<compile_context>
chip_gen: v6e
topology: v6e:2x2x1
jax: 0.10.0
libtpu: 0.0.40
codegen_flags: <defaults>
</compile_context>

<pallas_src>
import numpy as np
import jax
import jax.numpy as jnp
from jax.experimental import pallas as pl
from jax.experimental.pallas import tpu as pltpu

# ---------------- model hyper-parameters (small, consistent with __init__) ---
CHANNELS      = 4            # flow channels (must be even)
HIDDEN        = 32           # hidden_channels
KERNEL_SIZE   = 3            # WaveNet kernel size (odd)
DILATION_RATE = 2
N_LAYERS      = 2            # WaveNet layers per coupling block
N_FLOWS       = 4
HALF          = CHANNELS // 2
RES_LAYERS    = max(N_LAYERS - 1, 1)   # layers that have a residual branch
_CENTER       = (KERNEL_SIZE - 1) // 2
B, T          = 2, 16        # batch, sequence length

# gin_channels = 0  => g is None, cond_layer unused.
# TODO(synk): conditioning input `g` / cond_layer and the reverse (inverse)
# pass are not implemented (gin_channels=0 and reverse=False default path).
# TODO(synk): for production-sized T, tile the T axis (512-1024 rows per grid
# step with halo handling for the dilated taps) instead of (T, T) shift mats.


# ------------------------------ Pallas kernel --------------------------------
def _lane_reverse(a):
    """Reverse the (tiny) lane axis of a 2-D value via static unit-lane slices."""
    n = a.shape[1]
    if n == 1:
        return a
    return jnp.concatenate([a[:, j:j + 1] for j in range(n - 1, -1, -1)], axis=1)


def vpflow_kernel(x_ref, mask_ref, shift_ref,
                  w_pre_ref, b_pre_ref,
                  in_wt_ref, in_bt_ref, in_ws_ref, in_bs_ref,
                  res_w_ref, res_b_ref, skip_w_ref, skip_b_ref,
                  w_post_ref, b_post_ref,
                  out_ref):
    """All N_FLOWS x (ResidualCouplingLayer[mean_only=True] + Flip) for one row."""
    x = x_ref[0]                       # (T, C)
    mask = mask_ref[0]                 # (T, 1)
    x0 = x[:, :HALF]                   # (T, HALF)
    x1 = x[:, HALF:]                   # (T, HALF)

    for f in range(N_FLOWS):           # statically unrolled over flows
        # pre: 1x1 conv then mask
        h = (jnp.dot(x0, w_pre_ref[f], preferred_element_type=jnp.float32)
             + b_pre_ref[f]) * mask                                    # (T, H)

        skip_acc = jnp.zeros((T, HIDDEN), jnp.float32)

        # NonCausalWaveNet (g = None), statically unrolled
        for i in range(N_LAYERS):
            xt = in_bt_ref[f * N_LAYERS + i]                           # (1, H)
            xs = in_bs_ref[f * N_LAYERS + i]                           # (1, H)
            for k in range(KERNEL_SIZE):
                if k == _CENTER:
                    tap = h
                else:
                    # zero-padded dilated tap via constant band-shift matmul
                    tap = jnp.dot(shift_ref[i * KERNEL_SIZE + k], h,
                                  preferred_element_type=jnp.float32)  # (T, H)
                w_idx = (f * N_LAYERS + i) * KERNEL_SIZE + k
                xt = xt + jnp.dot(tap, in_wt_ref[w_idx],
                                  preferred_element_type=jnp.float32)
                xs = xs + jnp.dot(tap, in_ws_ref[w_idx],
                                  preferred_element_type=jnp.float32)
            # fused_add_tanh_sigmoid_multiply with g = 0
            acts = jnp.tanh(xt) * jax.nn.sigmoid(xs)                   # (T, H)
            skip_acc = skip_acc + (
                jnp.dot(acts, skip_w_ref[f * N_LAYERS + i],
                        preferred_element_type=jnp.float32)
                + skip_b_ref[f * N_LAYERS + i])
            if i < N_LAYERS - 1:                                       # residual branch
                res = (jnp.dot(acts, res_w_ref[f * RES_LAYERS + i],
                               preferred_element_type=jnp.float32)
                       + res_b_ref[f * RES_LAYERS + i])
                h = (h + res) * mask

        skip_acc = skip_acc * mask

        # post: 1x1 conv -> m   (mean_only=True  =>  logs == 0, exp(logs) == 1)
        m = (jnp.dot(skip_acc, w_post_ref[f],
                     preferred_element_type=jnp.float32)
             + b_post_ref[f]) * mask
        x1n = m + x1 * mask

        # Flip over the channel dim: [x0, x1n][:, ::-1]
        x0, x1 = _lane_reverse(x1n), _lane_reverse(x0)

    out_ref[0] = jnp.concatenate([x0, x1], axis=1)                     # (T, C)


def _build_shift_mats():
    """(N_LAYERS*K, T, T) band matrices: (S @ h)[t] = h[t + off] (0 outside)."""
    mats = np.zeros((N_LAYERS * KERNEL_SIZE, T, T), np.float32)
    for i in range(N_LAYERS):
        d = DILATION_RATE ** i
        for k in range(KERNEL_SIZE):
            off = d * (k - _CENTER)
            for t in range(T):
                u = t + off
                if 0 <= u < T:
                    mats[i * KERNEL_SIZE + k, t, u] = 1.0
    return jnp.asarray(mats)


def vpflow_forward(x_ncl, x_mask_ncl, p):
    """VPFlow.forward(x, x_mask, g=None, reverse=False).

    x_ncl: (B, C, T) float32 (torch NCL layout); x_mask_ncl: (B, 1, T)."""
    x = jnp.transpose(x_ncl, (0, 2, 1))          # (B, T, C)
    mask = jnp.transpose(x_mask_ncl, (0, 2, 1))  # (B, T, 1)
    shift = _build_shift_mats()

    H = HIDDEN
    # Flatten leading (flow, layer[, tap]) axes so in-kernel indexing is a
    # plain static first-axis index on a 3-D ref.
    in_wt = p["in_wt"].reshape(N_FLOWS * N_LAYERS * KERNEL_SIZE, H, H)
    in_ws = p["in_ws"].reshape(N_FLOWS * N_LAYERS * KERNEL_SIZE, H, H)
    in_bt = p["in_bt"].reshape(N_FLOWS * N_LAYERS, 1, H)
    in_bs = p["in_bs"].reshape(N_FLOWS * N_LAYERS, 1, H)
    res_w = p["res_w"].reshape(N_FLOWS * RES_LAYERS, H, H)
    res_b = p["res_b"].reshape(N_FLOWS * RES_LAYERS, 1, H)
    skip_w = p["skip_w"].reshape(N_FLOWS * N_LAYERS, H, H)
    skip_b = p["skip_b"].reshape(N_FLOWS * N_LAYERS, 1, H)

    def full(a):  # whole array as one block, DMA'd once (constant index_map)
        return pl.BlockSpec(a.shape, lambda b, _nd=a.ndim: (0,) * _nd)

    out = pl.pallas_call(
        vpflow_kernel,
        out_shape=jax.ShapeDtypeStruct((B, T, CHANNELS), jnp.float32),
        grid=(B,),
        in_specs=[
            pl.BlockSpec((1, T, CHANNELS), lambda b: (b, 0, 0)),       # x
            pl.BlockSpec((1, T, 1),        lambda b: (b, 0, 0)),       # mask
            full(shift),
            full(p["w_pre"]), full(p["b_pre"]),
            full(in_wt), full(in_bt), full(in_ws), full(in_bs),
            full(res_w), full(res_b), full(skip_w), full(skip_b),
            full(p["w_post"]), full(p["b_post"]),
        ],
        out_specs=pl.BlockSpec((1, T, CHANNELS), lambda b: (b, 0, 0)),
        compiler_params=pltpu.CompilerParams(
            dimension_semantics=("parallel",)),
    )(x, mask, shift,
      p["w_pre"], p["b_pre"],
      in_wt, in_bt, in_ws, in_bs,
      res_w, res_b, skip_w, skip_b,
      p["w_post"], p["b_post"])

    return jnp.transpose(out, (0, 2, 1))         # back to (B, C, T)


# ------------------------- parameter initialization --------------------------
def init_vpflow_params(key, scale=0.1):
    """Per-flow params stacked along a leading N_FLOWS axis.

    Gate weights are pre-split into tanh / sigmoid halves, and the res/skip
    1x1 conv into separate res (layers 0..n-2 only) and skip matrices — this
    matches how a real torch checkpoint would be repacked for this kernel."""
    ks = jax.random.split(key, 12)
    rnd = lambda k, shape: scale * jax.random.normal(k, shape, jnp.float32)
    return dict(
        w_pre=rnd(ks[0],  (N_FLOWS, HALF, HIDDEN)),
        b_pre=rnd(ks[1],  (N_FLOWS, 1, HIDDEN)),
        in_wt=rnd(ks[2],  (N_FLOWS, N_LAYERS, KERNEL_SIZE, HIDDEN, HIDDEN)),
        in_ws=rnd(ks[3],  (N_FLOWS, N_LAYERS, KERNEL_SIZE, HIDDEN, HIDDEN)),
        in_bt=rnd(ks[4],  (N_FLOWS, N_LAYERS, 1, HIDDEN)),
        in_bs=rnd(ks[5],  (N_FLOWS, N_LAYERS, 1, HIDDEN)),
        res_w=rnd(ks[6],  (N_FLOWS, RES_LAYERS, HIDDEN, HIDDEN)),
        res_b=rnd(ks[7],  (N_FLOWS, RES_LAYERS, 1, HIDDEN)),
        skip_w=rnd(ks[8], (N_FLOWS, N_LAYERS, HIDDEN, HIDDEN)),
        skip_b=rnd(ks[9], (N_FLOWS, N_LAYERS, 1, HIDDEN)),
        # Note: torch zero-inits `post` (identity coupling at init); we use
        # small random values so the kernel math is exercised non-trivially.
        w_post=rnd(ks[10], (N_FLOWS, HIDDEN, HALF)),
        b_post=rnd(ks[11], (N_FLOWS, 1, HALF)),
    )


# -------------------------- pure-JAX reference (check) -----------------------
def _vpflow_ref(x_ncl, x_mask_ncl, p):
    x = jnp.transpose(x_ncl, (0, 2, 1))          # (B, T, C)
    mask = jnp.transpose(x_mask_ncl, (0, 2, 1))  # (B, T, 1)
    for f in range(N_FLOWS):
        x0, x1 = x[..., :HALF], x[..., HALF:]
        h = (jnp.einsum("btc,ch->bth", x0, p["w_pre"][f]) + p["b_pre"][f]) * mask
        skip = jnp.zeros(h.shape, jnp.float32)
        for i in range(N_LAYERS):
            d = DILATION_RATE ** i
            pad = d * (KERNEL_SIZE - 1) // 2
            hp = jnp.pad(h, ((0, 0), (pad, pad), (0, 0)))
            xt = p["in_bt"][f, i]
            xs = p["in_bs"][f, i]
            for k in range(KERNEL_SIZE):
                tap = hp[:, k * d:k * d + T, :]
                xt = xt + jnp.einsum("bth,ho->bto", tap, p["in_wt"][f, i, k])
                xs = xs + jnp.einsum("bth,ho->bto", tap, p["in_ws"][f, i, k])
            acts = jnp.tanh(xt) * jax.nn.sigmoid(xs)
            skip = skip + (jnp.einsum("bth,ho->bto", acts, p["skip_w"][f, i])
                           + p["skip_b"][f, i])
            if i < N_LAYERS - 1:
                res = (jnp.einsum("bth,ho->bto", acts, p["res_w"][f, i])
                       + p["res_b"][f, i])
                h = (h + res) * mask
        skip = skip * mask
        m = (jnp.einsum("bth,hc->btc", skip, p["w_post"][f]) + p["b_post"][f]) * mask
        x = jnp.concatenate([x0, m + x1 * mask], axis=-1)
        x = jnp.flip(x, axis=-1)                 # Flip over the channel dim
    return jnp.transpose(x, (0, 2, 1))


# ------------------------------------ main ------------------------------------
if __name__ == "__main__":
    key = jax.random.PRNGKey(0)
    kx, kp = jax.random.split(key)

    x = jax.random.normal(kx, (B, CHANNELS, T), jnp.float32)          # (B, C, T)
    lengths = jnp.array([T, T - 4])
    x_mask = (jnp.arange(T)[None, None, :] <
              lengths[:, None, None]).astype(jnp.float32)             # (B, 1, T)

    params = init_vpflow_params(kp)

    out = jax.block_until_ready(vpflow_forward(x, x_mask, params))
    ref = jax.block_until_ready(_vpflow_ref(x, x_mask, params))
    np.testing.assert_allclose(np.asarray(out), np.asarray(ref),
                               rtol=1e-3, atol=1e-3)
    print("KERNEL_OK")
</pallas_src>

<mosaic_0001>
module attributes {stable_mosaic.version = 11 : i64} {
  func.func @vpflow_kernel(%arg0: i32, %arg1: memref<1x16x4xf32, #tpu.memory_space<vmem>>, %arg2: memref<1x16x1xf32, #tpu.memory_space<vmem>>, %arg3: memref<6x16x16xf32, #tpu.memory_space<vmem>>, %arg4: memref<4x2x32xf32, #tpu.memory_space<vmem>>, %arg5: memref<4x1x32xf32, #tpu.memory_space<vmem>>, %arg6: memref<24x32x32xf32, #tpu.memory_space<vmem>>, %arg7: memref<8x1x32xf32, #tpu.memory_space<vmem>>, %arg8: memref<24x32x32xf32, #tpu.memory_space<vmem>>, %arg9: memref<8x1x32xf32, #tpu.memory_space<vmem>>, %arg10: memref<4x32x32xf32, #tpu.memory_space<vmem>>, %arg11: memref<4x1x32xf32, #tpu.memory_space<vmem>>, %arg12: memref<8x32x32xf32, #tpu.memory_space<vmem>>, %arg13: memref<8x1x32xf32, #tpu.memory_space<vmem>>, %arg14: memref<4x32x2xf32, #tpu.memory_space<vmem>>, %arg15: memref<4x1x2xf32, #tpu.memory_space<vmem>>, %arg16: memref<1x16x4xf32, #tpu.memory_space<vmem>>) attributes {dimension_semantics = [#tpu.dimension_semantics<parallel>], iteration_bounds = array<i64: 2>, scalar_prefetch = 0 : i64, scratch_operands = 0 : i64, tpu.core_type = #tpu.core_type<tc>, window_params = [{transform_indices = @transform_0, window_bounds = array<i64: 1, 16, 4>}, {transform_indices = @transform_1, window_bounds = array<i64: 1, 16, 1>}, {pipeline_mode = #tpu.pipeline_mode<synchronous>, transform_indices = @transform_2, window_bounds = array<i64: 6, 16, 16>}, {pipeline_mode = #tpu.pipeline_mode<synchronous>, transform_indices = @transform_3, window_bounds = array<i64: 4, 2, 32>}, {pipeline_mode = #tpu.pipeline_mode<synchronous>, transform_indices = @transform_4, window_bounds = array<i64: 4, 1, 32>}, {pipeline_mode = #tpu.pipeline_mode<synchronous>, transform_indices = @transform_5, window_bounds = array<i64: 24, 32, 32>}, {pipeline_mode = #tpu.pipeline_mode<synchronous>, transform_indices = @transform_6, window_bounds = array<i64: 8, 1, 32>}, {pipeline_mode = #tpu.pipeline_mode<synchronous>, transform_indices = @transform_7, window_bounds = array<i64: 24, 32, 32>}, {pipeline_mode = #tpu.pipeline_mode<synchronous>, transform_indices = @transform_8, window_bounds = array<i64: 8, 1, 32>}, {pipeline_mode = #tpu.pipeline_mode<synchronous>, transform_indices = @transform_9, window_bounds = array<i64: 4, 32, 32>}, {pipeline_mode = #tpu.pipeline_mode<synchronous>, transform_indices = @transform_10, window_bounds = array<i64: 4, 1, 32>}, {pipeline_mode = #tpu.pipeline_mode<synchronous>, transform_indices = @transform_11, window_bounds = array<i64: 8, 32, 32>}, {pipeline_mode = #tpu.pipeline_mode<synchronous>, transform_indices = @transform_12, window_bounds = array<i64: 8, 1, 32>}, {pipeline_mode = #tpu.pipeline_mode<synchronous>, transform_indices = @transform_13, window_bounds = array<i64: 4, 32, 2>}, {pipeline_mode = #tpu.pipeline_mode<synchronous>, transform_indices = @transform_14, window_bounds = array<i64: 4, 1, 2>}, {transform_indices = @transform_15, window_bounds = array<i64: 1, 16, 4>}]} {
    %c0 = arith.constant 0 : index
    %c0_0 = arith.constant 0 : index
    %c0_1 = arith.constant 0 : index
    %0 = vector.load %arg1[%c0, %c0_0, %c0_1] : memref<1x16x4xf32, #tpu.memory_space<vmem>>, vector<1x16x4xf32>
    %1 = vector.shape_cast %0 : vector<1x16x4xf32> to vector<16x4xf32>
    %c0_2 = arith.constant 0 : index
    %c0_3 = arith.constant 0 : index
    %c0_4 = arith.constant 0 : index
    %2 = vector.load %arg2[%c0_2, %c0_3, %c0_4] : memref<1x16x1xf32, #tpu.memory_space<vmem>>, vector<1x16x1xf32>
    %3 = vector.shape_cast %2 : vector<1x16x1xf32> to vector<16x1xf32>
    %4 = vector.extract_strided_slice %1 {offsets = [0, 0], sizes = [16, 2], strides = [1, 1]} : vector<16x4xf32> to vector<16x2xf32>
    %5 = vector.extract_strided_slice %1 {offsets = [0, 2], sizes = [16, 2], strides = [1, 1]} : vector<16x4xf32> to vector<16x2xf32>
    %c0_5 = arith.constant 0 : index
    %c0_6 = arith.constant 0 : index
    %c0_7 = arith.constant 0 : index
    %6 = vector.load %arg4[%c0_5, %c0_6, %c0_7] : memref<4x2x32xf32, #tpu.memory_space<vmem>>, vector<1x2x32xf32>
    %7 = vector.shape_cast %6 : vector<1x2x32xf32> to vector<2x32xf32>
    %cst = arith.constant dense<0.000000e+00> : vector<16x32xf32>
    %8 = tpu.matmul %4, %7, %cst {dimension_numbers = #tpu.dot_dimension_numbers<[1], [0], [0], [1], [0, 0, 1, 1], [], []>} : vector<16x2xf32>, vector<2x32xf32>, vector<16x32xf32> -> vector<16x32xf32>
    %c0_8 = arith.constant 0 : index
    %c0_9 = arith.constant 0 : index
    %c0_10 = arith.constant 0 : index
    %9 = vector.load %arg5[%c0_8, %c0_9, %c0_10] : memref<4x1x32xf32, #tpu.memory_space<vmem>>, vector<1x1x32xf32>
    %10 = vector.shape_cast %9 : vector<1x1x32xf32> to vector<1x32xf32>
    %11 = vector.broadcast %10 : vector<1x32xf32> to vector<16x32xf32>
    %12 = arith.addf %8, %11 : vector<16x32xf32>
    %13 = vector.broadcast %3 : vector<16x1xf32> to vector<16x32xf32>
    %14 = arith.mulf %12, %13 : vector<16x32xf32>
    %cst_11 = arith.constant 0.000000e+00 : f32
    %15 = vector.broadcast %cst_11 : f32 to vector<16x32xf32>
    %c0_12 = arith.constant 0 : index
    %c0_13 = arith.constant 0 : index
    %c0_14 = arith.constant 0 : index
    %16 = vector.load %arg7[%c0_12, %c0_13, %c0_14] : memref<8x1x32xf32, #tpu.memory_space<vmem>>, vector<1x1x32xf32>
    %17 = vector.shape_cast %16 : vector<1x1x32xf32> to vector<1x32xf32>
    %c0_15 = arith.constant 0 : index
    %c0_16 = arith.constant 0 : index
    %c0_17 = arith.constant 0 : index
    %18 = vector.load %arg9[%c0_15, %c0_16, %c0_17] : memref<8x1x32xf32, #tpu.memory_space<vmem>>, vector<1x1x32xf32>
    %19 = vector.shape_cast %18 : vector<1x1x32xf32> to vector<1x32xf32>
    %c0_18 = arith.constant 0 : index
    %c0_19 = arith.constant 0 : index
    %c0_20 = arith.constant 0 : index
    %20 = vector.load %arg3[%c0_18, %c0_19, %c0_20] : memref<6x16x16xf32, #tpu.memory_space<vmem>>, vector<1x16x16xf32>
    %21 = vector.shape_cast %20 : vector<1x16x16xf32> to vector<16x16xf32>
    %cst_21 = arith.constant dense<0.000000e+00> : vector<16x32xf32>
    %22 = tpu.matmul %21, %14, %cst_21 {dimension_numbers = #tpu.dot_dimension_numbers<[1], [0], [0], [1], [0, 0, 1, 1], [], []>} : vector<16x16xf32>, vector<16x32xf32>, vector<16x32xf32> -> vector<16x32xf32>
    %c0_22 = arith.constant 0 : index
    %c0_23 = arith.constant 0 : index
    %c0_24 = arith.constant 0 : index
    %23 = vector.load %arg6[%c0_22, %c0_23, %c0_24] : memref<24x32x32xf32, #tpu.memory_space<vmem>>, vector<1x32x32xf32>
    %24 = vector.shape_cast %23 : vector<1x32x32xf32> to vector<32x32xf32>
    %cst_25 = arith.constant dense<0.000000e+00> : vector<16x32xf32>
    %25 = tpu.matmul %22, %24, %cst_25 {dimension_numbers = #tpu.dot_dimension_numbers<[1], [0], [0], [1], [0, 0, 1, 1], [], []>} : vector<16x32xf32>, vector<32x32xf32>, vector<16x32xf32> -> vector<16x32xf32>
    %26 = vector.broadcast %17 : vector<1x32xf32> to vector<16x32xf32>
    %27 = arith.addf %26, %25 : vector<16x32xf32>
    %c0_26 = arith.constant 0 : index
    %c0_27 = arith.constant 0 : index
    %c0_28 = arith.constant 0 : index
    %28 = vector.load %arg8[%c0_26, %c0_27, %c0_28] : memref<24x32x32xf32, #tpu.memory_space<vmem>>, vector<1x32x32xf32>
    %29 = vector.shape_cast %28 : vector<1x32x32xf32> to vector<32x32xf32>
    %cst_29 = arith.constant dense<0.000000e+00> : vector<16x32xf32>
    %30 = tpu.matmul %22, %29, %cst_29 {dimension_numbers = #tpu.dot_dimension_numbers<[1], [0], [0], [1], [0, 0, 1, 1], [], []>} : vector<16x32xf32>, vector<32x32xf32>, vector<16x32xf32> -> vector<16x32xf32>
    %31 = vector.broadcast %19 : vector<1x32xf32> to vector<16x32xf32>
    %32 = arith.addf %31, %30 : vector<16x32xf32>
    %c1 = arith.constant 1 : index
    %c0_30 = arith.constant 0 : index
    %c0_31 = arith.constant 0 : index
    %33 = vector.load %arg6[%c1, %c0_30, %c0_31] : memref<24x32x32xf32, #tpu.memory_space<vmem>>, vector<1x32x32xf32>
    %34 = vector.shape_cast %33 : vector<1x32x32xf32> to vector<32x32xf32>
    %cst_32 = arith.constant dense<0.000000e+00> : vector<16x32xf32>
    %35 = tpu.matmul %14, %34, %cst_32 {dimension_numbers = #tpu.dot_dimension_numbers<[1], [0], [0], [1], [0, 0, 1, 1], [], []>} : vector<16x32xf32>, vector<32x32xf32>, vector<16x32xf32> -> vector<16x32xf32>
    %36 = arith.addf %27, %35 : vector<16x32xf32>
    %c1_33 = arith.constant 1 : index
    %c0_34 = arith.constant 0 : index
    %c0_35 = arith.constant 0 : index
    %37 = vector.load %arg8[%c1_33, %c0_34, %c0_35] : memref<24x32x32xf32, #tpu.memory_space<vmem>>, vector<1x32x32xf32>
    %38 = vector.shape_cast %37 : vector<1x32x32xf32> to vector<32x32xf32>
    %cst_36 = arith.constant dense<0.000000e+00> : vector<16x32xf32>
    %39 = tpu.matmul %14, %38, %cst_36 {dimension_numbers = #tpu.dot_dimension_numbers<[1], [0], [0], [1], [0, 0, 1, 1], [], []>} : vector<16x32xf32>, vector<32x32xf32>, vector<16x32xf32> -> vector<16x32xf32>
    %40 = arith.addf %32, %39 : vector<16x32xf32>
    %c2 = arith.constant 2 : index
    %c0_37 = arith.constant 0 : index
    %c0_38 = arith.constant 0 : index
    %41 = vector.load %arg3[%c2, %c0_37, %c0_38] : memref<6x16x16xf32, #tpu.memory_space<vmem>>, vector<1x16x16xf32>
    %42 = vector.shape_cast %41 : vector<1x16x16xf32> to vector<16x16xf32>
    %cst_39 = arith.constant dense<0.000000e+00> : vector<16x32xf32>
    %43 = tpu.matmul %42, %14, %cst_39 {dimension_numbers = #tpu.dot_dimension_numbers<[1], [0], [0], [1], [0, 0, 1, 1], [], []>} : vector<16x16xf32>, vector<16x32xf32>, vector<16x32xf32> -> vector<16x32xf32>
    %c2_40 = arith.constant 2 : index
    %c0_41 = arith.constant 0 : index
    %c0_42 = arith.constant 0 : index
    %44 = vector.load %arg6[%c2_40, %c0_41, %c0_42] : memref<24x32x32xf32, #tpu.memory_space<vmem>>, vector<1x32x32xf32>
    %45 = vector.shape_cast %44 : vector<1x32x32xf32> to vector<32x32xf32>
    %cst_43 = arith.constant dense<0.000000e+00> : vector<16x32xf32>
    %46 = tpu.matmul %43, %45, %cst_43 {dimension_numbers = #tpu.dot_dimension_numbers<[1], [0], [0], [1], [0, 0, 1, 1], [], []>} : vector<16x32xf32>, vector<32x32xf32>, vector<16x32xf32> -> vector<16x32xf32>
    %47 = arith.addf %36, %46 : vector<16x32xf32>
    %c2_44 = arith.constant 2 : index
    %c0_45 = arith.constant 0 : index
    %c0_46 = arith.constant 0 : index
    %48 = vector.load %arg8[%c2_44, %c0_45, %c0_46] : memref<24x32x32xf32, #tpu.memory_space<vmem>>, vector<1x32x32xf32>
    %49 = vector.shape_cast %48 : vector<1x32x32xf32> to vector<32x32xf32>
    %cst_47 = arith.constant dense<0.000000e+00> : vector<16x32xf32>
    %50 = tpu.matmul %43, %49, %cst_47 {dimension_numbers = #tpu.dot_dimension_numbers<[1], [0], [0], [1], [0, 0, 1, 1], [], []>} : vector<16x32xf32>, vector<32x32xf32>, vector<16x32xf32> -> vector<16x32xf32>
    %51 = arith.addf %40, %50 : vector<16x32xf32>
    %52 = math.tanh %47 : vector<16x32xf32>
    %53 = arith.negf %51 : vector<16x32xf32>
    %54 = math.exp %53 : vector<16x32xf32>
    %cst_48 = arith.constant 1.000000e+00 : f32
    %55 = vector.broadcast %cst_48 : f32 to vector<16x32xf32>
    %56 = arith.addf %55, %54 : vector<16x32xf32>
    %57 = arith.divf %55, %56 : vector<16x32xf32>
    %58 = arith.mulf %52, %57 : vector<16x32xf32>
    %c0_49 = arith.constant 0 : index
    %c0_50 = arith.constant 0 : index
    %c0_51 = arith.constant 0 : index
    %59 = vector.load %arg12[%c0_49, %c0_50, %c0_51] : memref<8x32x32xf32, #tpu.memory_space<vmem>>, vector<1x32x32xf32>
    %60 = vector.shape_cast %59 : vector<1x32x32xf32> to vector<32x32xf32>
    %cst_52 = arith.constant dense<0.000000e+00> : vector<16x32xf32>
    %61 = tpu.matmul %58, %60, %cst_52 {dimension_numbers = #tpu.dot_dimension_numbers<[1], [0], [0], [1], [0, 0, 1, 1], [], []>} : vector<16x32xf32>, vector<32x32xf32>, vector<16x32xf32> -> vector<16x32xf32>
    %c0_53 = arith.constant 0 : index
    %c0_54 = arith.constant 0 : index
    %c0_55 = arith.constant 0 : index
    %62 = vector.load %arg13[%c0_53, %c0_54, %c0_55] : memref<8x1x32xf32, #tpu.memory_space<vmem>>, vector<1x1x32xf32>
    %63 = vector.shape_cast %62 : vector<1x1x32xf32> to vector<1x32xf32>
    %64 = vector.broadcast %63 : vector<1x32xf32> to vector<16x32xf32>
    %65 = arith.addf %61, %64 : vector<16x32xf32>
    %66 = arith.addf %15, %65 : vector<16x32xf32>
    %c0_56 = arith.constant 0 : index
    %c0_57 = arith.constant 0 : index
    %c0_58 = arith.constant 0 : index
    %67 = vector.load %arg10[%c0_56, %c0_57, %c0_58] : memref<4x32x32xf32, #tpu.memory_space<vmem>>, vector<1x32x32xf32>
    %68 = vector.shape_cast %67 : vector<1x32x32xf32> to vector<32x32xf32>
    %cst_59 = arith.constant dense<0.000000e+00> : vector<16x32xf32>
    %69 = tpu.matmul %58, %68, %cst_59 {dimension_numbers = #tpu.dot_dimension_numbers<[1], [0], [0], [1], [0, 0, 1, 1], [], []>} : vector<16x32xf32>, vector<32x32xf32>, vector<16x32xf32> -> vector<16x32xf32>
    %c0_60 = arith.constant 0 : index
    %c0_61 = arith.constant 0 : index
    %c0_62 = arith.constant 0 : index
    %70 = vector.load %arg11[%c0_60, %c0_61, %c0_62] : memref<4x1x32xf32, #tpu.memory_space<vmem>>, vector<1x1x32xf32>
    %71 = vector.shape_cast %70 : vector<1x1x32xf32> to vector<1x32xf32>
    %72 = vector.broadcast %71 : vector<1x32xf32> to vector<16x32xf32>
    %73 = arith.addf %69, %72 : vector<16x32xf32>
    %74 = arith.addf %14, %73 : vector<16x32xf32>
    %75 = vector.broadcast %3 : vector<16x1xf32> to vector<16x32xf32>
    %76 = arith.mulf %74, %75 : vector<16x32xf32>
    %c1_63 = arith.constant 1 : index
    %c0_64 = arith.constant 0 : index
    %c0_65 = arith.constant 0 : index
    %77 = vector.load %arg7[%c1_63, %c0_64, %c0_65] : memref<8x1x32xf32, #tpu.memory_space<vmem>>, vector<1x1x32xf32>
    %78 = vector.shape_cast %77 : vector<1x1x32xf32> to vector<1x32xf32>
    %c1_66 = arith.constant 1 : index
    %c0_67 = arith.constant 0 : index
    %c0_68 = arith.constant 0 : index
    %79 = vector.load %arg9[%c1_66, %c0_67, %c0_68] : memref<8x1x32xf32, #tpu.memory_space<vmem>>, vector<1x1x32xf32>
    %80 = vector.shape_cast %79 : vector<1x1x32xf32> to vector<1x32xf32>
    %c3 = arith.constant 3 : index
    %c0_69 = arith.constant 0 : index
    %c0_70 = arith.constant 0 : index
    %81 = vector.load %arg3[%c3, %c0_69, %c0_70] : memref<6x16x16xf32, #tpu.memory_space<vmem>>, vector<1x16x16xf32>
    %82 = vector.shape_cast %81 : vector<1x16x16xf32> to vector<16x16xf32>
    %cst_71 = arith.constant dense<0.000000e+00> : vector<16x32xf32>
    %83 = tpu.matmul %82, %76, %cst_71 {dimension_numbers = #tpu.dot_dimension_numbers<[1], [0], [0], [1], [0, 0, 1, 1], [], []>} : vector<16x16xf32>, vector<16x32xf32>, vector<16x32xf32> -> vector<16x32xf32>
    %c3_72 = arith.constant 3 : index
    %c0_73 = arith.constant 0 : index
    %c0_74 = arith.constant 0 : index
    %84 = vector.load %arg6[%c3_72, %c0_73, %c0_74] : memref<24x32x32xf32, #tpu.memory_space<vmem>>, vector<1x32x32xf32>
    %85 = vector.shape_cast %84 : vector<1x32x32xf32> to vector<32x32xf32>
    %cst_75 = arith.constant dense<0.000000e+00> : vector<16x32xf32>
    %86 = tpu.matmul %83, %85, %cst_75 {dimension_numbers = #tpu.dot_dimension_numbers<[1], [0], [0], [1], [0, 0, 1, 1], [], []>} : vector<16x32xf32>, vector<32x32xf32>, vector<16x32xf32> -> vector<16x32xf32>
    %87 = vector.broadcast %78 : vector<1x32xf32> to vector<16x32xf32>
    %88 = arith.addf %87, %86 : vector<16x32xf32>
    %c3_76 = arith.constant 3 : index
    %c0_77 = arith.constant 0 : index
    %c0_78 = arith.constant 0 : index
    %89 = vector.load %arg8[%c3_76, %c0_77, %c0_78] : memref<24x32x32xf32, #tpu.memory_space<vmem>>, vector<1x32x32xf32>
    %90 = vector.shape_cast %89 : vector<1x32x32xf32> to vector<32x32xf32>
    %cst_79 = arith.constant dense<0.000000e+00> : vector<16x32xf32>
    %91 = tpu.matmul %83, %90, %cst_79 {dimension_numbers = #tpu.dot_dimension_numbers<[1], [0], [0], [1], [0, 0, 1, 1], [], []>} : vector<16x32xf32>, vector<32x32xf32>, vector<16x32xf32> -> vector<16x32xf32>
    %92 = vector.broadcast %80 : vector<1x32xf32> to vector<16x32xf32>
    %93 = arith.addf %92, %91 : vector<16x32xf32>
    %c4 = arith.constant 4 : index
    %c0_80 = arith.constant 0 : index
    %c0_81 = arith.constant 0 : index
    %94 = vector.load %arg6[%c4, %c0_80, %c0_81] : memref<24x32x32xf32, #tpu.memory_space<vmem>>, vector<1x32x32xf32>
    %95 = vector.shape_cast %94 : vector<1x32x32xf32> to vector<32x32xf32>
    %cst_82 = arith.constant dense<0.000000e+00> : vector<16x32xf32>
    %96 = tpu.matmul %76, %95, %cst_82 {dimension_numbers = #tpu.dot_dimension_numbers<[1], [0], [0], [1], [0, 0, 1, 1], [], []>} : vector<16x32xf32>, vector<32x32xf32>, vector<16x32xf32> -> vector<16x32xf32>
    %97 = arith.addf %88, %96 : vector<16x32xf32>
    %c4_83 = arith.constant 4 : index
    %c0_84 = arith.constant 0 : index
    %c0_85 = arith.constant 0 : index
    %98 = vector.load %arg8[%c4_83, %c0_84, %c0_85] : memref<24x32x32xf32, #tpu.memory_space<vmem>>, vector<1x32x32xf32>
    %99 = vector.shape_cast %98 : vector<1x32x32xf32> to vector<32x32xf32>
    %cst_86 = arith.constant dense<0.000000e+00> : vector<16x32xf32>
    %100 = tpu.matmul %76, %99, %cst_86 {dimension_numbers = #tpu.dot_dimension_numbers<[1], [0], [0], [1], [0, 0, 1, 1], [], []>} : vector<16x32xf32>, vector<32x32xf32>, vector<16x32xf32> -> vector<16x32xf32>
    %101 = arith.addf %93, %100 : vector<16x32xf32>
    %c5 = arith.constant 5 : index
    %c0_87 = arith.constant 0 : index
    %c0_88 = arith.constant 0 : index
    %102 = vector.load %arg3[%c5, %c0_87, %c0_88] : memref<6x16x16xf32, #tpu.memory_space<vmem>>, vector<1x16x16xf32>
    %103 = vector.shape_cast %102 : vector<1x16x16xf32> to vector<16x16xf32>
    %cst_89 = arith.constant dense<0.000000e+00> : vector<16x32xf32>
    %104 = tpu.matmul %103, %76, %cst_89 {dimension_numbers = #tpu.dot_dimension_numbers<[1], [0], [0], [1], [0, 0, 1, 1], [], []>} : vector<16x16xf32>, vector<16x32xf32>, vector<16x32xf32> -> vector<16x32xf32>
    %c5_90 = arith.constant 5 : index
    %c0_91 = arith.constant 0 : index
    %c0_92 = arith.constant 0 : index
    %105 = vector.load %arg6[%c5_90, %c0_91, %c0_92] : memref<24x32x32xf32, #tpu.memory_space<vmem>>, vector<1x32x32xf32>
    %106 = vector.shape_cast %105 : vector<1x32x32xf32> to vector<32x32xf32>
    %cst_93 = arith.constant dense<0.000000e+00> : vector<16x32xf32>
    %107 = tpu.matmul %104, %106, %cst_93 {dimension_numbers = #tpu.dot_dimension_numbers<[1], [0], [0], [1], [0, 0, 1, 1], [], []>} : vector<16x32xf32>, vector<32x32xf32>, vector<16x32xf32> -> vector<16x32xf32>
    %108 = arith.addf %97, %107 : vector<16x32xf32>
    %c5_94 = arith.constant 5 : index
    %c0_95 = arith.constant 0 : index
    %c0_96 = arith.constant 0 : index
    %109 = vector.load %arg8[%c5_94, %c0_95, %c0_96] : memref<24x32x32xf32, #tpu.memory_space<vmem>>, vector<1x32x32xf32>
    %110 = vector.shape_cast %109 : vector<1x32x32xf32> to vector<32x32xf32>
    %cst_97 = arith.constant dense<0.000000e+00> : vector<16x32xf32>
    %111 = tpu.matmul %104, %110, %cst_97 {dimension_numbers = #tpu.dot_dimension_numbers<[1], [0], [0], [1], [0, 0, 1, 1], [], []>} : vector<16x32xf32>, vector<32x32xf32>, vector<16x32xf32> -> vector<16x32xf32>
    %112 = arith.addf %101, %111 : vector<16x32xf32>
    %113 = math.tanh %108 : vector<16x32xf32>
    %114 = arith.negf %112 : vector<16x32xf32>
    %115 = math.exp %114 : vector<16x32xf32>
    %cst_98 = arith.constant 1.000000e+00 : f32
    %116 = vector.broadcast %cst_98 : f32 to vector<16x32xf32>
    %117 = arith.addf %116, %115 : vector<16x32xf32>
    %118 = arith.divf %116, %117 : vector<16x32xf32>
    %119 = arith.mulf %113, %118 : vector<16x32xf32>
    %c1_99 = arith.constant 1 : index
    %c0_100 = arith.constant 0 : index
    %c0_101 = arith.constant 0 : index
    %120 = vector.load %arg12[%c1_99, %c0_100, %c0_101] : memref<8x32x32xf32, #tpu.memory_space<vmem>>, vector<1x32x32xf32>
    %121 = vector.shape_cast %120 : vector<1x32x32xf32> to vector<32x32xf32>
    %cst_102 = arith.constant dense<0.000000e+00> : vector<16x32xf32>
    %122 = tpu.matmul %119, %121, %cst_102 {dimension_numbers = #tpu.dot_dimension_numbers<[1], [0], [0], [1], [0, 0, 1, 1], [], []>} : vector<16x32xf32>, vector<32x32xf32>, vector<16x32xf32> -> vector<16x32xf32>
    %c1_103 = arith.constant 1 : index
    %c0_104 = arith.constant 0 : index
    %c0_105 = arith.constant 0 : index
    %123 = vector.load %arg13[%c1_103, %c0_104, %c0_105] : memref<8x1x32xf32, #tpu.memory_space<vmem>>, vector<1x1x32xf32>
    %124 = vector.shape_cast %123 : vector<1x1x32xf32> to vector<1x32xf32>
    %125 = vector.broadcast %124 : vector<1x32xf32> to vector<16x32xf32>
    %126 = arith.addf %122, %125 : vector<16x32xf32>
    %127 = arith.addf %66, %126 : vector<16x32xf32>
    %128 = vector.broadcast %3 : vector<16x1xf32> to vector<16x32xf32>
    %129 = arith.mulf %127, %128 : vector<16x32xf32>
    %c0_106 = arith.constant 0 : index
    %c0_107 = arith.constant 0 : index
    %c0_108 = arith.constant 0 : index
    %130 = vector.load %arg14[%c0_106, %c0_107, %c0_108] : memref<4x32x2xf32, #tpu.memory_space<vmem>>, vector<1x32x2xf32>
    %131 = vector.shape_cast %130 : vector<1x32x2xf32> to vector<32x2xf32>
    %cst_109 = arith.constant dense<0.000000e+00> : vector<16x2xf32>
    %132 = tpu.matmul %129, %131, %cst_109 {dimension_numbers = #tpu.dot_dimension_numbers<[1], [0], [0], [1], [0, 0, 1, 1], [], []>} : vector<16x32xf32>, vector<32x2xf32>, vector<16x2xf32> -> vector<16x2xf32>
    %c0_110 = arith.constant 0 : index
    %c0_111 = arith.constant 0 : index
    %c0_112 = arith.constant 0 : index
    %133 = vector.load %arg15[%c0_110, %c0_111, %c0_112] : memref<4x1x2xf32, #tpu.memory_space<vmem>>, vector<1x1x2xf32>
    %134 = vector.shape_cast %133 : vector<1x1x2xf32> to vector<1x2xf32>
    %135 = vector.broadcast %134 : vector<1x2xf32> to vector<16x2xf32>
    %136 = arith.addf %132, %135 : vector<16x2xf32>
    %137 = vector.broadcast %3 : vector<16x1xf32> to vector<16x2xf32>
    %138 = arith.mulf %136, %137 : vector<16x2xf32>
    %139 = vector.broadcast %3 : vector<16x1xf32> to vector<16x2xf32>
    %140 = arith.mulf %5, %139 : vector<16x2xf32>
    %141 = arith.addf %138, %140 : vector<16x2xf32>
    %142 = vector.extract_strided_slice %141 {offsets = [0, 1], sizes = [16, 1], strides = [1, 1]} : vector<16x2xf32> to vector<16x1xf32>
    %143 = vector.extract_strided_slice %141 {offsets = [0, 0], sizes = [16, 1], strides = [1, 1]} : vector<16x2xf32> to vector<16x1xf32>
    %144 = tpu.concatenate %142, %143 in 1 : vector<16x1xf32>, vector<16x1xf32> -> vector<16x2xf32>
    %145 = vector.extract_strided_slice %4 {offsets = [0, 1], sizes = [16, 1], strides = [1, 1]} : vector<16x2xf32> to vector<16x1xf32>
    %146 = vector.extract_strided_slice %4 {offsets = [0, 0], sizes = [16, 1], strides = [1, 1]} : vector<16x2xf32> to vector<16x1xf32>
    %147 = tpu.concatenate %145, %146 in 1 : vector<16x1xf32>, vector<16x1xf32> -> vector<16x2xf32>
    %c1_113 = arith.constant 1 : index
    %c0_114 = arith.constant 0 : index
    %c0_115 = arith.constant 0 : index
    %148 = vector.load %arg4[%c1_113, %c0_114, %c0_115] : memref<4x2x32xf32, #tpu.memory_space<vmem>>, vector<1x2x32xf32>
    %149 = vector.shape_cast %148 : vector<1x2x32xf32> to vector<2x32xf32>
    %cst_116 = arith.constant dense<0.000000e+00> : vector<16x32xf32>
    %150 = tpu.matmul %144, %149, %cst_116 {dimension_numbers = #tpu.dot_dimension_numbers<[1], [0], [0], [1], [0, 0, 1, 1], [], []>} : vector<16x2xf32>, vector<2x32xf32>, vector<16x32xf32> -> vector<16x32xf32>
    %c1_117 = arith.constant 1 : index
    %c0_118 = arith.constant 0 : index
    %c0_119 = arith.constant 0 : index
    %151 = vector.load %arg5[%c1_117, %c0_118, %c0_119] : memref<4x1x32xf32, #tpu.memory_space<vmem>>, vector<1x1x32xf32>
    %152 = vector.shape_cast %151 : vector<1x1x32xf32> to vector<1x32xf32>
    %153 = vector.broadcast %152 : vector<1x32xf32> to vector<16x32xf32>
    %154 = arith.addf %150, %153 : vector<16x32xf32>
    %155 = vector.broadcast %3 : vector<16x1xf32> to vector<16x32xf32>
    %156 = arith.mulf %154, %155 : vector<16x32xf32>
    %cst_120 = arith.constant 0.000000e+00 : f32
    %157 = vector.broadcast %cst_120 : f32 to vector<16x32xf32>
    %c2_121 = arith.constant 2 : index
    %c0_122 = arith.constant 0 : index
    %c0_123 = arith.constant 0 : index
    %158 = vector.load %arg7[%c2_121, %c0_122, %c0_123] : memref<8x1x32xf32, #tpu.memory_space<vmem>>, vector<1x1x32xf32>
    %159 = vector.shape_cast %158 : vector<1x1x32xf32> to vector<1x32xf32>
    %c2_124 = arith.constant 2 : index
    %c0_125 = arith.constant 0 : index
    %c0_126 = arith.constant 0 : index
    %160 = vector.load %arg9[%c2_124, %c0_125, %c0_126] : memref<8x1x32xf32, #tpu.memory_space<vmem>>, vector<1x1x32xf32>
    %161 = vector.shape_cast %160 : vector<1x1x32xf32> to vector<1x32xf32>
    %c0_127 = arith.constant 0 : index
    %c0_128 = arith.constant 0 : index
    %c0_129 = arith.constant 0 : index
    %162 = vector.load %arg3[%c0_127, %c0_128, %c0_129] : memref<6x16x16xf32, #tpu.memory_space<vmem>>, vector<1x16x16xf32>
    %163 = vector.shape_cast %162 : vector<1x16x16xf32> to vector<16x16xf32>
    %cst_130 = arith.constant dense<0.000000e+00> : vector<16x32xf32>
    %164 = tpu.matmul %163, %156, %cst_130 {dimension_numbers = #tpu.dot_dimension_numbers<[1], [0], [0], [1], [0, 0, 1, 1], [], []>} : vector<16x16xf32>, vector<16x32xf32>, vector<16x32xf32> -> vector<16x32xf32>
    %c6 = arith.constant 6 : index
    %c0_131 = arith.constant 0 : index
    %c0_132 = arith.constant 0 : index
    %165 = vector.load %arg6[%c6, %c0_131, %c0_132] : memref<24x32x32xf32, #tpu.memory_space<vmem>>, vector<1x32x32xf32>
    %166 = vector.shape_cast %165 : vector<1x32x32xf32> to vector<32x32xf32>
    %cst_133 = arith.constant dense<0.000000e+00> : vector<16x32xf32>
    %167 = tpu.matmul %164, %166, %cst_133 {dimension_numbers = #tpu.dot_dimension_numbers<[1], [0], [0], [1], [0, 0, 1, 1], [], []>} : vector<16x32xf32>, vector<32x32xf32>, vector<16x32xf32> -> vector<16x32xf32>
    %168 = vector.broadcast %159 : vector<1x32xf32> to vector<16x32xf32>
    %169 = arith.addf %168, %167 : vector<16x32xf32>
    %c6_134 = arith.constant 6 : index
    %c0_135 = arith.constant 0 : index
    %c0_136 = arith.constant 0 : index
    %170 = vector.load %arg8[%c6_134, %c0_135, %c0_136] : memref<24x32x32xf32, #tpu.memory_space<vmem>>, vector<1x32x32xf32>
    %171 = vector.shape_cast %170 : vector<1x32x32xf32> to vector<32x32xf32>
    %cst_137 = arith.constant dense<0.000000e+00> : vector<16x32xf32>
    %172 = tpu.matmul %164, %171, %cst_137 {dimension_numbers = #tpu.dot_dimension_numbers<[1], [0], [0], [1], [0, 0, 1, 1], [], []>} : vector<16x32xf32>, vector<32x32xf32>, vector<16x32xf32> -> vector<16x32xf32>
    %173 = vector.broadcast %161 : vector<1x32xf32> to vector<16x32xf32>
    %174 = arith.addf %173, %172 : vector<16x32xf32>
    %c7 = arith.constant 7 : index
    %c0_138 = arith.constant 0 : index
    %c0_139 = arith.constant 0 : index
    %175 = vector.load %arg6[%c7, %c0_138, %c0_139] : memref<24x32x32xf32, #tpu.memory_space<vmem>>, vector<1x32x32xf32>
    %176 = vector.shape_cast %175 : vector<1x32x32xf32> to vector<32x32xf32>
    %cst_140 = arith.constant dense<0.000000e+00> : vector<16x32xf32>
    %177 = tpu.matmul %156, %176, %cst_140 {dimension_numbers = #tpu.dot_dimension_numbers<[1], [0], [0], [1], [0, 0, 1, 1], [], []>} : vector<16x32xf32>, vector<32x32xf32>, vector<16x32xf32> -> vector<16x32xf32>
    %178 = arith.addf %169, %177 : vector<16x32xf32>
    %c7_141 = arith.constant 7 : index
    %c0_142 = arith.constant 0 : index
    %c0_143 = arith.constant 0 : index
    %179 = vector.load %arg8[%c7_141, %c0_142, %c0_143] : memref<24x32x32xf32, #tpu.memory_space<vmem>>, vector<1x32x32xf32>
    %180 = vector.shape_cast %179 : vector<1x32x32xf32> to vector<32x32xf32>
    %cst_144 = arith.constant dense<0.000000e+00> : vector<16x32xf32>
    %181 = tpu.matmul %156, %180, %cst_144 {dimension_numbers = #tpu.dot_dimension_numbers<[1], [0], [0], [1], [0, 0, 1, 1], [], []>} : vector<16x32xf32>, vector<32x32xf32>, vector<16x32xf32> -> vector<16x32xf32>
    %182 = arith.addf %174, %181 : vector<16x32xf32>
    %c2_145 = arith.constant 2 : index
    %c0_146 = arith.constant 0 : index
    %c0_147 = arith.constant 0 : index
    %183 = vector.load %arg3[%c2_145, %c0_146, %c0_147] : memref<6x16x16xf32, #tpu.memory_space<vmem>>, vector<1x16x16xf32>
    %184 = vector.shape_cast %183 : vector<1x16x16xf32> to vector<16x16xf32>
    %cst_148 = arith.constant dense<0.000000e+00> : vector<16x32xf32>
    %185 = tpu.matmul %184, %156, %cst_148 {dimension_numbers = #tpu.dot_dimension_numbers<[1], [0], [0], [1], [0, 0, 1, 1], [], []>} : vector<16x16xf32>, vector<16x32xf32>, vector<16x32xf32> -> vector<16x32xf32>
    %c8 = arith.constant 8 : index
    %c0_149 = arith.constant 0 : index
    %c0_150 = arith.constant 0 : index
    %186 = vector.load %arg6[%c8, %c0_149, %c0_150] : memref<24x32x32xf32, #tpu.memory_space<vmem>>, vector<1x32x32xf32>
    %187 = vector.shape_cast %186 : vector<1x32x32xf32> to vector<32x32xf32>
    %cst_151 = arith.constant dense<0.000000e+00> : vector<16x32xf32>
    %188 = tpu.matmul %185, %187, %cst_151 {dimension_numbers = #tpu.dot_dimension_numbers<[1], [0], [0], [1], [0, 0, 1, 1], [], []>} : vector<16x32xf32>, vector<32x32xf32>, vector<16x32xf32> -> vector<16x32xf32>
    %189 = arith.addf %178, %188 : vector<16x32xf32>
    %c8_152 = arith.constant 8 : index
    %c0_153 = arith.constant 0 : index
    %c0_154 = arith.constant 0 : index
    %190 = vector.load %arg8[%c8_152, %c0_153, %c0_154] : memref<24x32x32xf32, #tpu.memory_space<vmem>>, vector<1x32x32xf32>
    %191 = vector.shape_cast %190 : vector<1x32x32xf32> to vector<32x32xf32>
    %cst_155 = arith.constant dense<0.000000e+00> : vector<16x32xf32>
    %192 = tpu.matmul %185, %191, %cst_155 {dimension_numbers = #tpu.dot_dimension_numbers<[1], [0], [0], [1], [0, 0, 1, 1], [], []>} : vector<16x32xf32>, vector<32x32xf32>, vector<16x32xf32> -> vector<16x32xf32>
    %193 = arith.addf %182, %192 : vector<16x32xf32>
    %194 = math.tanh %189 : vector<16x32xf32>
    %195 = arith.negf %193 : vector<16x32xf32>
    %196 = math.exp %195 : vector<16x32xf32>
    %cst_156 = arith.constant 1.000000e+00 : f32
    %197 = vector.broadcast %cst_156 : f32 to vector<16x32xf32>
    %198 = arith.addf %197, %196 : vector<16x32xf32>
    %199 = arith.divf %197, %198 : vector<16x32xf32>
    %200 = arith.mulf %194, %199 : vector<16x32xf32>
    %c2_157 = arith.constant 2 : index
    %c0_158 = arith.constant 0 : index
    %c0_159 = arith.constant 0 : index
    %201 = vector.load %arg12[%c2_157, %c0_158, %c0_159] : memref<8x32x32xf32, #tpu.memory_space<vmem>>, vector<1x32x32xf32>
    %202 = vector.shape_cast %201 : vector<1x32x32xf32> to vector<32x32xf32>
    %cst_160 = arith.constant dense<0.000000e+00> : vector<16x32xf32>
    %203 = tpu.matmul %200, %202, %cst_160 {dimension_numbers = #tpu.dot_dimension_numbers<[1], [0], [0], [1], [0, 0, 1, 1], [], []>} : vector<16x32xf32>, vector<32x32xf32>, vector<16x32xf32> -> vector<16x32xf32>
    %c2_161 = arith.constant 2 : index
    %c0_162 = arith.constant 0 : index
    %c0_163 = arith.constant 0 : index
    %204 = vector.load %arg13[%c2_161, %c0_162, %c0_163] : memref<8x1x32xf32, #tpu.memory_space<vmem>>, vector<1x1x32xf32>
    %205 = vector.shape_cast %204 : vector<1x1x32xf32> to vector<1x32xf32>
    %206 = vector.broadcast %205 : vector<1x32xf32> to vector<16x32xf32>
    %207 = arith.addf %203, %206 : vector<16x32xf32>
    %208 = arith.addf %157, %207 : vector<16x32xf32>
    %c1_164 = arith.constant 1 : index
    %c0_165 = arith.constant 0 : index
    %c0_166 = arith.constant 0 : index
    %209 = vector.load %arg10[%c1_164, %c0_165, %c0_166] : memref<4x32x32xf32, #tpu.memory_space<vmem>>, vector<1x32x32xf32>
    %210 = vector.shape_cast %209 : vector<1x32x32xf32> to vector<32x32xf32>
    %cst_167 = arith.constant dense<0.000000e+00> : vector<16x32xf32>
    %211 = tpu.matmul %200, %210, %cst_167 {dimension_numbers = #tpu.dot_dimension_numbers<[1], [0], [0], [1], [0, 0, 1, 1], [], []>} : vector<16x32xf32>, vector<32x32xf32>, vector<16x32xf32> -> vector<16x32xf32>
    %c1_168 = arith.constant 1 : index
    %c0_169 = arith.constant 0 : index
    %c0_170 = arith.constant 0 : index
    %212 = vector.load %arg11[%c1_168, %c0_169, %c0_170] : memref<4x1x32xf32, #tpu.memory_space<vmem>>, vector<1x1x32xf32>
    %213 = vector.shape_cast %212 : vector<1x1x32xf32> to vector<1x32xf32>
    %214 = vector.broadcast %213 : vector<1x32xf32> to vector<16x32xf32>
    %215 = arith.addf %211, %214 : vector<16x32xf32>
    %216 = arith.addf %156, %215 : vector<16x32xf32>
    %217 = vector.broadcast %3 : vector<16x1xf32> to vector<16x32xf32>
    %218 = arith.mulf %216, %217 : vector<16x32xf32>
    %c3_171 = arith.constant 3 : index
    %c0_172 = arith.constant 0 : index
    %c0_173 = arith.constant 0 : index
    %219 = vector.load %arg7[%c3_171, %c0_172, %c0_173] : memref<8x1x32xf32, #tpu.memory_space<vmem>>, vector<1x1x32xf32>
    %220 = vector.shape_cast %219 : vector<1x1x32xf32> to vector<1x32xf32>
    %c3_174 = arith.constant 3 : index
    %c0_175 = arith.constant 0 : index
    %c0_176 = arith.constant 0 : index
    %221 = vector.load %arg9[%c3_174, %c0_175, %c0_176] : memref<8x1x32xf32, #tpu.memory_space<vmem>>, vector<1x1x32xf32>
    %222 = vector.shape_cast %221 : vector<1x1x32xf32> to vector<1x32xf32>
    %c3_177 = arith.constant 3 : index
    %c0_178 = arith.constant 0 : index
    %c0_179 = arith.constant 0 : index
    %223 = vector.load %arg3[%c3_177, %c0_178, %c0_179] : memref<6x16x16xf32, #tpu.memory_space<vmem>>, vector<1x16x16xf32>
    %224 = vector.shape_cast %223 : vector<1x16x16xf32> to vector<16x16xf32>
    %cst_180 = arith.constant dense<0.000000e+00> : vector<16x32xf32>
    %225 = tpu.matmul %224, %218, %cst_180 {dimension_numbers = #tpu.dot_dimension_numbers<[1], [0], [0], [1], [0, 0, 1, 1], [], []>} : vector<16x16xf32>, vector<16x32xf32>, vector<16x32xf32> -> vector<16x32xf32>
    %c9 = arith.constant 9 : index
    %c0_181 = arith.constant 0 : index
    %c0_182 = arith.constant 0 : index
    %226 = vector.load %arg6[%c9, %c0_181, %c0_182] : memref<24x32x32xf32, #tpu.memory_space<vmem>>, vector<1x32x32xf32>
    %227 = vector.shape_cast %226 : vector<1x32x32xf32> to vector<32x32xf32>
    %cst_183 = arith.constant dense<0.000000e+00> : vector<16x32xf32>
    %228 = tpu.matmul %225, %227, %cst_183 {dimension_numbers = #tpu.dot_dimension_numbers<[1], [0], [0], [1], [0, 0, 1, 1], [], []>} : vector<16x32xf32>, vector<32x32xf32>, vector<16x32xf32> -> vector<16x32xf32>
    %229 = vector.broadcast %220 : vector<1x32xf32> to vector<16x32xf32>
    %230 = arith.addf %229, %228 : vector<16x32xf32>
    %c9_184 = arith.constant 9 : index
    %c0_185 = arith.constant 0 : index
    %c0_186 = arith.constant 0 : index
    %231 = vector.load %arg8[%c9_184, %c0_185, %c0_186] : memref<24x32x32xf32, #tpu.memory_space<vmem>>, vector<1x32x32xf32>
    %232 = vector.shape_cast %231 : vector<1x32x32xf32> to vector<32x32xf32>
    %cst_187 = arith.constant dense<0.000000e+00> : vector<16x32xf32>
    %233 = tpu.matmul %225, %232, %cst_187 {dimension_numbers = #tpu.dot_dimension_numbers<[1], [0], [0], [1], [0, 0, 1, 1], [], []>} : vector<16x32xf32>, vector<32x32xf32>, vector<16x32xf32> -> vector<16x32xf32>
    %234 = vector.broadcast %222 : vector<1x32xf32> to vector<16x32xf32>
    %235 = arith.addf %234, %233 : vector<16x32xf32>
    %c10 = arith.constant 10 : index
    %c0_188 = arith.constant 0 : index
    %c0_189 = arith.constant 0 : index
    %236 = vector.load %arg6[%c10, %c0_188, %c0_189] : memref<24x32x32xf32, #tpu.memory_space<vmem>>, vector<1x32x32xf32>
    %237 = vector.shape_cast %236 : vector<1x32x32xf32> to vector<32x32xf32>
    %cst_190 = arith.constant dense<0.000000e+00> : vector<16x32xf32>
    %238 = tpu.matmul %218, %237, %cst_190 {dimension_numbers = #tpu.dot_dimension_numbers<[1], [0], [0], [1], [0, 0, 1, 1], [], []>} : vector<16x32xf32>, vector<32x32xf32>, vector<16x32xf32> -> vector<16x32xf32>
    %239 = arith.addf %230, %238 : vector<16x32xf32>
    %c10_191 = arith.constant 10 : index
    %c0_192 = arith.constant 0 : index
    %c0_193 = arith.constant 0 : index
    %240 = vector.load %arg8[%c10_191, %c0_192, %c0_193] : memref<24x32x32xf32, #tpu.memory_space<vmem>>, vector<1x32x32xf32>
    %241 = vector.shape_cast %240 : vector<1x32x32xf32> to vector<32x32xf32>
    %cst_194 = arith.constant dense<0.000000e+00> : vector<16x32xf32>
    %242 = tpu.matmul %218, %241, %cst_194 {dimension_numbers = #tpu.dot_dimension_numbers<[1], [0], [0], [1], [0, 0, 1, 1], [], []>} : vector<16x32xf32>, vector<32x32xf32>, vector<16x32xf32> -> vector<16x32xf32>
    %243 = arith.addf %235, %242 : vector<16x32xf32>
    %c5_195 = arith.constant 5 : index
    %c0_196 = arith.constant 0 : index
    %c0_197 = arith.constant 0 : index
    %244 = vector.load %arg3[%c5_195, %c0_196, %c0_197] : memref<6x16x16xf32, #tpu.memory_space<vmem>>, vector<1x16x16xf32>
    %245 = vector.shape_cast %244 : vector<1x16x16xf32> to vector<16x16xf32>
    %cst_198 = arith.constant dense<0.000000e+00> : vector<16x32xf32>
    %246 = tpu.matmul %245, %218, %cst_198 {dimension_numbers = #tpu.dot_dimension_numbers<[1], [0], [0], [1], [0, 0, 1, 1], [], []>} : vector<16x16xf32>, vector<16x32xf32>, vector<16x32xf32> -> vector<16x32xf32>
    %c11 = arith.constant 11 : index
    %c0_199 = arith.constant 0 : index
    %c0_200 = arith.constant 0 : index
    %247 = vector.load %arg6[%c11, %c0_199, %c0_200] : memref<24x32x32xf32, #tpu.memory_space<vmem>>, vector<1x32x32xf32>
    %248 = vector.shape_cast %247 : vector<1x32x32xf32> to vector<32x32xf32>
    %cst_201 = arith.constant dense<0.000000e+00> : vector<16x32xf32>
    %249 = tpu.matmul %246, %248, %cst_201 {dimension_numbers = #tpu.dot_dimension_numbers<[1], [0], [0], [1], [0, 0, 1, 1], [], []>} : vector<16x32xf32>, vector<32x32xf32>, vector<16x32xf32> -> vector<16x32xf32>
    %250 = arith.addf %239, %249 : vector<16x32xf32>
    %c11_202 = arith.constant 11 : index
    %c0_203 = arith.constant 0 : index
    %c0_204 = arith.constant 0 : index
    %251 = vector.load %arg8[%c11_202, %c0_203, %c0_204] : memref<24x32x32xf32, #tpu.memory_space<vmem>>, vector<1x32x32xf32>
    %252 = vector.shape_cast %251 : vector<1x32x32xf32> to vector<32x32xf32>
    %cst_205 = arith.constant dense<0.000000e+00> : vector<16x32xf32>
    %253 = tpu.matmul %246, %252, %cst_205 {dimension_numbers = #tpu.dot_dimension_numbers<[1], [0], [0], [1], [0, 0, 1, 1], [], []>} : vector<16x32xf32>, vector<32x32xf32>, vector<16x32xf32> -> vector<16x32xf32>
    %254 = arith.addf %243, %253 : vector<16x32xf32>
    %255 = math.tanh %250 : vector<16x32xf32>
    %256 = arith.negf %254 : vector<16x32xf32>
    %257 = math.exp %256 : vector<16x32xf32>
    %cst_206 = arith.constant 1.000000e+00 : f32
    %258 = vector.broadcast %cst_206 : f32 to vector<16x32xf32>
    %259 = arith.addf %258, %257 : vector<16x32xf32>
    %260 = arith.divf %258, %259 : vector<16x32xf32>
    %261 = arith.mulf %255, %260 : vector<16x32xf32>
    %c3_207 = arith.constant 3 : index
    %c0_208 = arith.constant 0 : index
    %c0_209 = arith.constant 0 : index
    %262 = vector.load %arg12[%c3_207, %c0_208, %c0_209] : memref<8x32x32xf32, #tpu.memory_space<vmem>>, vector<1x32x32xf32>
    %263 = vector.shape_cast %262 : vector<1x32x32xf32> to vector<32x32xf32>
    %cst_210 = arith.constant dense<0.000000e+00> : vector<16x32xf32>
    %264 = tpu.matmul %261, %263, %cst_210 {dimension_numbers = #tpu.dot_dimension_numbers<[1], [0], [0], [1], [0, 0, 1, 1], [], []>} : vector<16x32xf32>, vector<32x32xf32>, vector<16x32xf32> -> vector<16x32xf32>
    %c3_211 = arith.constant 3 : index
    %c0_212 = arith.constant 0 : index
    %c0_213 = arith.constant 0 : index
    %265 = vector.load %arg13[%c3_211, %c0_212, %c0_213] : memref<8x1x32xf32, #tpu.memory_space<vmem>>, vector<1x1x32xf32>
    %266 = vector.shape_cast %265 : vector<1x1x32xf32> to vector<1x32xf32>
    %267 = vector.broadcast %266 : vector<1x32xf32> to vector<16x32xf32>
    %268 = arith.addf %264, %267 : vector<16x32xf32>
    %269 = arith.addf %208, %268 : vector<16x32xf32>
    %270 = vector.broadcast %3 : vector<16x1xf32> to vector<16x32xf32>
    %271 = arith.mulf %269, %270 : vector<16x32xf32>
    %c1_214 = arith.constant 1 : index
    %c0_215 = arith.constant 0 : index
    %c0_216 = arith.constant 0 : index
    %272 = vector.load %arg14[%c1_214, %c0_215, %c0_216] : memref<4x32x2xf32, #tpu.memory_space<vmem>>, vector<1x32x2xf32>
    %273 = vector.shape_cast %272 : vector<1x32x2xf32> to vector<32x2xf32>
    %cst_217 = arith.constant dense<0.000000e+00> : vector<16x2xf32>
    %274 = tpu.matmul %271, %273, %cst_217 {dimension_numbers = #tpu.dot_dimension_numbers<[1], [0], [0], [1], [0, 0, 1, 1], [], []>} : vector<16x32xf32>, vector<32x2xf32>, vector<16x2xf32> -> vector<16x2xf32>
    %c1_218 = arith.constant 1 : index
    %c0_219 = arith.constant 0 : index
    %c0_220 = arith.constant 0 : index
    %275 = vector.load %arg15[%c1_218, %c0_219, %c0_220] : memref<4x1x2xf32, #tpu.memory_space<vmem>>, vector<1x1x2xf32>
    %276 = vector.shape_cast %275 : vector<1x1x2xf32> to vector<1x2xf32>
    %277 = vector.broadcast %276 : vector<1x2xf32> to vector<16x2xf32>
    %278 = arith.addf %274, %277 : vector<16x2xf32>
    %279 = vector.broadcast %3 : vector<16x1xf32> to vector<16x2xf32>
    %280 = arith.mulf %278, %279 : vector<16x2xf32>
    %281 = vector.broadcast %3 : vector<16x1xf32> to vector<16x2xf32>
    %282 = arith.mulf %147, %281 : vector<16x2xf32>
    %283 = arith.addf %280, %282 : vector<16x2xf32>
    %284 = vector.extract_strided_slice %283 {offsets = [0, 1], sizes = [16, 1], strides = [1, 1]} : vector<16x2xf32> to vector<16x1xf32>
    %285 = vector.extract_strided_slice %283 {offsets = [0, 0], sizes = [16, 1], strides = [1, 1]} : vector<16x2xf32> to vector<16x1xf32>
    %286 = tpu.concatenate %284, %285 in 1 : vector<16x1xf32>, vector<16x1xf32> -> vector<16x2xf32>
    %287 = vector.extract_strided_slice %144 {offsets = [0, 1], sizes = [16, 1], strides = [1, 1]} : vector<16x2xf32> to vector<16x1xf32>
    %288 = vector.extract_strided_slice %144 {offsets = [0, 0], sizes = [16, 1], strides = [1, 1]} : vector<16x2xf32> to vector<16x1xf32>
    %289 = tpu.concatenate %287, %288 in 1 : vector<16x1xf32>, vector<16x1xf32> -> vector<16x2xf32>
    %c2_221 = arith.constant 2 : index
    %c0_222 = arith.constant 0 : index
    %c0_223 = arith.constant 0 : index
    %290 = vector.load %arg4[%c2_221, %c0_222, %c0_223] : memref<4x2x32xf32, #tpu.memory_space<vmem>>, vector<1x2x32xf32>
    %291 = vector.shape_cast %290 : vector<1x2x32xf32> to vector<2x32xf32>
    %cst_224 = arith.constant dense<0.000000e+00> : vector<16x32xf32>
    %292 = tpu.matmul %286, %291, %cst_224 {dimension_numbers = #tpu.dot_dimension_numbers<[1], [0], [0], [1], [0, 0, 1, 1], [], []>} : vector<16x2xf32>, vector<2x32xf32>, vector<16x32xf32> -> vector<16x32xf32>
    %c2_225 = arith.constant 2 : index
    %c0_226 = arith.constant 0 : index
    %c0_227 = arith.constant 0 : index
    %293 = vector.load %arg5[%c2_225, %c0_226, %c0_227] : memref<4x1x32xf32, #tpu.memory_space<vmem>>, vector<1x1x32xf32>
    %294 = vector.shape_cast %293 : vector<1x1x32xf32> to vector<1x32xf32>
    %295 = vector.broadcast %294 : vector<1x32xf32> to vector<16x32xf32>
    %296 = arith.addf %292, %295 : vector<16x32xf32>
    %297 = vector.broadcast %3 : vector<16x1xf32> to vector<16x32xf32>
    %298 = arith.mulf %296, %297 : vector<16x32xf32>
    %cst_228 = arith.constant 0.000000e+00 : f32
    %299 = vector.broadcast %cst_228 : f32 to vector<16x32xf32>
    %c4_229 = arith.constant 4 : index
    %c0_230 = arith.constant 0 : index
    %c0_231 = arith.constant 0 : index
    %300 = vector.load %arg7[%c4_229, %c0_230, %c0_231] : memref<8x1x32xf32, #tpu.memory_space<vmem>>, vector<1x1x32xf32>
    %301 = vector.shape_cast %300 : vector<1x1x32xf32> to vector<1x32xf32>
    %c4_232 = arith.constant 4 : index
    %c0_233 = arith.constant 0 : index
    %c0_234 = arith.constant 0 : index
    %302 = vector.load %arg9[%c4_232, %c0_233, %c0_234] : memref<8x1x32xf32, #tpu.memory_space<vmem>>, vector<1x1x32xf32>
    %303 = vector.shape_cast %302 : vector<1x1x32xf32> to vector<1x32xf32>
    %c0_235 = arith.constant 0 : index
    %c0_236 = arith.constant 0 : index
    %c0_237 = arith.constant 0 : index
    %304 = vector.load %arg3[%c0_235, %c0_236, %c0_237] : memref<6x16x16xf32, #tpu.memory_space<vmem>>, vector<1x16x16xf32>
    %305 = vector.shape_cast %304 : vector<1x16x16xf32> to vector<16x16xf32>
    %cst_238 = arith.constant dense<0.000000e+00> : vector<16x32xf32>
    %306 = tpu.matmul %305, %298, %cst_238 {dimension_numbers = #tpu.dot_dimension_numbers<[1], [0], [0], [1], [0, 0, 1, 1], [], []>} : vector<16x16xf32>, vector<16x32xf32>, vector<16x32xf32> -> vector<16x32xf32>
    %c12 = arith.constant 12 : index
    %c0_239 = arith.constant 0 : index
    %c0_240 = arith.constant 0 : index
    %307 = vector.load %arg6[%c12, %c0_239, %c0_240] : memref<24x32x32xf32, #tpu.memory_space<vmem>>, vector<1x32x32xf32>
    %308 = vector.shape_cast %307 : vector<1x32x32xf32> to vector<32x32xf32>
    %cst_241 = arith.constant dense<0.000000e+00> : vector<16x32xf32>
    %309 = tpu.matmul %306, %308, %cst_241 {dimension_numbers = #tpu.dot_dimension_numbers<[1], [0], [0], [1], [0, 0, 1, 1], [], []>} : vector<16x32xf32>, vector<32x32xf32>, vector<16x32xf32> -> vector<16x32xf32>
    %310 = vector.broadcast %301 : vector<1x32xf32> to vector<16x32xf32>
    %311 = arith.addf %310, %309 : vector<16x32xf32>
    %c12_242 = arith.constant 12 : index
    %c0_243 = arith.constant 0 : index
    %c0_244 = arith.constant 0 : index
    %312 = vector.load %arg8[%c12_242, %c0_243, %c0_244] : memref<24x32x32xf32, #tpu.memory_space<vmem>>, vector<1x32x32xf32>
    %313 = vector.shape_cast %312 : vector<1x32x32xf32> to vector<32x32xf32>
    %cst_245 = arith.constant dense<0.000000e+00> : vector<16x32xf32>
    %314 = tpu.matmul %306, %313, %cst_245 {dimension_numbers = #tpu.dot_dimension_numbers<[1], [0], [0], [1], [0, 0, 1, 1], [], []>} : vector<16x32xf32>, vector<32x32xf32>, vector<16x32xf32> -> vector<16x32xf32>
    %315 = vector.broadcast %303 : vector<1x32xf32> to vector<16x32xf32>
    %316 = arith.addf %315, %314 : vector<16x32xf32>
    %c13 = arith.constant 13 : index
    %c0_246 = arith.constant 0 : index
    %c0_247 = arith.constant 0 : index
    %317 = vector.load %arg6[%c13, %c0_246, %c0_247] : memref<24x32x32xf32, #tpu.memory_space<vmem>>, vector<1x32x32xf32>
    %318 = vector.shape_cast %317 : vector<1x32x32xf32> to vector<32x32xf32>
    %cst_248 = arith.constant dense<0.000000e+00> : vector<16x32xf32>
    %319 = tpu.matmul %298, %318, %cst_248 {dimension_numbers = #tpu.dot_dimension_numbers<[1], [0], [0], [1], [0, 0, 1, 1], [], []>} : vector<16x32xf32>, vector<32x32xf32>, vector<16x32xf32> -> vector<16x32xf32>
    %320 = arith.addf %311, %319 : vector<16x32xf32>
    %c13_249 = arith.constant 13 : index
    %c0_250 = arith.constant 0 : index
    %c0_251 = arith.constant 0 : index
    %321 = vector.load %arg8[%c13_249, %c0_250, %c0_251] : memref<24x32x32xf32, #tpu.memory_space<vmem>>, vector<1x32x32xf32>
    %322 = vector.shape_cast %321 : vector<1x32x32xf32> to vector<32x32xf32>
    %cst_252 = arith.constant dense<0.000000e+00> : vector<16x32xf32>
    %323 = tpu.matmul %298, %322, %cst_252 {dimension_numbers = #tpu.dot_dimension_numbers<[1], [0], [0], [1], [0, 0, 1, 1], [], []>} : vector<16x32xf32>, vector<32x32xf32>, vector<16x32xf32> -> vector<16x32xf32>
    %324 = arith.addf %316, %323 : vector<16x32xf32>
    %c2_253 = arith.constant 2 : index
    %c0_254 = arith.constant 0 : index
    %c0_255 = arith.constant 0 : index
    %325 = vector.load %arg3[%c2_253, %c0_254, %c0_255] : memref<6x16x16xf32, #tpu.memory_space<vmem>>, vector<1x16x16xf32>
    %326 = vector.shape_cast %325 : vector<1x16x16xf32> to vector<16x16xf32>
    %cst_256 = arith.constant dense<0.000000e+00> : vector<16x32xf32>
    %327 = tpu.matmul %326, %298, %cst_256 {dimension_numbers = #tpu.dot_dimension_numbers<[1], [0], [0], [1], [0, 0, 1, 1], [], []>} : vector<16x16xf32>, vector<16x32xf32>, vector<16x32xf32> -> vector<16x32xf32>
    %c14 = arith.constant 14 : index
    %c0_257 = arith.constant 0 : index
    %c0_258 = arith.constant 0 : index
    %328 = vector.load %arg6[%c14, %c0_257, %c0_258] : memref<24x32x32xf32, #tpu.memory_space<vmem>>, vector<1x32x32xf32>
    %329 = vector.shape_cast %328 : vector<1x32x32xf32> to vector<32x32xf32>
    %cst_259 = arith.constant dense<0.000000e+00> : vector<16x32xf32>
    %330 = tpu.matmul %327, %329, %cst_259 {dimension_numbers = #tpu.dot_dimension_numbers<[1], [0], [0], [1], [0, 0, 1, 1], [], []>} : vector<16x32xf32>, vector<32x32xf32>, vector<16x32xf32> -> vector<16x32xf32>
    %331 = arith.addf %320, %330 : vector<16x32xf32>
    %c14_260 = arith.constant 14 : index
    %c0_261 = arith.constant 0 : index
    %c0_262 = arith.constant 0 : index
    %332 = vector.load %arg8[%c14_260, %c0_261, %c0_262] : memref<24x32x32xf32, #tpu.memory_space<vmem>>, vector<1x32x32xf32>
    %333 = vector.shape_cast %332 : vector<1x32x32xf32> to vector<32x32xf32>
    %cst_263 = arith.constant dense<0.000000e+00> : vector<16x32xf32>
    %334 = tpu.matmul %327, %333, %cst_263 {dimension_numbers = #tpu.dot_dimension_numbers<[1], [0], [0], [1], [0, 0, 1, 1], [], []>} : vector<16x32xf32>, vector<32x32xf32>, vector<16x32xf32> -> vector<16x32xf32>
    %335 = arith.addf %324, %334 : vector<16x32xf32>
    %336 = math.tanh %331 : vector<16x32xf32>
    %337 = arith.negf %335 : vector<16x32xf32>
    %338 = math.exp %337 : vector<16x32xf32>
    %cst_264 = arith.constant 1.000000e+00 : f32
    %339 = vector.broadcast %cst_264 : f32 to vector<16x32xf32>
    %340 = arith.addf %339, %338 : vector<16x32xf32>
    %341 = arith.divf %339, %340 : vector<16x32xf32>
    %342 = arith.mulf %336, %341 : vector<16x32xf32>
    %c4_265 = arith.constant 4 : index
    %c0_266 = arith.constant 0 : index
    %c0_267 = arith.constant 0 : index
    %343 = vector.load %arg12[%c4_265, %c0_266, %c0_267] : memref<8x32x32xf32, #tpu.memory_space<vmem>>, vector<1x32x32xf32>
    %344 = vector.shape_cast %343 : vector<1x32x32xf32> to vector<32x32xf32>
    %cst_268 = arith.constant dense<0.000000e+00> : vector<16x32xf32>
    %345 = tpu.matmul %342, %344, %cst_268 {dimension_numbers = #tpu.dot_dimension_numbers<[1], [0], [0], [1], [0, 0, 1, 1], [], []>} : vector<16x32xf32>, vector<32x32xf32>, vector<16x32xf32> -> vector<16x32xf32>
    %c4_269 = arith.constant 4 : index
    %c0_270 = arith.constant 0 : index
    %c0_271 = arith.constant 0 : index
    %346 = vector.load %arg13[%c4_269, %c0_270, %c0_271] : memref<8x1x32xf32, #tpu.memory_space<vmem>>, vector<1x1x32xf32>
    %347 = vector.shape_cast %346 : vector<1x1x32xf32> to vector<1x32xf32>
    %348 = vector.broadcast %347 : vector<1x32xf32> to vector<16x32xf32>
    %349 = arith.addf %345, %348 : vector<16x32xf32>
    %350 = arith.addf %299, %349 : vector<16x32xf32>
    %c2_272 = arith.constant 2 : index
    %c0_273 = arith.constant 0 : index
    %c0_274 = arith.constant 0 : index
    %351 = vector.load %arg10[%c2_272, %c0_273, %c0_274] : memref<4x32x32xf32, #tpu.memory_space<vmem>>, vector<1x32x32xf32>
    %352 = vector.shape_cast %351 : vector<1x32x32xf32> to vector<32x32xf32>
    %cst_275 = arith.constant dense<0.000000e+00> : vector<16x32xf32>
    %353 = tpu.matmul %342, %352, %cst_275 {dimension_numbers = #tpu.dot_dimension_numbers<[1], [0], [0], [1], [0, 0, 1, 1], [], []>} : vector<16x32xf32>, vector<32x32xf32>, vector<16x32xf32> -> vector<16x32xf32>
    %c2_276 = arith.constant 2 : index
    %c0_277 = arith.constant 0 : index
    %c0_278 = arith.constant 0 : index
    %354 = vector.load %arg11[%c2_276, %c0_277, %c0_278] : memref<4x1x32xf32, #tpu.memory_space<vmem>>, vector<1x1x32xf32>
    %355 = vector.shape_cast %354 : vector<1x1x32xf32> to vector<1x32xf32>
    %356 = vector.broadcast %355 : vector<1x32xf32> to vector<16x32xf32>
    %357 = arith.addf %353, %356 : vector<16x32xf32>
    %358 = arith.addf %298, %357 : vector<16x32xf32>
    %359 = vector.broadcast %3 : vector<16x1xf32> to vector<16x32xf32>
    %360 = arith.mulf %358, %359 : vector<16x32xf32>
    %c5_279 = arith.constant 5 : index
    %c0_280 = arith.constant 0 : index
    %c0_281 = arith.constant 0 : index
    %361 = vector.load %arg7[%c5_279, %c0_280, %c0_281] : memref<8x1x32xf32, #tpu.memory_space<vmem>>, vector<1x1x32xf32>
    %362 = vector.shape_cast %361 : vector<1x1x32xf32> to vector<1x32xf32>
    %c5_282 = arith.constant 5 : index
    %c0_283 = arith.constant 0 : index
    %c0_284 = arith.constant 0 : index
    %363 = vector.load %arg9[%c5_282, %c0_283, %c0_284] : memref<8x1x32xf32, #tpu.memory_space<vmem>>, vector<1x1x32xf32>
    %364 = vector.shape_cast %363 : vector<1x1x32xf32> to vector<1x32xf32>
    %c3_285 = arith.constant 3 : index
    %c0_286 = arith.constant 0 : index
    %c0_287 = arith.constant 0 : index
    %365 = vector.load %arg3[%c3_285, %c0_286, %c0_287] : memref<6x16x16xf32, #tpu.memory_space<vmem>>, vector<1x16x16xf32>
    %366 = vector.shape_cast %365 : vector<1x16x16xf32> to vector<16x16xf32>
    %cst_288 = arith.constant dense<0.000000e+00> : vector<16x32xf32>
    %367 = tpu.matmul %366, %360, %cst_288 {dimension_numbers = #tpu.dot_dimension_numbers<[1], [0], [0], [1], [0, 0, 1, 1], [], []>} : vector<16x16xf32>, vector<16x32xf32>, vector<16x32xf32> -> vector<16x32xf32>
    %c15 = arith.constant 15 : index
    %c0_289 = arith.constant 0 : index
    %c0_290 = arith.constant 0 : index
    %368 = vector.load %arg6[%c15, %c0_289, %c0_290] : memref<24x32x32xf32, #tpu.memory_space<vmem>>, vector<1x32x32xf32>
    %369 = vector.shape_cast %368 : vector<1x32x32xf32> to vector<32x32xf32>
    %cst_291 = arith.constant dense<0.000000e+00> : vector<16x32xf32>
    %370 = tpu.matmul %367, %369, %cst_291 {dimension_numbers = #tpu.dot_dimension_numbers<[1], [0], [0], [1], [0, 0, 1, 1], [], []>} : vector<16x32xf32>, vector<32x32xf32>, vector<16x32xf32> -> vector<16x32xf32>
    %371 = vector.broadcast %362 : vector<1x32xf32> to vector<16x32xf32>
    %372 = arith.addf %371, %370 : vector<16x32xf32>
    %c15_292 = arith.constant 15 : index
    %c0_293 = arith.constant 0 : index
    %c0_294 = arith.constant 0 : index
    %373 = vector.load %arg8[%c15_292, %c0_293, %c0_294] : memref<24x32x32xf32, #tpu.memory_space<vmem>>, vector<1x32x32xf32>
    %374 = vector.shape_cast %373 : vector<1x32x32xf32> to vector<32x32xf32>
    %cst_295 = arith.constant dense<0.000000e+00> : vector<16x32xf32>
    %375 = tpu.matmul %367, %374, %cst_295 {dimension_numbers = #tpu.dot_dimension_numbers<[1], [0], [0], [1], [0, 0, 1, 1], [], []>} : vector<16x32xf32>, vector<32x32xf32>, vector<16x32xf32> -> vector<16x32xf32>
    %376 = vector.broadcast %364 : vector<1x32xf32> to vector<16x32xf32>
    %377 = arith.addf %376, %375 : vector<16x32xf32>
    %c16 = arith.constant 16 : index
    %c0_296 = arith.constant 0 : index
    %c0_297 = arith.constant 0 : index
    %378 = vector.load %arg6[%c16, %c0_296, %c0_297] : memref<24x32x32xf32, #tpu.memory_space<vmem>>, vector<1x32x32xf32>
    %379 = vector.shape_cast %378 : vector<1x32x32xf32> to vector<32x32xf32>
    %cst_298 = arith.constant dense<0.000000e+00> : vector<16x32xf32>
    %380 = tpu.matmul %360, %379, %cst_298 {dimension_numbers = #tpu.dot_dimension_numbers<[1], [0], [0], [1], [0, 0, 1, 1], [], []>} : vector<16x32xf32>, vector<32x32xf32>, vector<16x32xf32> -> vector<16x32xf32>
    %381 = arith.addf %372, %380 : vector<16x32xf32>
    %c16_299 = arith.constant 16 : index
    %c0_300 = arith.constant 0 : index
    %c0_301 = arith.constant 0 : index
    %382 = vector.load %arg8[%c16_299, %c0_300, %c0_301] : memref<24x32x32xf32, #tpu.memory_space<vmem>>, vector<1x32x32xf32>
    %383 = vector.shape_cast %382 : vector<1x32x32xf32> to vector<32x32xf32>
    %cst_302 = arith.constant dense<0.000000e+00> : vector<16x32xf32>
    %384 = tpu.matmul %360, %383, %cst_302 {dimension_numbers = #tpu.dot_dimension_numbers<[1], [0], [0], [1], [0, 0, 1, 1], [], []>} : vector<16x32xf32>, vector<32x32xf32>, vector<16x32xf32> -> vector<16x32xf32>
    %385 = arith.addf %377, %384 : vector<16x32xf32>
    %c5_303 = arith.constant 5 : index
    %c0_304 = arith.constant 0 : index
    %c0_305 = arith.constant 0 : index
    %386 = vector.load %arg3[%c5_303, %c0_304, %c0_305] : memref<6x16x16xf32, #tpu.memory_space<vmem>>, vector<1x16x16xf32>
    %387 = vector.shape_cast %386 : vector<1x16x16xf32> to vector<16x16xf32>
    %cst_306 = arith.constant dense<0.000000e+00> : vector<16x32xf32>
    %388 = tpu.matmul %387, %360, %cst_306 {dimension_numbers = #tpu.dot_dimension_numbers<[1], [0], [0], [1], [0, 0, 1, 1], [], []>} : vector<16x16xf32>, vector<16x32xf32>, vector<16x32xf32> -> vector<16x32xf32>
    %c17 = arith.constant 17 : index
    %c0_307 = arith.constant 0 : index
    %c0_308 = arith.constant 0 : index
    %389 = vector.load %arg6[%c17, %c0_307, %c0_308] : memref<24x32x32xf32, #tpu.memory_space<vmem>>, vector<1x32x32xf32>
    %390 = vector.shape_cast %389 : vector<1x32x32xf32> to vector<32x32xf32>
    %cst_309 = arith.constant dense<0.000000e+00> : vector<16x32xf32>
    %391 = tpu.matmul %388, %390, %cst_309 {dimension_numbers = #tpu.dot_dimension_numbers<[1], [0], [0], [1], [0, 0, 1, 1], [], []>} : vector<16x32xf32>, vector<32x32xf32>, vector<16x32xf32> -> vector<16x32xf32>
    %392 = arith.addf %381, %391 : vector<16x32xf32>
    %c17_310 = arith.constant 17 : index
    %c0_311 = arith.constant 0 : index
    %c0_312 = arith.constant 0 : index
    %393 = vector.load %arg8[%c17_310, %c0_311, %c0_312] : memref<24x32x32xf32, #tpu.memory_space<vmem>>, vector<1x32x32xf32>
    %394 = vector.shape_cast %393 : vector<1x32x32xf32> to vector<32x32xf32>
    %cst_313 = arith.constant dense<0.000000e+00> : vector<16x32xf32>
    %395 = tpu.matmul %388, %394, %cst_313 {dimension_numbers = #tpu.dot_dimension_numbers<[1], [0], [0], [1], [0, 0, 1, 1], [], []>} : vector<16x32xf32>, vector<32x32xf32>, vector<16x32xf32> -> vector<16x32xf32>
    %396 = arith.addf %385, %395 : vector<16x32xf32>
    %397 = math.tanh %392 : vector<16x32xf32>
    %398 = arith.negf %396 : vector<16x32xf32>
    %399 = math.exp %398 : vector<16x32xf32>
    %cst_314 = arith.constant 1.000000e+00 : f32
    %400 = vector.broadcast %cst_314 : f32 to vector<16x32xf32>
    %401 = arith.addf %400, %399 : vector<16x32xf32>
    %402 = arith.divf %400, %401 : vector<16x32xf32>
    %403 = arith.mulf %397, %402 : vector<16x32xf32>
    %c5_315 = arith.constant 5 : index
    %c0_316 = arith.constant 0 : index
    %c0_317 = arith.constant 0 : index
    %404 = vector.load %arg12[%c5_315, %c0_316, %c0_317] : memref<8x32x32xf32, #tpu.memory_space<vmem>>, vector<1x32x32xf32>
    %405 = vector.shape_cast %404 : vector<1x32x32xf32> to vector<32x32xf32>
    %cst_318 = arith.constant dense<0.000000e+00> : vector<16x32xf32>
    %406 = tpu.matmul %403, %405, %cst_318 {dimension_numbers = #tpu.dot_dimension_numbers<[1], [0], [0], [1], [0, 0, 1, 1], [], []>} : vector<16x32xf32>, vector<32x32xf32>, vector<16x32xf32> -> vector<16x32xf32>
    %c5_319 = arith.constant 5 : index
    %c0_320 = arith.constant 0 : index
    %c0_321 = arith.constant 0 : index
    %407 = vector.load %arg13[%c5_319, %c0_320, %c0_321] : memref<8x1x32xf32, #tpu.memory_space<vmem>>, vector<1x1x32xf32>
    %408 = vector.shape_cast %407 : vector<1x1x32xf32> to vector<1x32xf32>
    %409 = vector.broadcast %408 : vector<1x32xf32> to vector<16x32xf32>
    %410 = arith.addf %406, %409 : vector<16x32xf32>
    %411 = arith.addf %350, %410 : vector<16x32xf32>
    %412 = vector.broadcast %3 : vector<16x1xf32> to vector<16x32xf32>
    %413 = arith.mulf %411, %412 : vector<16x32xf32>
    %c2_322 = arith.constant 2 : index
    %c0_323 = arith.constant 0 : index
    %c0_324 = arith.constant 0 : index
    %414 = vector.load %arg14[%c2_322, %c0_323, %c0_324] : memref<4x32x2xf32, #tpu.memory_space<vmem>>, vector<1x32x2xf32>
    %415 = vector.shape_cast %414 : vector<1x32x2xf32> to vector<32x2xf32>
    %cst_325 = arith.constant dense<0.000000e+00> : vector<16x2xf32>
    %416 = tpu.matmul %413, %415, %cst_325 {dimension_numbers = #tpu.dot_dimension_numbers<[1], [0], [0], [1], [0, 0, 1, 1], [], []>} : vector<16x32xf32>, vector<32x2xf32>, vector<16x2xf32> -> vector<16x2xf32>
    %c2_326 = arith.constant 2 : index
    %c0_327 = arith.constant 0 : index
    %c0_328 = arith.constant 0 : index
    %417 = vector.load %arg15[%c2_326, %c0_327, %c0_328] : memref<4x1x2xf32, #tpu.memory_space<vmem>>, vector<1x1x2xf32>
    %418 = vector.shape_cast %417 : vector<1x1x2xf32> to vector<1x2xf32>
    %419 = vector.broadcast %418 : vector<1x2xf32> to vector<16x2xf32>
    %420 = arith.addf %416, %419 : vector<16x2xf32>
    %421 = vector.broadcast %3 : vector<16x1xf32> to vector<16x2xf32>
    %422 = arith.mulf %420, %421 : vector<16x2xf32>
    %423 = vector.broadcast %3 : vector<16x1xf32> to vector<16x2xf32>
    %424 = arith.mulf %289, %423 : vector<16x2xf32>
    %425 = arith.addf %422, %424 : vector<16x2xf32>
    %426 = vector.extract_strided_slice %425 {offsets = [0, 1], sizes = [16, 1], strides = [1, 1]} : vector<16x2xf32> to vector<16x1xf32>
    %427 = vector.extract_strided_slice %425 {offsets = [0, 0], sizes = [16, 1], strides = [1, 1]} : vector<16x2xf32> to vector<16x1xf32>
    %428 = tpu.concatenate %426, %427 in 1 : vector<16x1xf32>, vector<16x1xf32> -> vector<16x2xf32>
    %429 = vector.extract_strided_slice %286 {offsets = [0, 1], sizes = [16, 1], strides = [1, 1]} : vector<16x2xf32> to vector<16x1xf32>
    %430 = vector.extract_strided_slice %286 {offsets = [0, 0], sizes = [16, 1], strides = [1, 1]} : vector<16x2xf32> to vector<16x1xf32>
    %431 = tpu.concatenate %429, %430 in 1 : vector<16x1xf32>, vector<16x1xf32> -> vector<16x2xf32>
    %c3_329 = arith.constant 3 : index
    %c0_330 = arith.constant 0 : index
    %c0_331 = arith.constant 0 : index
    %432 = vector.load %arg4[%c3_329, %c0_330, %c0_331] : memref<4x2x32xf32, #tpu.memory_space<vmem>>, vector<1x2x32xf32>
    %433 = vector.shape_cast %432 : vector<1x2x32xf32> to vector<2x32xf32>
    %cst_332 = arith.constant dense<0.000000e+00> : vector<16x32xf32>
    %434 = tpu.matmul %428, %433, %cst_332 {dimension_numbers = #tpu.dot_dimension_numbers<[1], [0], [0], [1], [0, 0, 1, 1], [], []>} : vector<16x2xf32>, vector<2x32xf32>, vector<16x32xf32> -> vector<16x32xf32>
    %c3_333 = arith.constant 3 : index
    %c0_334 = arith.constant 0 : index
    %c0_335 = arith.constant 0 : index
    %435 = vector.load %arg5[%c3_333, %c0_334, %c0_335] : memref<4x1x32xf32, #tpu.memory_space<vmem>>, vector<1x1x32xf32>
    %436 = vector.shape_cast %435 : vector<1x1x32xf32> to vector<1x32xf32>
    %437 = vector.broadcast %436 : vector<1x32xf32> to vector<16x32xf32>
    %438 = arith.addf %434, %437 : vector<16x32xf32>
    %439 = vector.broadcast %3 : vector<16x1xf32> to vector<16x32xf32>
    %440 = arith.mulf %438, %439 : vector<16x32xf32>
    %cst_336 = arith.constant 0.000000e+00 : f32
    %441 = vector.broadcast %cst_336 : f32 to vector<16x32xf32>
    %c6_337 = arith.constant 6 : index
    %c0_338 = arith.constant 0 : index
    %c0_339 = arith.constant 0 : index
    %442 = vector.load %arg7[%c6_337, %c0_338, %c0_339] : memref<8x1x32xf32, #tpu.memory_space<vmem>>, vector<1x1x32xf32>
    %443 = vector.shape_cast %442 : vector<1x1x32xf32> to vector<1x32xf32>
    %c6_340 = arith.constant 6 : index
    %c0_341 = arith.constant 0 : index
    %c0_342 = arith.constant 0 : index
    %444 = vector.load %arg9[%c6_340, %c0_341, %c0_342] : memref<8x1x32xf32, #tpu.memory_space<vmem>>, vector<1x1x32xf32>
    %445 = vector.shape_cast %444 : vector<1x1x32xf32> to vector<1x32xf32>
    %c0_343 = arith.constant 0 : index
    %c0_344 = arith.constant 0 : index
    %c0_345 = arith.constant 0 : index
    %446 = vector.load %arg3[%c0_343, %c0_344, %c0_345] : memref<6x16x16xf32, #tpu.memory_space<vmem>>, vector<1x16x16xf32>
    %447 = vector.shape_cast %446 : vector<1x16x16xf32> to vector<16x16xf32>
    %cst_346 = arith.constant dense<0.000000e+00> : vector<16x32xf32>
    %448 = tpu.matmul %447, %440, %cst_346 {dimension_numbers = #tpu.dot_dimension_numbers<[1], [0], [0], [1], [0, 0, 1, 1], [], []>} : vector<16x16xf32>, vector<16x32xf32>, vector<16x32xf32> -> vector<16x32xf32>
    %c18 = arith.constant 18 : index
    %c0_347 = arith.constant 0 : index
    %c0_348 = arith.constant 0 : index
    %449 = vector.load %arg6[%c18, %c0_347, %c0_348] : memref<24x32x32xf32, #tpu.memory_space<vmem>>, vector<1x32x32xf32>
    %450 = vector.shape_cast %449 : vector<1x32x32xf32> to vector<32x32xf32>
    %cst_349 = arith.constant dense<0.000000e+00> : vector<16x32xf32>
    %451 = tpu.matmul %448, %450, %cst_349 {dimension_numbers = #tpu.dot_dimension_numbers<[1], [0], [0], [1], [0, 0, 1, 1], [], []>} : vector<16x32xf32>, vector<32x32xf32>, vector<16x32xf32> -> vector<16x32xf32>
    %452 = vector.broadcast %443 : vector<1x32xf32> to vector<16x32xf32>
    %453 = arith.addf %452, %451 : vector<16x32xf32>
    %c18_350 = arith.constant 18 : index
    %c0_351 = arith.constant 0 : index
    %c0_352 = arith.constant 0 : index
    %454 = vector.load %arg8[%c18_350, %c0_351, %c0_352] : memref<24x32x32xf32, #tpu.memory_space<vmem>>, vector<1x32x32xf32>
    %455 = vector.shape_cast %454 : vector<1x32x32xf32> to vector<32x32xf32>
    %cst_353 = arith.constant dense<0.000000e+00> : vector<16x32xf32>
    %456 = tpu.matmul %448, %455, %cst_353 {dimension_numbers = #tpu.dot_dimension_numbers<[1], [0], [0], [1], [0, 0, 1, 1], [], []>} : vector<16x32xf32>, vector<32x32xf32>, vector<16x32xf32> -> vector<16x32xf32>
    %457 = vector.broadcast %445 : vector<1x32xf32> to vector<16x32xf32>
    %458 = arith.addf %457, %456 : vector<16x32xf32>
    %c19 = arith.constant 19 : index
    %c0_354 = arith.constant 0 : index
    %c0_355 = arith.constant 0 : index
    %459 = vector.load %arg6[%c19, %c0_354, %c0_355] : memref<24x32x32xf32, #tpu.memory_space<vmem>>, vector<1x32x32xf32>
    %460 = vector.shape_cast %459 : vector<1x32x32xf32> to vector<32x32xf32>
    %cst_356 = arith.constant dense<0.000000e+00> : vector<16x32xf32>
    %461 = tpu.matmul %440, %460, %cst_356 {dimension_numbers = #tpu.dot_dimension_numbers<[1], [0], [0], [1], [0, 0, 1, 1], [], []>} : vector<16x32xf32>, vector<32x32xf32>, vector<16x32xf32> -> vector<16x32xf32>
    %462 = arith.addf %453, %461 : vector<16x32xf32>
    %c19_357 = arith.constant 19 : index
    %c0_358 = arith.constant 0 : index
    %c0_359 = arith.constant 0 : index
    %463 = vector.load %arg8[%c19_357, %c0_358, %c0_359] : memref<24x32x32xf32, #tpu.memory_space<vmem>>, vector<1x32x32xf32>
    %464 = vector.shape_cast %463 : vector<1x32x32xf32> to vector<32x32xf32>
    %cst_360 = arith.constant dense<0.000000e+00> : vector<16x32xf32>
    %465 = tpu.matmul %440, %464, %cst_360 {dimension_numbers = #tpu.dot_dimension_numbers<[1], [0], [0], [1], [0, 0, 1, 1], [], []>} : vector<16x32xf32>, vector<32x32xf32>, vector<16x32xf32> -> vector<16x32xf32>
    %466 = arith.addf %458, %465 : vector<16x32xf32>
    %c2_361 = arith.constant 2 : index
    %c0_362 = arith.constant 0 : index
    %c0_363 = arith.constant 0 : index
    %467 = vector.load %arg3[%c2_361, %c0_362, %c0_363] : memref<6x16x16xf32, #tpu.memory_space<vmem>>, vector<1x16x16xf32>
    %468 = vector.shape_cast %467 : vector<1x16x16xf32> to vector<16x16xf32>
    %cst_364 = arith.constant dense<0.000000e+00> : vector<16x32xf32>
    %469 = tpu.matmul %468, %440, %cst_364 {dimension_numbers = #tpu.dot_dimension_numbers<[1], [0], [0], [1], [0, 0, 1, 1], [], []>} : vector<16x16xf32>, vector<16x32xf32>, vector<16x32xf32> -> vector<16x32xf32>
    %c20 = arith.constant 20 : index
    %c0_365 = arith.constant 0 : index
    %c0_366 = arith.constant 0 : index
    %470 = vector.load %arg6[%c20, %c0_365, %c0_366] : memref<24x32x32xf32, #tpu.memory_space<vmem>>, vector<1x32x32xf32>
    %471 = vector.shape_cast %470 : vector<1x32x32xf32> to vector<32x32xf32>
    %cst_367 = arith.constant dense<0.000000e+00> : vector<16x32xf32>
    %472 = tpu.matmul %469, %471, %cst_367 {dimension_numbers = #tpu.dot_dimension_numbers<[1], [0], [0], [1], [0, 0, 1, 1], [], []>} : vector<16x32xf32>, vector<32x32xf32>, vector<16x32xf32> -> vector<16x32xf32>
    %473 = arith.addf %462, %472 : vector<16x32xf32>
    %c20_368 = arith.constant 20 : index
    %c0_369 = arith.constant 0 : index
    %c0_370 = arith.constant 0 : index
    %474 = vector.load %arg8[%c20_368, %c0_369, %c0_370] : memref<24x32x32xf32, #tpu.memory_space<vmem>>, vector<1x32x32xf32>
    %475 = vector.shape_cast %474 : vector<1x32x32xf32> to vector<32x32xf32>
    %cst_371 = arith.constant dense<0.000000e+00> : vector<16x32xf32>
    %476 = tpu.matmul %469, %475, %cst_371 {dimension_numbers = #tpu.dot_dimension_numbers<[1], [0], [0], [1], [0, 0, 1, 1], [], []>} : vector<16x32xf32>, vector<32x32xf32>, vector<16x32xf32> -> vector<16x32xf32>
    %477 = arith.addf %466, %476 : vector<16x32xf32>
    %478 = math.tanh %473 : vector<16x32xf32>
    %479 = arith.negf %477 : vector<16x32xf32>
    %480 = math.exp %479 : vector<16x32xf32>
    %cst_372 = arith.constant 1.000000e+00 : f32
    %481 = vector.broadcast %cst_372 : f32 to vector<16x32xf32>
    %482 = arith.addf %481, %480 : vector<16x32xf32>
    %483 = arith.divf %481, %482 : vector<16x32xf32>
    %484 = arith.mulf %478, %483 : vector<16x32xf32>
    %c6_373 = arith.constant 6 : index
    %c0_374 = arith.constant 0 : index
    %c0_375 = arith.constant 0 : index
    %485 = vector.load %arg12[%c6_373, %c0_374, %c0_375] : memref<8x32x32xf32, #tpu.memory_space<vmem>>, vector<1x32x32xf32>
    %486 = vector.shape_cast %485 : vector<1x32x32xf32> to vector<32x32xf32>
    %cst_376 = arith.constant dense<0.000000e+00> : vector<16x32xf32>
    %487 = tpu.matmul %484, %486, %cst_376 {dimension_numbers = #tpu.dot_dimension_numbers<[1], [0], [0], [1], [0, 0, 1, 1], [], []>} : vector<16x32xf32>, vector<32x32xf32>, vector<16x32xf32> -> vector<16x32xf32>
    %c6_377 = arith.constant 6 : index
    %c0_378 = arith.constant 0 : index
    %c0_379 = arith.constant 0 : index
    %488 = vector.load %arg13[%c6_377, %c0_378, %c0_379] : memref<8x1x32xf32, #tpu.memory_space<vmem>>, vector<1x1x32xf32>
    %489 = vector.shape_cast %488 : vector<1x1x32xf32> to vector<1x32xf32>
    %490 = vector.broadcast %489 : vector<1x32xf32> to vector<16x32xf32>
    %491 = arith.addf %487, %490 : vector<16x32xf32>
    %492 = arith.addf %441, %491 : vector<16x32xf32>
    %c3_380 = arith.constant 3 : index
    %c0_381 = arith.constant 0 : index
    %c0_382 = arith.constant 0 : index
    %493 = vector.load %arg10[%c3_380, %c0_381, %c0_382] : memref<4x32x32xf32, #tpu.memory_space<vmem>>, vector<1x32x32xf32>
    %494 = vector.shape_cast %493 : vector<1x32x32xf32> to vector<32x32xf32>
    %cst_383 = arith.constant dense<0.000000e+00> : vector<16x32xf32>
    %495 = tpu.matmul %484, %494, %cst_383 {dimension_numbers = #tpu.dot_dimension_numbers<[1], [0], [0], [1], [0, 0, 1, 1], [], []>} : vector<16x32xf32>, vector<32x32xf32>, vector<16x32xf32> -> vector<16x32xf32>
    %c3_384 = arith.constant 3 : index
    %c0_385 = arith.constant 0 : index
    %c0_386 = arith.constant 0 : index
    %496 = vector.load %arg11[%c3_384, %c0_385, %c0_386] : memref<4x1x32xf32, #tpu.memory_space<vmem>>, vector<1x1x32xf32>
    %497 = vector.shape_cast %496 : vector<1x1x32xf32> to vector<1x32xf32>
    %498 = vector.broadcast %497 : vector<1x32xf32> to vector<16x32xf32>
    %499 = arith.addf %495, %498 : vector<16x32xf32>
    %500 = arith.addf %440, %499 : vector<16x32xf32>
    %501 = vector.broadcast %3 : vector<16x1xf32> to vector<16x32xf32>
    %502 = arith.mulf %500, %501 : vector<16x32xf32>
    %c7_387 = arith.constant 7 : index
    %c0_388 = arith.constant 0 : index
    %c0_389 = arith.constant 0 : index
    %503 = vector.load %arg7[%c7_387, %c0_388, %c0_389] : memref<8x1x32xf32, #tpu.memory_space<vmem>>, vector<1x1x32xf32>
    %504 = vector.shape_cast %503 : vector<1x1x32xf32> to vector<1x32xf32>
    %c7_390 = arith.constant 7 : index
    %c0_391 = arith.constant 0 : index
    %c0_392 = arith.constant 0 : index
    %505 = vector.load %arg9[%c7_390, %c0_391, %c0_392] : memref<8x1x32xf32, #tpu.memory_space<vmem>>, vector<1x1x32xf32>
    %506 = vector.shape_cast %505 : vector<1x1x32xf32> to vector<1x32xf32>
    %c3_393 = arith.constant 3 : index
    %c0_394 = arith.constant 0 : index
    %c0_395 = arith.constant 0 : index
    %507 = vector.load %arg3[%c3_393, %c0_394, %c0_395] : memref<6x16x16xf32, #tpu.memory_space<vmem>>, vector<1x16x16xf32>
    %508 = vector.shape_cast %507 : vector<1x16x16xf32> to vector<16x16xf32>
    %cst_396 = arith.constant dense<0.000000e+00> : vector<16x32xf32>
    %509 = tpu.matmul %508, %502, %cst_396 {dimension_numbers = #tpu.dot_dimension_numbers<[1], [0], [0], [1], [0, 0, 1, 1], [], []>} : vector<16x16xf32>, vector<16x32xf32>, vector<16x32xf32> -> vector<16x32xf32>
    %c21 = arith.constant 21 : index
    %c0_397 = arith.constant 0 : index
    %c0_398 = arith.constant 0 : index
    %510 = vector.load %arg6[%c21, %c0_397, %c0_398] : memref<24x32x32xf32, #tpu.memory_space<vmem>>, vector<1x32x32xf32>
    %511 = vector.shape_cast %510 : vector<1x32x32xf32> to vector<32x32xf32>
    %cst_399 = arith.constant dense<0.000000e+00> : vector<16x32xf32>
    %512 = tpu.matmul %509, %511, %cst_399 {dimension_numbers = #tpu.dot_dimension_numbers<[1], [0], [0], [1], [0, 0, 1, 1], [], []>} : vector<16x32xf32>, vector<32x32xf32>, vector<16x32xf32> -> vector<16x32xf32>
    %513 = vector.broadcast %504 : vector<1x32xf32> to vector<16x32xf32>
    %514 = arith.addf %513, %512 : vector<16x32xf32>
    %c21_400 = arith.constant 21 : index
    %c0_401 = arith.constant 0 : index
    %c0_402 = arith.constant 0 : index
    %515 = vector.load %arg8[%c21_400, %c0_401, %c0_402] : memref<24x32x32xf32, #tpu.memory_space<vmem>>, vector<1x32x32xf32>
    %516 = vector.shape_cast %515 : vector<1x32x32xf32> to vector<32x32xf32>
    %cst_403 = arith.constant dense<0.000000e+00> : vector<16x32xf32>
    %517 = tpu.matmul %509, %516, %cst_403 {dimension_numbers = #tpu.dot_dimension_numbers<[1], [0], [0], [1], [0, 0, 1, 1], [], []>} : vector<16x32xf32>, vector<32x32xf32>, vector<16x32xf32> -> vector<16x32xf32>
    %518 = vector.broadcast %506 : vector<1x32xf32> to vector<16x32xf32>
    %519 = arith.addf %518, %517 : vector<16x32xf32>
    %c22 = arith.constant 22 : index
    %c0_404 = arith.constant 0 : index
    %c0_405 = arith.constant 0 : index
    %520 = vector.load %arg6[%c22, %c0_404, %c0_405] : memref<24x32x32xf32, #tpu.memory_space<vmem>>, vector<1x32x32xf32>
    %521 = vector.shape_cast %520 : vector<1x32x32xf32> to vector<32x32xf32>
    %cst_406 = arith.constant dense<0.000000e+00> : vector<16x32xf32>
    %522 = tpu.matmul %502, %521, %cst_406 {dimension_numbers = #tpu.dot_dimension_numbers<[1], [0], [0], [1], [0, 0, 1, 1], [], []>} : vector<16x32xf32>, vector<32x32xf32>, vector<16x32xf32> -> vector<16x32xf32>
    %523 = arith.addf %514, %522 : vector<16x32xf32>
    %c22_407 = arith.constant 22 : index
    %c0_408 = arith.constant 0 : index
    %c0_409 = arith.constant 0 : index
    %524 = vector.load %arg8[%c22_407, %c0_408, %c0_409] : memref<24x32x32xf32, #tpu.memory_space<vmem>>, vector<1x32x32xf32>
    %525 = vector.shape_cast %524 : vector<1x32x32xf32> to vector<32x32xf32>
    %cst_410 = arith.constant dense<0.000000e+00> : vector<16x32xf32>
    %526 = tpu.matmul %502, %525, %cst_410 {dimension_numbers = #tpu.dot_dimension_numbers<[1], [0], [0], [1], [0, 0, 1, 1], [], []>} : vector<16x32xf32>, vector<32x32xf32>, vector<16x32xf32> -> vector<16x32xf32>
    %527 = arith.addf %519, %526 : vector<16x32xf32>
    %c5_411 = arith.constant 5 : index
    %c0_412 = arith.constant 0 : index
    %c0_413 = arith.constant 0 : index
    %528 = vector.load %arg3[%c5_411, %c0_412, %c0_413] : memref<6x16x16xf32, #tpu.memory_space<vmem>>, vector<1x16x16xf32>
    %529 = vector.shape_cast %528 : vector<1x16x16xf32> to vector<16x16xf32>
    %cst_414 = arith.constant dense<0.000000e+00> : vector<16x32xf32>
    %530 = tpu.matmul %529, %502, %cst_414 {dimension_numbers = #tpu.dot_dimension_numbers<[1], [0], [0], [1], [0, 0, 1, 1], [], []>} : vector<16x16xf32>, vector<16x32xf32>, vector<16x32xf32> -> vector<16x32xf32>
    %c23 = arith.constant 23 : index
    %c0_415 = arith.constant 0 : index
    %c0_416 = arith.constant 0 : index
    %531 = vector.load %arg6[%c23, %c0_415, %c0_416] : memref<24x32x32xf32, #tpu.memory_space<vmem>>, vector<1x32x32xf32>
    %532 = vector.shape_cast %531 : vector<1x32x32xf32> to vector<32x32xf32>
    %cst_417 = arith.constant dense<0.000000e+00> : vector<16x32xf32>
    %533 = tpu.matmul %530, %532, %cst_417 {dimension_numbers = #tpu.dot_dimension_numbers<[1], [0], [0], [1], [0, 0, 1, 1], [], []>} : vector<16x32xf32>, vector<32x32xf32>, vector<16x32xf32> -> vector<16x32xf32>
    %534 = arith.addf %523, %533 : vector<16x32xf32>
    %c23_418 = arith.constant 23 : index
    %c0_419 = arith.constant 0 : index
    %c0_420 = arith.constant 0 : index
    %535 = vector.load %arg8[%c23_418, %c0_419, %c0_420] : memref<24x32x32xf32, #tpu.memory_space<vmem>>, vector<1x32x32xf32>
    %536 = vector.shape_cast %535 : vector<1x32x32xf32> to vector<32x32xf32>
    %cst_421 = arith.constant dense<0.000000e+00> : vector<16x32xf32>
    %537 = tpu.matmul %530, %536, %cst_421 {dimension_numbers = #tpu.dot_dimension_numbers<[1], [0], [0], [1], [0, 0, 1, 1], [], []>} : vector<16x32xf32>, vector<32x32xf32>, vector<16x32xf32> -> vector<16x32xf32>
    %538 = arith.addf %527, %537 : vector<16x32xf32>
    %539 = math.tanh %534 : vector<16x32xf32>
    %540 = arith.negf %538 : vector<16x32xf32>
    %541 = math.exp %540 : vector<16x32xf32>
    %cst_422 = arith.constant 1.000000e+00 : f32
    %542 = vector.broadcast %cst_422 : f32 to vector<16x32xf32>
    %543 = arith.addf %542, %541 : vector<16x32xf32>
    %544 = arith.divf %542, %543 : vector<16x32xf32>
    %545 = arith.mulf %539, %544 : vector<16x32xf32>
    %c7_423 = arith.constant 7 : index
    %c0_424 = arith.constant 0 : index
    %c0_425 = arith.constant 0 : index
    %546 = vector.load %arg12[%c7_423, %c0_424, %c0_425] : memref<8x32x32xf32, #tpu.memory_space<vmem>>, vector<1x32x32xf32>
    %547 = vector.shape_cast %546 : vector<1x32x32xf32> to vector<32x32xf32>
    %cst_426 = arith.constant dense<0.000000e+00> : vector<16x32xf32>
    %548 = tpu.matmul %545, %547, %cst_426 {dimension_numbers = #tpu.dot_dimension_numbers<[1], [0], [0], [1], [0, 0, 1, 1], [], []>} : vector<16x32xf32>, vector<32x32xf32>, vector<16x32xf32> -> vector<16x32xf32>
    %c7_427 = arith.constant 7 : index
    %c0_428 = arith.constant 0 : index
    %c0_429 = arith.constant 0 : index
    %549 = vector.load %arg13[%c7_427, %c0_428, %c0_429] : memref<8x1x32xf32, #tpu.memory_space<vmem>>, vector<1x1x32xf32>
    %550 = vector.shape_cast %549 : vector<1x1x32xf32> to vector<1x32xf32>
    %551 = vector.broadcast %550 : vector<1x32xf32> to vector<16x32xf32>
    %552 = arith.addf %548, %551 : vector<16x32xf32>
    %553 = arith.addf %492, %552 : vector<16x32xf32>
    %554 = vector.broadcast %3 : vector<16x1xf32> to vector<16x32xf32>
    %555 = arith.mulf %553, %554 : vector<16x32xf32>
    %c3_430 = arith.constant 3 : index
    %c0_431 = arith.constant 0 : index
    %c0_432 = arith.constant 0 : index
    %556 = vector.load %arg14[%c3_430, %c0_431, %c0_432] : memref<4x32x2xf32, #tpu.memory_space<vmem>>, vector<1x32x2xf32>
    %557 = vector.shape_cast %556 : vector<1x32x2xf32> to vector<32x2xf32>
    %cst_433 = arith.constant dense<0.000000e+00> : vector<16x2xf32>
    %558 = tpu.matmul %555, %557, %cst_433 {dimension_numbers = #tpu.dot_dimension_numbers<[1], [0], [0], [1], [0, 0, 1, 1], [], []>} : vector<16x32xf32>, vector<32x2xf32>, vector<16x2xf32> -> vector<16x2xf32>
    %c3_434 = arith.constant 3 : index
    %c0_435 = arith.constant 0 : index
    %c0_436 = arith.constant 0 : index
    %559 = vector.load %arg15[%c3_434, %c0_435, %c0_436] : memref<4x1x2xf32, #tpu.memory_space<vmem>>, vector<1x1x2xf32>
    %560 = vector.shape_cast %559 : vector<1x1x2xf32> to vector<1x2xf32>
    %561 = vector.broadcast %560 : vector<1x2xf32> to vector<16x2xf32>
    %562 = arith.addf %558, %561 : vector<16x2xf32>
    %563 = vector.broadcast %3 : vector<16x1xf32> to vector<16x2xf32>
    %564 = arith.mulf %562, %563 : vector<16x2xf32>
    %565 = vector.broadcast %3 : vector<16x1xf32> to vector<16x2xf32>
    %566 = arith.mulf %431, %565 : vector<16x2xf32>
    %567 = arith.addf %564, %566 : vector<16x2xf32>
    %568 = vector.extract_strided_slice %567 {offsets = [0, 1], sizes = [16, 1], strides = [1, 1]} : vector<16x2xf32> to vector<16x1xf32>
    %569 = vector.extract_strided_slice %567 {offsets = [0, 0], sizes = [16, 1], strides = [1, 1]} : vector<16x2xf32> to vector<16x1xf32>
    %570 = tpu.concatenate %568, %569 in 1 : vector<16x1xf32>, vector<16x1xf32> -> vector<16x2xf32>
    %571 = vector.extract_strided_slice %428 {offsets = [0, 1], sizes = [16, 1], strides = [1, 1]} : vector<16x2xf32> to vector<16x1xf32>
    %572 = vector.extract_strided_slice %428 {offsets = [0, 0], sizes = [16, 1], strides = [1, 1]} : vector<16x2xf32> to vector<16x1xf32>
    %573 = tpu.concatenate %571, %572 in 1 : vector<16x1xf32>, vector<16x1xf32> -> vector<16x2xf32>
    %574 = tpu.concatenate %570, %573 in 1 : vector<16x2xf32>, vector<16x2xf32> -> vector<16x4xf32>
    %c0_437 = arith.constant 0 : index
    %c0_438 = arith.constant 0 : index
    %c0_439 = arith.constant 0 : index
    %575 = vector.load %arg16[%c0_437, %c0_438, %c0_439] : memref<1x16x4xf32, #tpu.memory_space<vmem>>, vector<1x16x4xf32>
    %576 = vector.shape_cast %575 : vector<1x16x4xf32> to vector<16x4xf32>
    %577 = vector.shape_cast %574 : vector<16x4xf32> to vector<1x16x4xf32>
    tpu.vector_store %arg16[%c0_437, %c0_438, %c0_439], %577 {strides = array<i32>} : memref<1x16x4xf32, #tpu.memory_space<vmem>>, vector<1x16x4xf32>,
    return
  }
  func.func @transform_0(%arg0: i32) -> (i32, i32, i32) {
    %c0_i32 = arith.constant 0 : i32
    %c0_i32_0 = arith.constant 0 : i32
    %c0_i32_1 = arith.constant 0 : i32
    return %arg0, %c0_i32, %c0_i32_0 : i32, i32, i32
  }
  func.func @transform_1(%arg0: i32) -> (i32, i32, i32) {
    %c0_i32 = arith.constant 0 : i32
    %c0_i32_0 = arith.constant 0 : i32
    %c0_i32_1 = arith.constant 0 : i32
    return %arg0, %c0_i32, %c0_i32_0 : i32, i32, i32
  }
  func.func @transform_2(%arg0: i32) -> (i32, i32, i32) {
    %c0_i32 = arith.constant 0 : i32
    %c0_i32_0 = arith.constant 0 : i32
    %c0_i32_1 = arith.constant 0 : i32
    %c0_i32_2 = arith.constant 0 : i32
    return %c0_i32, %c0_i32_0, %c0_i32_1 : i32, i32, i32
  }
  func.func @transform_3(%arg0: i32) -> (i32, i32, i32) {
    %c0_i32 = arith.constant 0 : i32
    %c0_i32_0 = arith.constant 0 : i32
    %c0_i32_1 = arith.constant 0 : i32
    %c0_i32_2 = arith.constant 0 : i32
    return %c0_i32, %c0_i32_0, %c0_i32_1 : i32, i32, i32
  }
  func.func @transform_4(%arg0: i32) -> (i32, i32, i32) {
    %c0_i32 = arith.constant 0 : i32
    %c0_i32_0 = arith.constant 0 : i32
    %c0_i32_1 = arith.constant 0 : i32
    %c0_i32_2 = arith.constant 0 : i32
    return %c0_i32, %c0_i32_0, %c0_i32_1 : i32, i32, i32
  }
  func.func @transform_5(%arg0: i32) -> (i32, i32, i32) {
    %c0_i32 = arith.constant 0 : i32
    %c0_i32_0 = arith.constant 0 : i32
    %c0_i32_1 = arith.constant 0 : i32
    %c0_i32_2 = arith.constant 0 : i32
    return %c0_i32, %c0_i32_0, %c0_i32_1 : i32, i32, i32
  }
  func.func @transform_6(%arg0: i32) -> (i32, i32, i32) {
    %c0_i32 = arith.constant 0 : i32
    %c0_i32_0 = arith.constant 0 : i32
    %c0_i32_1 = arith.constant 0 : i32
    %c0_i32_2 = arith.constant 0 : i32
    return %c0_i32, %c0_i32_0, %c0_i32_1 : i32, i32, i32
  }
  func.func @transform_7(%arg0: i32) -> (i32, i32, i32) {
    %c0_i32 = arith.constant 0 : i32
    %c0_i32_0 = arith.constant 0 : i32
    %c0_i32_1 = arith.constant 0 : i32
    %c0_i32_2 = arith.constant 0 : i32
    return %c0_i32, %c0_i32_0, %c0_i32_1 : i32, i32, i32
  }
  func.func @transform_8(%arg0: i32) -> (i32, i32, i32) {
    %c0_i32 = arith.constant 0 : i32
    %c0_i32_0 = arith.constant 0 : i32
    %c0_i32_1 = arith.constant 0 : i32
    %c0_i32_2 = arith.constant 0 : i32
    return %c0_i32, %c0_i32_0, %c0_i32_1 : i32, i32, i32
  }
  func.func @transform_9(%arg0: i32) -> (i32, i32, i32) {
    %c0_i32 = arith.constant 0 : i32
    %c0_i32_0 = arith.constant 0 : i32
    %c0_i32_1 = arith.constant 0 : i32
    %c0_i32_2 = arith.constant 0 : i32
    return %c0_i32, %c0_i32_0, %c0_i32_1 : i32, i32, i32
  }
  func.func @transform_10(%arg0: i32) -> (i32, i32, i32) {
    %c0_i32 = arith.constant 0 : i32
    %c0_i32_0 = arith.constant 0 : i32
    %c0_i32_1 = arith.constant 0 : i32
    %c0_i32_2 = arith.constant 0 : i32
    return %c0_i32, %c0_i32_0, %c0_i32_1 : i32, i32, i32
  }
  func.func @transform_11(%arg0: i32) -> (i32, i32, i32) {
    %c0_i32 = arith.constant 0 : i32
    %c0_i32_0 = arith.constant 0 : i32
    %c0_i32_1 = arith.constant 0 : i32
    %c0_i32_2 = arith.constant 0 : i32
    return %c0_i32, %c0_i32_0, %c0_i32_1 : i32, i32, i32
  }
  func.func @transform_12(%arg0: i32) -> (i32, i32, i32) {
    %c0_i32 = arith.constant 0 : i32
    %c0_i32_0 = arith.constant 0 : i32
    %c0_i32_1 = arith.constant 0 : i32
    %c0_i32_2 = arith.constant 0 : i32
    return %c0_i32, %c0_i32_0, %c0_i32_1 : i32, i32, i32
  }
  func.func @transform_13(%arg0: i32) -> (i32, i32, i32) {
    %c0_i32 = arith.constant 0 : i32
    %c0_i32_0 = arith.constant 0 : i32
    %c0_i32_1 = arith.constant 0 : i32
    %c0_i32_2 = arith.constant 0 : i32
    return %c0_i32, %c0_i32_0, %c0_i32_1 : i32, i32, i32
  }
  func.func @transform_14(%arg0: i32) -> (i32, i32, i32) {
    %c0_i32 = arith.constant 0 : i32
    %c0_i32_0 = arith.constant 0 : i32
    %c0_i32_1 = arith.constant 0 : i32
    %c0_i32_2 = arith.constant 0 : i32
    return %c0_i32, %c0_i32_0, %c0_i32_1 : i32, i32, i32
  }
  func.func @transform_15(%arg0: i32) -> (i32, i32, i32) {
    %c0_i32 = arith.constant 0 : i32
    %c0_i32_0 = arith.constant 0 : i32
    %c0_i32_1 = arith.constant 0 : i32
    return %arg0, %c0_i32, %c0_i32_0 : i32, i32, i32
  }
}

</mosaic_0001>

<bundles_post_ra>
// kernel: tpu_custom_call.1
= control target key start
LH: loop header
LB: loop body
LE: loop exit
PB: predicated region body
PF: predicated region fallthrough
CT: control target
= control target key end

     0   :  { %s11425_s0 = inlined_call_operand.vmem [shape: f32[2,16,4], index: 0, kind: input, shape index: {}]   ;;  %s11426_s1 = inlined_call_operand.vmem [shape: f32[2,16,1], index: 1, kind: input, shape index: {}]   ;;  %s11427_s2 = inlined_call_operand.vmem [shape: f32[6,16,16], index: 2, kind: input, shape index: {}]   ;;  %s11428_s3 = inlined_call_operand.hbm [shape: f32[4,2,32], index: 3, kind: input, shape index: {}]   ;;  %s11429_s4 = inlined_call_operand.hbm [shape: f32[4,1,32], index: 4, kind: input, shape index: {}]   ;;  %s11430_s5 = inlined_call_operand.hbm [shape: f32[24,32,32], index: 5, kind: input, shape index: {}]   ;;  %s11431_s6 = inlined_call_operand.hbm [shape: f32[8,1,32], index: 6, kind: input, shape index: {}]   ;;  %s11432_s7 = inlined_call_operand.hbm [shape: f32[24,32,32], index: 7, kind: input, shape index: {}]   ;;  %s11433_s8 = inlined_call_operand.hbm [shape: f32[8,1,32], index: 8, kind: input, shape index: {}]   ;;  %s11434_s9 = inlined_call_operand.vmem [shape: f32[4,32,32], index: 9, kind: input, shape index: {}]   ;;  %s11435_s10 = inlined_call_operand.hbm [shape: f32[4,1,32], index: 10, kind: input, shape index: {}]   ;;  %s11436_s11 = inlined_call_operand.hbm [shape: f32[8,32,32], index: 11, kind: input, shape index: {}]   ;;  %s11437_s12 = inlined_call_operand.hbm [shape: f32[8,1,32], index: 12, kind: input, shape index: {}]   ;;  %s11438_s13 = inlined_call_operand.vmem [shape: f32[4,32,2], index: 13, kind: input, shape index: {}]   ;;  %s11439_s14 = inlined_call_operand.vmem [shape: f32[4,1,2], index: 14, kind: input, shape index: {}]   ;;  %s11440_s15 = inlined_call_operand.vmem [shape: f32[2,16,4], index: 15, kind: output, shape index: {}]  }
   0x1   :  { %11449 = sst [smem:[#allocation21_spill]] %s11429_s4 }
   0x2   :  { %20 = vsyncpa [#allocation3], 0 }
   0x3   :  { %21 = vsyncpa [#allocation5], 0 }
   0x4   :  { %22 = vsyncpa [#allocation8], 0 }
   0x5   :  { %23 = vsyncpa [#allocation11], 0 }
   0x6   :  { %24 = vsyncpa [#allocation14], 0  ;;  %s10612_s18 = smov 0  }
   0x7 LB: > { %s10512_s19 = smov [#allocation4]   ;;  %s10618_s21 = sadd.s32 4294967295, %s10510_s18   ;;  %s10510_s18 = sphi %s10612_s18, %s30_s18  }
   0x8   : > { %s414_s20 = sshll.u32 %s10512_s19, 4  ;;  %p8450_p0 = scmp.ge.s32.totalorder %s10510_s18, 1  ;;  %s415_s20 = int_to_ptr.vmem [resolvable:$true] %s414_s20 }
   0x9   : > { %p386_p1 = scmp.lt.s32.totalorder %s10510_s18, 3  ;;  %p10099_p2 = scmp.eq.s32.totalorder %s10618_s21, 0 }
   0xa   : > { %s10513_s23 = smov [#allocation7]   ;;  %s10514_s26 = smov [#allocation10]  }
   0xb   : > { %p10623_p3 = pnand %p8450_p0, %p386_p1  ;;  %s440_s24 = sshll.u32 %s10513_s23, 4  ;;  %s10629_s24 = int_to_ptr.vmem [resolvable:$true] %s440_s24 }
   0xc   : > { %s466_s27 = sshll.u32 %s10514_s26, 4  ;;  %s10261_s29 = scalar_lea.vmem %s415_s20, 64  ;;  %s10637_s27 = int_to_ptr.vmem [resolvable:$true] %s466_s27 }
   0xd   : > { %p10071_p4 = pneg %p10623_p3  ;;  %p10262_p7 = scmp.ne.s32.totalorder %s415_s20, %s10261_s29 }
   0xe   : > { %p10269_p10 = scmp.lt.s32.totalorder %s415_s20, %s415_s20  ;;  %p10270_p11 = scmp.lt.s32.totalorder %s10261_s29, %s10261_s29 }
   0xf   : > { %p10633_p5 = pnand %p10099_p2, %p10071_p4 }
  0x10   : > { %p10271_p12 = por %p10270_p11, %p10269_p10 }
  0x11   : > { %p10641_p6 = pneg %p10633_p5 }
  0x13   : > { %p10264_p8 = pnand %p10262_p7, %p10641_p6 }
  0x15   : > { %p10265_p9 = pneg %p10264_p8 }
  0x17   : > { %p10272_p13 = pnand %p10271_p12, %p10265_p9 }
  0x19   : > { %10275 = shalt.err (!%p10272_p13)
}
  0x1a   : > { %s11441_s30 = smov 16   ;;  %s11443_s16 = smov 1  }
  0x1b   : > { %s11453_s4 = sld [smem:[#allocation21_spill]]  ;;  %s10287_s23 = scalar_lea.vmem %s10629_s24, 128 }
  0x1c   : > { %p10288_p0 = scmp.ne.s32.totalorder %s10629_s24, %s10287_s23  ;;  %p10295_p7 = scmp.lt.s32.totalorder %s10629_s24, %s10629_s24 }
  0x1d   : > { %p10296_p8 = scmp.lt.s32.totalorder %s10287_s23, %s10287_s23 }
  0x1e   : > { %p10290_p1 = pnand %p10288_p0, %p10641_p6 }
  0x1f   : > { %p10297_p9 = por %p10296_p8, %p10295_p7 }
  0x20   : > { %p10291_p4 = pneg %p10290_p1 }
  0x21   : > { %10077 = dma.hbm_to_vmem [thread:$0]  (!%p10633_p5), %s11453_s4, 64, %s415_s20, [#allocation5], %s11441_s30, %s11441_s30, %s11443_s16  }
  0x22   : > { %p10298_p10 = pnand %p10297_p9, %p10291_p4 }
  0x24   : > { %10301 = shalt.err (!%p10298_p10)
}
  0x25   : > { %10083 = dma.hbm_to_vmem [thread:$0]  (!%p10633_p5), %s11431_s6, 128, %s10629_s24, [#allocation8], %s11441_s30, %s11441_s30, %s11443_s16  }
  0x26   : > { %s10313_s20 = scalar_lea.vmem %s10637_s27, 128  ;;  %p10321_p0 = scmp.lt.s32.totalorder %s10637_s27, %s10637_s27 }
  0x27   : > { %p10314_p11 = scmp.ne.s32.totalorder %s10637_s27, %s10313_s20  ;;  %p10322_p1 = scmp.lt.s32.totalorder %s10313_s20, %s10313_s20 }
  0x29   : > { %p10316_p12 = pnand %p10314_p11, %p10641_p6  ;;  %p10323_p4 = por %p10322_p1, %p10321_p0 }
  0x2b   : > { %p10317_p13 = pneg %p10316_p12 }
  0x2d   : > { %p10324_p7 = pnand %p10323_p4, %p10317_p13 }
  0x2f   : > { %10327 = shalt.err (!%p10324_p7)
}
  0x30   : > { %10089 = dma.hbm_to_vmem [thread:$0]  (!%p10633_p5), %s11433_s8, 128, %s10637_s27, [#allocation11], %s11441_s30, %s11441_s30, %s11443_s16  }
  0x31   : > { %s10517_s24 = smov [#allocation13]   ;;  %s10518_s26 = smov [#allocation2]  }
  0x32   : > { %s495_s23 = sshll.u32 %s10517_s24, 4  ;;  %s401_s29 = sshll.u32 %s10518_s26, 4  ;;  %s496_s23 = int_to_ptr.vmem [resolvable:$true] %s495_s23  ;;  %s402_s29 = int_to_ptr.vmem [resolvable:$true] %s401_s29 }
  0x33   : > { %s10339_s20 = scalar_lea.vmem %s496_s23, 4096  ;;  %p10347_p11 = scmp.lt.s32.totalorder %s496_s23, %s496_s23 }
  0x34   : > { %p10340_p8 = scmp.ne.s32.totalorder %s496_s23, %s10339_s20  ;;  %p10348_p12 = scmp.lt.s32.totalorder %s10339_s20, %s10339_s20 }
  0x36   : > { %p10342_p9 = pnand %p10340_p8, %p10641_p6  ;;  %p10349_p13 = por %p10348_p12, %p10347_p11 }
  0x38   : > { %p10343_p10 = pneg %p10342_p9 }
  0x3a   : > { %p10350_p0 = pnand %p10349_p13, %p10343_p10 }
  0x3c   : > { %10353 = shalt.err (!%p10350_p0)
}
  0x3d   : > { %s11445_s4 = smov 128   ;;  %s11447_s27 = smov 8  }
  0x3e   : > { %10095 = dma.hbm_to_vmem [thread:$0]  (!%p10633_p5), %s11436_s11, 4096, %s496_s23, [#allocation14], %s11445_s4, %s11445_s4, %s11447_s27  }
  0x3f   : > { %s10365_s24 = scalar_lea.vmem %s402_s29, 128  ;;  %p10373_p8 = scmp.lt.s32.totalorder %s402_s29, %s402_s29 }
  0x40   : > { %p10366_p1 = scmp.ne.s32.totalorder %s402_s29, %s10365_s24  ;;  %p10374_p9 = scmp.lt.s32.totalorder %s10365_s24, %s10365_s24 }
  0x42   : > { %p10368_p4 = pnand %p10366_p1, %p10641_p6  ;;  %p10375_p10 = por %p10374_p9, %p10373_p8 }
  0x44   : > { %p10369_p7 = pneg %p10368_p4 }
  0x46   : > { %p10376_p11 = pnand %p10375_p10, %p10369_p7 }
  0x48   : > { %10379 = shalt.err (!%p10376_p11)
}
  0x49   : > { %s10521_s26 = smov 32   ;;  %s10522_s20 = smov 2  }
  0x4a   : > { %10074 = dma.hbm_to_vmem [thread:$0]  (!%p10633_p5), %s11428_s3, 128, %s402_s29, [#allocation3], %s10521_s26, %s10521_s26, %s10522_s20  }
  0x4b   : > { %s10523_s23 = smov [#allocation6]   ;;  %s10524_s19 = smov [#allocation9]  }
  0x4c   : > { %s427_s17 = sshll.u32 %s10523_s23, 4  ;;  %s453_s4 = sshll.u32 %s10524_s19, 4  ;;  %s428_s17 = int_to_ptr.vmem [resolvable:$true] %s427_s17  ;;  %s454_s4 = int_to_ptr.vmem [resolvable:$true] %s453_s4 }
  0x4d   : > { %s10391_s27 = scalar_lea.vmem %s428_s17, 12288  ;;  %p10399_p1 = scmp.lt.s32.totalorder %s428_s17, %s428_s17 }
  0x4e   : > { %p10392_p12 = scmp.ne.s32.totalorder %s428_s17, %s10391_s27  ;;  %p10400_p4 = scmp.lt.s32.totalorder %s10391_s27, %s10391_s27 }
  0x50   : > { %p10394_p13 = pnand %p10392_p12, %p10641_p6  ;;  %p10401_p7 = por %p10400_p4, %p10399_p1 }
  0x52   : > { %p10395_p0 = pneg %p10394_p13 }
  0x54   : > { %p10402_p8 = pnand %p10401_p7, %p10395_p0 }
  0x56   : > { %10405 = shalt.err (!%p10402_p8)
}
  0x57   : > { %s11454_s30 = smov 8   ;;  %s11455_s16 = smov 128  }
  0x58   : > { %10080 = dma.hbm_to_vmem [thread:$0]  (!%p10633_p5), %s11430_s5, 12288, %s428_s17, [#allocation5], %s11455_s16, %s11455_s16, %s11454_s30  }
  0x59   : > { %s10417_s26 = scalar_lea.vmem %s454_s4, 12288  ;;  %p10425_p12 = scmp.lt.s32.totalorder %s454_s4, %s454_s4 }
  0x5a   : > { %p10418_p9 = scmp.ne.s32.totalorder %s454_s4, %s10417_s26  ;;  %p10426_p13 = scmp.lt.s32.totalorder %s10417_s26, %s10417_s26 }
  0x5c   : > { %p10420_p10 = pnand %p10418_p9, %p10641_p6  ;;  %p10427_p1 = por %p10426_p13, %p10425_p12 }
  0x5e   : > { %p10421_p11 = pneg %p10420_p10 }
  0x60   : > { %p10428_p0 = pnand %p10427_p1, %p10421_p11 }
  0x62   : > { %10431 = shalt.err (!%p10428_p0)
}
  0x63   : > { %10086 = dma.hbm_to_vmem [thread:$0]  (!%p10633_p5), %s11432_s7, 12288, %s454_s4, [#allocation8], %s11455_s16, %s11455_s16, %s11454_s30  }
  0x64   : > { %s10525_s23 = smov [#allocation12]   ;;  %s10526_s19 = smov [#allocation15]  }
  0x65   : > { %s482_s17 = sshll.u32 %s10525_s23, 4  ;;  %s508_s29 = sshll.u32 %s10526_s19, 4  ;;  %s483_s17 = int_to_ptr.vmem [resolvable:$true] %s482_s17  ;;  %s509_s29 = int_to_ptr.vmem [resolvable:$true] %s508_s29 }
  0x66   : > { %s10443_s24 = scalar_lea.vmem %s483_s17, 64  ;;  %p10451_p9 = scmp.lt.s32.totalorder %s483_s17, %s483_s17 }
  0x67   : > { %p10444_p4 = scmp.ne.s32.totalorder %s483_s17, %s10443_s24  ;;  %p10452_p10 = scmp.lt.s32.totalorder %s10443_s24, %s10443_s24 }
  0x69   : > { %p10446_p7 = pnand %p10444_p4, %p10641_p6  ;;  %p10453_p11 = por %p10452_p10, %p10451_p9 }
  0x6b   : > { %p10447_p8 = pneg %p10446_p7 }
  0x6d   : > { %p10454_p12 = pnand %p10453_p11, %p10447_p8 }
  0x6f   : > { %10457 = shalt.err (!%p10454_p12)
}
  0x70   : > { %s11456_s26 = smov 1   ;;  %s11457_s4 = smov 16  }
  0x71   : > { %10092 = dma.hbm_to_vmem [thread:$0]  (!%p10633_p5), %s11435_s10, 64, %s483_s17, [#allocation11], %s11457_s4, %s11457_s4, %s11456_s26  }
  0x72   : > { %s10469_s27 = scalar_lea.vmem %s509_s29, 128  ;;  %p10477_p4 = scmp.lt.s32.totalorder %s509_s29, %s509_s29 }
  0x73   : > { %p10470_p13 = scmp.ne.s32.totalorder %s509_s29, %s10469_s27  ;;  %p10478_p7 = scmp.lt.s32.totalorder %s10469_s27, %s10469_s27 }
  0x75   : > { %p10472_p1 = pnand %p10470_p13, %p10641_p6  ;;  %p10479_p9 = por %p10478_p7, %p10477_p4 }
  0x77   : > { %p10473_p0 = pneg %p10472_p1 }
  0x79   : > { %p10480_p8 = pnand %p10479_p9, %p10473_p0 }
  0x7b   : > { %10483 = shalt.err (!%p10480_p8)
}
  0x7c   : > { %10098 = dma.hbm_to_vmem [thread:$0]  (!%p10633_p5), %s11437_s12, 128, %s509_s29, [#allocation14], %s11457_s4, %s11457_s4, %s11456_s26  }
  0x7d   : > { %546 = sbr.rel (%p10623_p3) target bundleno = 8964 (0x2304), region = 80 }
  0x82   : > { %10489 = dma.done.wait (%p10099_p2), [#allocation3], 128  }
  0x83   : > { %10491 = vsyncadd (%p10099_p2), [#allocation3], 4294967168 }
  0x84   : > { %10493 = dma.done.wait (%p10099_p2), [#allocation5], 12352  }
  0x85   : > { %10495 = vsyncadd (%p10099_p2), [#allocation5], 4294954944 }
  0x86   : > { %10497 = dma.done.wait (%p10099_p2), [#allocation8], 12416  }
  0x87   : > { %10499 = vsyncadd (%p10099_p2), [#allocation8], 4294954880 }
  0x88   : > { %10501 = dma.done.wait (%p10099_p2), [#allocation11], 192  }
  0x89   : > { %10503 = vsyncadd (%p10099_p2), [#allocation11], 4294967104 }
  0x8a   : > { %10505 = dma.done.wait (%p10099_p2), [#allocation14], 4224  }
  0x8b   : > { %10507 = vsyncadd (%p10099_p2), [#allocation14], 4294963072  ;;  %p631_p3 = scmp.lt.s32.totalorder %s10618_s21, 1  ;;  %v10527_v0 = vmov 0   ;;  %vm665_vm0 = vcmask 1041408   ;;  %vm658_vm1 = vcmask 15360  }
  0x8c   : > { %10145 = vset.pattern.permute.xlu0 %v10527_v0  ;;  %v650_v1 = vld [vmem:[#allocation2] sm:$0x3]  ;;  %vm760_vm2 = vcmask 130048   ;;  %v845_v7 = vld [vmem:[#allocation6 + $0x18] sm:$0xff]  ;;  %v843_v9 = vld [vmem:[#allocation6 + $0x8] sm:$0xff]  ;;  %s10528_s4 = smov 126  }
  0x8d   : > { %s11459_s21 = smov (!%p631_p3, %s10618_s21), 1  ;;  %9199 = vmatprep.subr.msk.mxu0 %vm665_vm0, %v650_v1  ;;  %v10789_v6 = vld [vmem:[%s11427_s2] sm:$0xff]  ;;  %v8477_v14 = vld [vmem:[#allocation4] ss:$0 sm:$0xff]  ;;  %v939_v22 = vld [vmem:[#allocation9 + $0x18] sm:$0xff]  ;;  %vm846_vm3 = vcmask 261120  }
  0x8e   : > { %s10766_s22 = sshll.u32 %s11459_s21, 4  ;;  %9200 = vmatpush3.msk.msra.mxu0 %vm665_vm0, %v650_v1  ;;  %9208 = vmatprep.mubr.msk.f32.mxu1 %vm760_vm2, %v10789_v6  ;;  %v844_v8 = vld [vmem:[#allocation6 + $0x10] sm:$0xff]  ;;  %v10812_v21 = vld [vmem:[%s11427_s2 + $0x8] sm:$0xff]  ;;  %v936_v26 = vld [vmem:[#allocation9] sm:$0xff]  ;;  %s10529_s23 = smov 1   ;;  %vm2575_vm4 = vcmask 7168  }
  0x8f   : > { %s635_s17 = scalar_lea.vmem %s11425_s0, %s10766_s22  ;;  %s640_s24 = scalar_lea.vmem %s11426_s1, %s10766_s22  ;;  %9211 = vmatprep.subr.mxu0 %v845_v7  ;;  %v938_v23 = vld [vmem:[#allocation9 + $0x10] sm:$0xff]  ;;  %v937_v24 = vld [vmem:[#allocation9 + $0x8] sm:$0xff]  ;;  %v842_v25 = vld [vmem:[#allocation6] sm:$0xff]  ;;  %vm8290_vm5 = vcmask 31744  }
  0x90   : > { %v10776_v2 = vld [vmem:[%s635_s17] sm:$0xff]  ;;  %v10778_v3 = vld [vmem:[%s635_s17 + $0x8] sm:$0xff]  ;;  %v1025_v33 = vld [vmem:[#allocation6 + $0x28] sm:$0xff]  ;;  %s10530_s25 = smov 127   ;;  %s10531_s27 = smov 2  }
  0x91   : > { %9201 = vmatprep.mubr.msk.f32.mxu0 %vm658_vm1, %v10776_v2  ;;  %v649_v4 = vld [vmem:[%s640_s24 + $0x8] sm:$0xff]  ;;  %v648_v5 = vld [vmem:[%s640_s24] sm:$0xff]  ;;  %v1112_v36 = vld [vmem:[#allocation9 + $0x20] sm:$0xff] }
  0x92   : > { %751 = vperm.xlu0 %10145, %v649_v4   ;;  %9202 = vmatmul.mubr.msk.f32.vlgmr.msra.gmra.mxu0 %vm658_vm1, %v10778_v3  ;;  %v1027_v27 = vld [vmem:[#allocation6 + $0x38] sm:$0xff]  ;;  %v1115_v28 = vld [vmem:[#allocation9 + $0x38] sm:$0xff]  ;;  %v1026_v31 = vld [vmem:[#allocation6 + $0x30] sm:$0xff] }
  0x93   : > { %9212 = vmatpush3.msra.mxu0 %v845_v7  ;;  %v1114_v32 = vld [vmem:[#allocation9 + $0x30] sm:$0xff]  ;;  %v1113_v34 = vld [vmem:[#allocation9 + $0x28] sm:$0xff]  ;;  %v1024_v35 = vld [vmem:[#allocation6 + $0x20] sm:$0xff] }
  0x94   : > { %9213 = vmatprep.subr.mxu0 %v844_v8  ;;  %v10829_v37 = vld [vmem:[%s11427_s2 + $0x20] sm:$0xff]  ;;  %v10842_v38 = vld [vmem:[%s11427_s2 + $0x28] sm:$0xff]  ;;  %v1279_v43 = vld [vmem:[#allocation6 + $0x48] sm:$0xff] }
  0x95   : > { %9214 = vmatpush3.msra.mxu0 %v844_v8  ;;  %v1281_v39 = vld [vmem:[#allocation6 + $0x58] sm:$0xff]  ;;  %v1369_v40 = vld [vmem:[#allocation9 + $0x58] sm:$0xff]  ;;  %v1280_v41 = vld [vmem:[#allocation6 + $0x50] sm:$0xff] }
  0x96   : > { %746 = vperm.xlu0 %10145, %v648_v5   ;;  %9215 = vmatprep.subr.mxu0 %v843_v9  ;;  %v1368_v42 = vld [vmem:[#allocation9 + $0x50] sm:$0xff]  ;;  %v1367_v44 = vld [vmem:[#allocation9 + $0x48] sm:$0xff]  ;;  %v1278_v45 = vld [vmem:[#allocation6 + $0x40] sm:$0xff] }
  0x97   : > { %9216 = vmatpush3.msra.mxu0 %v843_v9  ;;  %v1366_v46 = vld [vmem:[#allocation9 + $0x40] sm:$0xff]  ;;  %v8485_v48 = vld [vmem:[#allocation7] ss:$0 sm:$0xff]  ;;  %v1463_v0 = vld [vmem:[#allocation13] sm:$0xff] }
  0x98   : > { %9217 = vmatprep.subr.mxu0 %v842_v25  ;;  %v1466_v58 = vld [vmem:[#allocation13 + $0x18] sm:$0xff]  ;;  %v1465_v60 = vld [vmem:[#allocation13 + $0x10] sm:$0xff]  ;;  %v1464_v62 = vld [vmem:[#allocation13 + $0x8] sm:$0xff] }
  0x99   : > { %9218 = vmatpush3.msra.mxu0 %v842_v25  ;;  %v1560_v59 = vld [vmem:[%s11434_s9 + $0x18] sm:$0xff]  ;;  %v1559_v61 = vld [vmem:[%s11434_s9 + $0x10] sm:$0xff]  ;;  %v1558_v63 = vld [vmem:[%s11434_s9 + $0x8] sm:$0xff] }
  0x9a   : > { %9233 = vmatprep.subr.mxu0 %v1027_v27  ;;  %v1557_v1 = vld [vmem:[%s11434_s9] sm:$0xff]  ;;  %v8488_v7 = vld [vmem:[#allocation10] ss:$0 sm:$0xff] }
 0x10d   : > { %v10793_v10 = vpop.permute.xlu0 %751 }
 0x10e   : > { %v2550_v13 = vmul.f32 %v10793_v10, %v10778_v3 }
 0x111   : > { %v10795_v11 = vpop.permute.xlu0 %746 }
 0x112   : > { %v2549_v12 = vmul.f32 %v10795_v11, %v10776_v2 }
 0x114   : > { %2553 = vrot.lane.b32.xlu1 %v2549_v12, %s10528_s4 }
 0x118   : > { %2555 = vrot.lane.b32.xlu1 %v2550_v13, %s10528_s4 }
 0x152   : > { %v9203_v15 = vpop.f32.mrf.mxu0 }
 0x153   : > { %v741_v16 = vadd.f32 %v9203_v15, %v8477_v14 }
 0x154   : > { %v735_v17 = vpop.f32.mrf.mxu0 }
 0x155   : > { %v10802_v18 = vmul.f32 %v10793_v10, %v741_v16  ;;  %v736_v19 = vadd.f32 %v8477_v14, %v735_v17 }
 0x157   : > { %v10805_v20 = vmul.f32 %v10795_v11, %v736_v19  ;;  %9204 = vmatprep.subr.mxu1 %v10802_v18 }
 0x158   : > { %9205 = vmatpush3.msra.mxu1 %v10802_v18 }
 0x159   : > { %9206 = vmatprep.subr.mxu1 %v10805_v20 }
 0x15a   : > { %9207 = vmatpush3.msra.mxu1 %v10805_v20 }
 0x15b   : > { %9209 = vmatmul.mubr.msk.f32.vlgmr.msra.gmra.mxu1 %vm760_vm2, %v10812_v21  ;;  %9222 = vmatprep.subr.mxu1 %v939_v22 }
 0x15c   : > { %9223 = vmatpush3.msra.mxu1 %v939_v22 }
 0x15d   : > { %9224 = vmatprep.subr.mxu1 %v938_v23 }
 0x15e   : > { %9225 = vmatpush3.msra.mxu1 %v938_v23 }
 0x15f   : > { %9226 = vmatprep.subr.mxu1 %v937_v24 }
 0x160   : > { %9227 = vmatpush3.msra.mxu1 %v937_v24 }
 0x161   : > { %9228 = vmatprep.subr.mxu1 %v936_v26 }
 0x162   : > { %9229 = vmatpush3.msra.mxu1 %v936_v26 }
 0x163   : > { %9244 = vmatprep.subr.mxu1 %v1115_v28 }
 0x21b   : > { %v9210_v29 = vpop.f32.mrf.mxu1 }
 0x21d   : > { %v833_v30 = vpop.f32.mrf.mxu1 }
 0x21e   : > { %9219 = vmatprep.mubr.msk.f32.mxu0 %vm846_vm3, %v833_v30  ;;  %9230 = vmatprep.mubr.msk.f32.mxu1 %vm846_vm3, %v833_v30 }
 0x21f   : > { %9220 = vmatmul.mubr.msk.f32.vlgmr.msra.gmra.mxu0 %vm846_vm3, %v9210_v29  ;;  %9231 = vmatmul.mubr.msk.f32.vlgmr.msra.gmra.mxu1 %vm846_vm3, %v9210_v29 }
 0x220   : > { %9234 = vmatpush3.msra.mxu0 %v1027_v27  ;;  %9245 = vmatpush3.msra.mxu1 %v1115_v28 }
 0x221   : > { %9235 = vmatprep.subr.mxu0 %v1026_v31  ;;  %9241 = vmatprep.mubr.msk.f32.mxu0 %vm846_vm3, %v10805_v20 }
 0x222   : > { %9246 = vmatprep.subr.mxu1 %v1114_v32  ;;  %9252 = vmatprep.mubr.msk.f32.mxu1 %vm846_vm3, %v10805_v20 }
 0x223   : > { %9236 = vmatpush3.msra.mxu0 %v1026_v31  ;;  %9247 = vmatpush3.msra.mxu1 %v1114_v32 }
 0x224   : > { %9237 = vmatprep.subr.mxu0 %v1025_v33  ;;  %9248 = vmatprep.subr.mxu1 %v1113_v34 }
 0x225   : > { %9238 = vmatpush3.msra.mxu0 %v1025_v33  ;;  %9249 = vmatpush3.msra.mxu1 %v1113_v34 }
 0x226   : > { %9239 = vmatprep.subr.mxu0 %v1024_v35  ;;  %9250 = vmatprep.subr.mxu1 %v1112_v36 }
 0x227   : > { %9240 = vmatpush3.msra.mxu0 %v1024_v35  ;;  %9251 = vmatpush3.msra.mxu1 %v1112_v36 }
 0x228   : > { %9242 = vmatmul.mubr.msk.f32.vlgmr.msra.gmra.mxu0 %vm846_vm3, %v10802_v18  ;;  %9253 = vmatmul.mubr.msk.f32.vlgmr.msra.gmra.mxu1 %vm846_vm3, %v10802_v18 }
 0x229   : > { %9255 = vmatprep.subr.mxu0 %v10802_v18  ;;  %9259 = vmatprep.mubr.msk.f32.mxu0 %vm760_vm2, %v10829_v37 }
 0x22a   : > { %9256 = vmatpush3.msra.mxu0 %v10802_v18  ;;  %9262 = vmatprep.subr.mxu1 %v1281_v39 }
 0x22b   : > { %9257 = vmatprep.subr.mxu0 %v10805_v20  ;;  %9263 = vmatpush3.msra.mxu1 %v1281_v39 }
 0x22c   : > { %9258 = vmatpush3.msra.mxu0 %v10805_v20  ;;  %9264 = vmatprep.subr.mxu1 %v1280_v41 }
 0x22d   : > { %9260 = vmatmul.mubr.msk.f32.vlgmr.msra.gmra.mxu0 %vm760_vm2, %v10842_v38  ;;  %9273 = vmatprep.subr.mxu0 %v1369_v40 }
 0x22e   : > { %9274 = vmatpush3.msra.mxu0 %v1369_v40  ;;  %9265 = vmatpush3.msra.mxu1 %v1280_v41  ;;  %v10871_v41 = vld [vmem:[%s11427_s2 + $0x30] sm:$0xff] }
 0x22f   : > { %9275 = vmatprep.subr.mxu0 %v1368_v42  ;;  %9266 = vmatprep.subr.mxu1 %v1279_v43 }
 0x230   : > { %9276 = vmatpush3.msra.mxu0 %v1368_v42  ;;  %9267 = vmatpush3.msra.mxu1 %v1279_v43  ;;  %v1739_v42 = vld [vmem:[#allocation6 + $0x78] sm:$0xff]  ;;  %v1738_v43 = vld [vmem:[#allocation6 + $0x70] sm:$0xff] }
 0x231   : > { %9277 = vmatprep.subr.mxu0 %v1367_v44  ;;  %9268 = vmatprep.subr.mxu1 %v1278_v45 }
 0x232   : > { %9278 = vmatpush3.msra.mxu0 %v1367_v44  ;;  %9269 = vmatpush3.msra.mxu1 %v1278_v45  ;;  %v1737_v44 = vld [vmem:[#allocation6 + $0x68] sm:$0xff]  ;;  %v8506_v45 = vld [vmem:[#allocation12] ss:$0 sm:$0xff] }
 0x233   : > { %9279 = vmatprep.subr.mxu0 %v1366_v46  ;;  %9284 = vmatprep.subr.mxu1 %v1466_v58 }
 0x234   : > { %9280 = vmatpush3.msra.mxu0 %v1366_v46 }
 0x235   : > { %9295 = vmatprep.subr.mxu0 %v1560_v59 }
 0x2df   : > { %v9221_v47 = vpop.f32.mrf.mxu0  ;;  %v9232_v4 = vpop.f32.mrf.mxu1 }
 0x2e0   : > { %v935_v50 = vadd.f32 %v9221_v47, %v8485_v48  ;;  %v1022_v9 = vadd.f32 %v9232_v4, %v8488_v7  ;;  %v1919_v4 = vld [vmem:[#allocation6 + $0x88] sm:$0xff] }
 0x2e1   : > { %v919_v49 = vpop.f32.mrf.mxu0  ;;  %v1006_v5 = vpop.f32.mrf.mxu1 }
 0x2e2   : > { %v934_v52 = vadd.f32 %v8485_v48, %v919_v49  ;;  %v1021_v13 = vadd.f32 %v8488_v7, %v1006_v5  ;;  %v2007_v5 = vld [vmem:[#allocation9 + $0x88] sm:$0xff]  ;;  %v1918_v7 = vld [vmem:[#allocation6 + $0x80] sm:$0xff] }
 0x2e8   : > { %v9243_v51 = vpop.f32.mrf.mxu0  ;;  %v9254_v8 = vpop.f32.mrf.mxu1 }
 0x2e9   : > { %v1110_v53 = vadd.f32 %v9243_v51, %v935_v50  ;;  %v1192_v14 = vadd.f32 %v9254_v8, %v1022_v9  ;;  %v2006_v8 = vld [vmem:[#allocation9 + $0x80] sm:$0xff] }
 0x2ea   : > { %v1100_v54 = vpop.f32.mrf.mxu0  ;;  %v1182_v12 = vpop.f32.mrf.mxu1  ;;  %v10909_v9 = vld [vmem:[%s11427_s2 + $0x50] sm:$0xff] }
 0x2eb   : > { %v1109_v55 = vadd.f32 %v1100_v54, %v934_v52  ;;  %v1191_v16 = vadd.f32 %v1182_v12, %v1021_v13  ;;  %v10888_v54 = vld [vmem:[%s11427_s2 + $0x38] sm:$0xff]  ;;  %v2175_v13 = vld [vmem:[#allocation6 + $0xb8] sm:$0xff] }
 0x2ec   : > { %v10922_v12 = vld [vmem:[%s11427_s2 + $0x58] sm:$0xff] }
 0x2ed   : > { %v9261_v56 = vpop.f32.mrf.mxu0 }
 0x2ef   : > { %v1268_v57 = vpop.f32.mrf.mxu0 }
 0x2f0   : > { %9270 = vmatprep.mubr.msk.f32.mxu1 %vm846_vm3, %v1268_v57  ;;  %9281 = vmatprep.mubr.msk.f32.mxu0 %vm846_vm3, %v1268_v57  ;;  %v1830_v57 = vld [vmem:[#allocation9 + $0x60] sm:$0xff] }
 0x2f1   : > { %9271 = vmatmul.mubr.msk.f32.vlgmr.msra.gmra.mxu1 %vm846_vm3, %v9261_v56  ;;  %9282 = vmatmul.mubr.msk.f32.vlgmr.msra.gmra.mxu0 %vm846_vm3, %v9261_v56  ;;  %v1736_v56 = vld [vmem:[#allocation6 + $0x60] sm:$0xff] }
 0x2f2   : > { %9285 = vmatpush3.msra.mxu1 %v1466_v58  ;;  %9296 = vmatpush3.msra.mxu0 %v1560_v59  ;;  %v1921_v58 = vld [vmem:[#allocation6 + $0x98] sm:$0xff]  ;;  %v2009_v59 = vld [vmem:[#allocation9 + $0x98] sm:$0xff] }
 0x2f3   : > { %9286 = vmatprep.subr.mxu1 %v1465_v60  ;;  %9297 = vmatprep.subr.mxu0 %v1559_v61 }
 0x2f4   : > { %9287 = vmatpush3.msra.mxu1 %v1465_v60  ;;  %9298 = vmatpush3.msra.mxu0 %v1559_v61 }
 0x2f5   : > { %9288 = vmatprep.subr.mxu1 %v1464_v62  ;;  %9299 = vmatprep.subr.mxu0 %v1558_v63 }
 0x2f6   : > { %9289 = vmatpush3.msra.mxu1 %v1464_v62  ;;  %9300 = vmatpush3.msra.mxu0 %v1558_v63 }
 0x2f7   : > { %9290 = vmatprep.subr.mxu1 %v1463_v0  ;;  %9301 = vmatprep.subr.mxu0 %v1557_v1 }
 0x2f8   : > { %9291 = vmatpush3.msra.mxu1 %v1463_v0  ;;  %9302 = vmatpush3.msra.mxu0 %v1557_v1  ;;  %v1920_v0 = vld [vmem:[#allocation6 + $0x90] sm:$0xff]  ;;  %v2008_v1 = vld [vmem:[#allocation9 + $0x90] sm:$0xff] }
 0x2f9   : > { %9313 = vmatprep.subr.mxu0 %v1739_v42 }
 0x3b1   : > { %v9283_v15 = vpop.f32.mrf.mxu0  ;;  %v9272_v25 = vpop.f32.mrf.mxu1 }
 0x3b2   : > { %v1446_v17 = vadd.f32 %v9283_v15, %v1192_v14  ;;  %v1364_v31 = vadd.f32 %v9272_v25, %v1110_v53  ;;  %v2263_v14 = vld [vmem:[#allocation9 + $0xb8] sm:$0xff]  ;;  %v2174_v15 = vld [vmem:[#allocation6 + $0xb0] sm:$0xff] }
 0x3b3   : > { %v1436_v19 = vpop.f32.mrf.mxu0  ;;  %v1354_v26 = vpop.f32.mrf.mxu1  ;;  %v8515_v25 = vld [vmem:[#allocation7 + $0x1] ss:$0 sm:$0xff] }
 0x3b4   : > { %v8502_v22 = vmul.f32 -1.442695, %v1446_v17  ;;  %v1445_v23 = vadd.f32 %v1436_v19, %v1191_v16  ;;  %v1363_v27 = vadd.f32 %v1354_v26, %v1109_v55  ;;  %v1833_v55 = vld [vmem:[#allocation9 + $0x78] sm:$0xff]  ;;  %v2262_v16 = vld [vmem:[#allocation9 + $0xb0] sm:$0xff]  ;;  %v2173_v17 = vld [vmem:[#allocation6 + $0xa8] sm:$0xff] }
 0x3b5   : > { %v2261_v19 = vld [vmem:[#allocation9 + $0xa8] sm:$0xff] }
 0x3b6   : > { %10146 = vpow2.f32 %v8502_v22  ;;  %v8501_v24 = vmul.f32 -1.442695, %v1445_v23  ;;  %v2172_v22 = vld [vmem:[#allocation6 + $0xa0] sm:$0xff]  ;;  %v2260_v23 = vld [vmem:[#allocation9 + $0xa0] sm:$0xff] }
 0x3b8   : > { %10148 = vpow2.f32 %v8501_v24 }
 0x3b9   : > { %10150 = vtanh.f32 %v1363_v27 }
 0x3c3   : > { %v10147_v28 = vpop.eup %10146 }
 0x3c4   : > { %v1456_v29 = vadd.f32 1.0, %v10147_v28 }
 0x3c5   : > { %v10149_v30 = vpop.eup %10148 }
 0x3c6   : > { %v1455_v32 = vadd.f32 1.0, %v10149_v30  ;;  %10152 = vrcp.f32 %v1456_v29  ;;  %v10151_v33 = vpop.eup %10150 }
 0x3c8   : > { %10154 = vrcp.f32 %v1455_v32 }
 0x3c9   : > { %10156 = vtanh.f32 %v1364_v31 }
 0x3d3   : > { %v10153_v34 = vpop.eup %10152 }
 0x3d5   : > { %v10155_v35 = vpop.eup %10154 }
 0x3d6   : > { %v10157_v36 = vpop.eup %10156  ;;  %v1461_v39 = vmul.f32 %v10155_v35, %v10151_v33  ;;  %v2361_v35 = vld [vmem:[#allocation13 + $0x38] sm:$0xff] }
 0x3d7   : > { %v1462_v40 = vmul.f32 %v10157_v36, %v10153_v34  ;;  %v2360_v36 = vld [vmem:[#allocation13 + $0x30] sm:$0xff] }
 0x3d8   : > { %9292 = vmatprep.mubr.msk.f32.mxu1 %vm846_vm3, %v1461_v39  ;;  %9303 = vmatprep.mubr.msk.f32.mxu0 %vm846_vm3, %v1461_v39  ;;  %v2359_v39 = vld [vmem:[#allocation13 + $0x28] sm:$0xff] }
 0x3d9   : > { %9293 = vmatmul.mubr.msk.f32.vlgmr.msra.gmra.mxu1 %vm846_vm3, %v1462_v40  ;;  %9304 = vmatmul.mubr.msk.f32.vlgmr.msra.gmra.mxu0 %vm846_vm3, %v1462_v40  ;;  %v2358_v40 = vld [vmem:[#allocation13 + $0x20] sm:$0xff] }
 0x3da   : > { %9310 = vmatprep.mubr.msk.f32.mxu1 %vm760_vm2, %v10871_v41  ;;  %9314 = vmatpush3.msra.mxu0 %v1739_v42 }
 0x3db   : > { %9315 = vmatprep.subr.mxu0 %v1738_v43 }
 0x3dc   : > { %9316 = vmatpush3.msra.mxu0 %v1738_v43 }
 0x3dd   : > { %9317 = vmatprep.subr.mxu0 %v1737_v44 }
 0x3de   : > { %9318 = vmatpush3.msra.mxu0 %v1737_v44  ;;  %v8518_v44 = vld [vmem:[#allocation10 + $0x1] ss:$0 sm:$0xff] }
 0x3df   : > { %9319 = vmatprep.subr.mxu0 %v1736_v56 }
 0x3e0   : > { %9320 = vmatpush3.msra.mxu0 %v1736_v56 }
 0x3e1   : > { %9335 = vmatprep.subr.mxu0 %v1921_v58 }
 0x499   : > { %v9305_v46 = vpop.f32.mrf.mxu0  ;;  %v10894_v60 = vpop.f32.mrf.mxu1 }
 0x49a   : > { %v1640_v47 = vadd.f32 %v9305_v46, %v8506_v45 }
 0x49b   : > { %v1634_v48 = vpop.f32.mrf.mxu0  ;;  %v10896_v61 = vpop.f32.mrf.mxu1 }
 0x49c   : > { %v1644_v49 = vadd.f32 %v1640_v47, %v10802_v18  ;;  %v1635_v50 = vadd.f32 %v8506_v45, %v1634_v48  ;;  %v1832_v18 = vld [vmem:[#allocation9 + $0x70] sm:$0xff] }
 0x49e   : > { %v10877_v51 = vmul.f32 %v1644_v49, %v10793_v10  ;;  %v1643_v52 = vadd.f32 %v1635_v50, %v10805_v20  ;;  %v1831_v20 = vld [vmem:[#allocation9 + $0x68] sm:$0xff] }
 0x4a0   : > { %v10881_v53 = vmul.f32 %v1643_v52, %v10795_v11  ;;  %9306 = vmatprep.subr.mxu1 %v10877_v51 }
 0x4a1   : > { %9307 = vmatpush3.msra.mxu1 %v10877_v51 }
 0x4a2   : > { %9308 = vmatprep.subr.mxu1 %v10881_v53 }
 0x4a3   : > { %9309 = vmatpush3.msra.mxu1 %v10881_v53 }
 0x4a4   : > { %9311 = vmatmul.mubr.msk.f32.vlgmr.msra.gmra.mxu1 %vm760_vm2, %v10888_v54  ;;  %9324 = vmatprep.subr.mxu1 %v1833_v55 }
 0x4a5   : > { %9325 = vmatpush3.msra.mxu1 %v1833_v55 }
 0x4a6   : > { %9326 = vmatprep.subr.mxu1 %v1832_v18 }
 0x4a7   : > { %9327 = vmatpush3.msra.mxu1 %v1832_v18 }
 0x4a8   : > { %9328 = vmatprep.subr.mxu1 %v1831_v20 }
 0x4a9   : > { %9329 = vmatpush3.msra.mxu1 %v1831_v20 }
 0x4aa   : > { %9330 = vmatprep.subr.mxu1 %v1830_v57 }
 0x4ab   : > { %9331 = vmatpush3.msra.mxu1 %v1830_v57 }
 0x4ac   : > { %9346 = vmatprep.subr.mxu1 %v2009_v59 }
 0x564   : > { %v9312_v62 = vpop.f32.mrf.mxu1 }
 0x566   : > { %v1726_v63 = vpop.f32.mrf.mxu1 }
 0x567   : > { %9321 = vmatprep.mubr.msk.f32.mxu0 %vm846_vm3, %v1726_v63  ;;  %9332 = vmatprep.mubr.msk.f32.mxu1 %vm846_vm3, %v1726_v63 }
 0x568   : > { %9322 = vmatmul.mubr.msk.f32.vlgmr.msra.gmra.mxu0 %vm846_vm3, %v9312_v62  ;;  %9333 = vmatmul.mubr.msk.f32.vlgmr.msra.gmra.mxu1 %vm846_vm3, %v9312_v62 }
 0x569   : > { %9336 = vmatpush3.msra.mxu0 %v1921_v58  ;;  %9347 = vmatpush3.msra.mxu1 %v2009_v59 }
 0x56a   : > { %9337 = vmatprep.subr.mxu0 %v1920_v0  ;;  %9343 = vmatprep.mubr.msk.f32.mxu0 %vm846_vm3, %v10881_v53 }
 0x56b   : > { %9348 = vmatprep.subr.mxu1 %v2008_v1  ;;  %9354 = vmatprep.mubr.msk.f32.mxu1 %vm846_vm3, %v10881_v53 }
 0x56c   : > { %9338 = vmatpush3.msra.mxu0 %v1920_v0  ;;  %9349 = vmatpush3.msra.mxu1 %v2008_v1 }
 0x56d   : > { %9339 = vmatprep.subr.mxu0 %v1919_v4  ;;  %9350 = vmatprep.subr.mxu1 %v2007_v5 }
 0x56e   : > { %9340 = vmatpush3.msra.mxu0 %v1919_v4  ;;  %9351 = vmatpush3.msra.mxu1 %v2007_v5 }
 0x56f   : > { %9341 = vmatprep.subr.mxu0 %v1918_v7  ;;  %9352 = vmatprep.subr.mxu1 %v2006_v8 }
 0x570   : > { %9342 = vmatpush3.msra.mxu0 %v1918_v7  ;;  %9353 = vmatpush3.msra.mxu1 %v2006_v8 }
 0x571   : > { %9344 = vmatmul.mubr.msk.f32.vlgmr.msra.gmra.mxu0 %vm846_vm3, %v10877_v51  ;;  %9355 = vmatmul.mubr.msk.f32.vlgmr.msra.gmra.mxu1 %vm846_vm3, %v10877_v51 }
 0x572   : > { %9357 = vmatprep.subr.mxu0 %v10877_v51  ;;  %9361 = vmatprep.mubr.msk.f32.mxu0 %vm760_vm2, %v10909_v9 }
 0x573   : > { %9358 = vmatpush3.msra.mxu0 %v10877_v51  ;;  %9364 = vmatprep.subr.mxu1 %v2175_v13 }
 0x574   : > { %9359 = vmatprep.subr.mxu0 %v10881_v53  ;;  %9365 = vmatpush3.msra.mxu1 %v2175_v13 }
 0x575   : > { %9360 = vmatpush3.msra.mxu0 %v10881_v53  ;;  %9366 = vmatprep.subr.mxu1 %v2174_v15 }
 0x576   : > { %9362 = vmatmul.mubr.msk.f32.vlgmr.msra.gmra.mxu0 %vm760_vm2, %v10922_v12  ;;  %9375 = vmatprep.subr.mxu0 %v2263_v14 }
 0x577   : > { %9376 = vmatpush3.msra.mxu0 %v2263_v14  ;;  %9367 = vmatpush3.msra.mxu1 %v2174_v15  ;;  %v2458_v15 = vld [vmem:[%s11438_s13 + $0x18] sm:$0xff] }
 0x578   : > { %9377 = vmatprep.subr.mxu0 %v2262_v16  ;;  %9368 = vmatprep.subr.mxu1 %v2173_v17 }
 0x579   : > { %9378 = vmatpush3.msra.mxu0 %v2262_v16  ;;  %9369 = vmatpush3.msra.mxu1 %v2173_v17  ;;  %v2457_v16 = vld [vmem:[%s11438_s13 + $0x10] sm:$0xff]  ;;  %v2456_v17 = vld [vmem:[%s11438_s13 + $0x8] sm:$0xff] }
 0x57a   : > { %9379 = vmatprep.subr.mxu0 %v2261_v19  ;;  %9370 = vmatprep.subr.mxu1 %v2172_v22 }
 0x57b   : > { %9380 = vmatpush3.msra.mxu0 %v2261_v19  ;;  %9371 = vmatpush3.msra.mxu1 %v2172_v22  ;;  %v2455_v19 = vld [vmem:[%s11438_s13] sm:$0xff] }
 0x57c   : > { %9381 = vmatprep.subr.mxu0 %v2260_v23  ;;  %9386 = vmatprep.subr.mxu1 %v2361_v35  ;;  %v8533_v22 = vld [vmem:[#allocation15 + $0x1] ss:$0 sm:$0xff] }
 0x57d   : > { %9382 = vmatpush3.msra.mxu0 %v2260_v23  ;;  %v8503_v23 = vld [vmem:[#allocation15] ss:$0 sm:$0xff] }
 0x57e   : > { %9397 = vmatprep.subr.mxu0 %v2458_v15 }
 0x628   : > { %v9323_v24 = vpop.f32.mrf.mxu0  ;;  %v9334_v42 = vpop.f32.mrf.mxu1 }
 0x629   : > { %v1828_v27 = vadd.f32 %v9323_v24, %v8515_v25  ;;  %v1916_v46 = vadd.f32 %v9334_v42, %v8518_v44 }
 0x62a   : > { %v1812_v26 = vpop.f32.mrf.mxu0  ;;  %v1900_v43 = vpop.f32.mrf.mxu1 }
 0x62b   : > { %v1827_v29 = vadd.f32 %v8515_v25, %v1812_v26  ;;  %v1915_v48 = vadd.f32 %v8518_v44, %v1900_v43  ;;  %v1552_v26 = vadd.f32 %v10894_v60, %v8503_v23 }
 0x631   : > { %v9345_v28 = vpop.f32.mrf.mxu0  ;;  %v9356_v45 = vpop.f32.mrf.mxu1 }
 0x632   : > { %v2004_v30 = vadd.f32 %v9345_v28, %v1828_v27  ;;  %v2086_v49 = vadd.f32 %v9356_v45, %v1916_v46  ;;  %v1547_v28 = vadd.f32 %v8503_v23, %v10896_v61  ;;  %v8536_v61 = vld [vmem:[%s11439_s14] ss:$0 sm:$0xff] }
 0x633   : > { %v1994_v31 = vpop.f32.mrf.mxu0  ;;  %v2076_v47 = vpop.f32.mrf.mxu1  ;;  %v3197_v23 = vld [vmem:[#allocation6 + $0x110] sm:$0xff] }
 0x634   : > { %v2003_v32 = vadd.f32 %v1994_v31, %v1827_v29  ;;  %v2085_v51 = vadd.f32 %v2076_v47, %v1915_v48 }
 0x636   : > { %v9363_v33 = vpop.f32.mrf.mxu0 }
 0x638   : > { %v2162_v34 = vpop.f32.mrf.mxu0 }
 0x639   : > { %9372 = vmatprep.mubr.msk.f32.mxu1 %vm846_vm3, %v2162_v34  ;;  %9383 = vmatprep.mubr.msk.f32.mxu0 %vm846_vm3, %v2162_v34  ;;  %v2593_v34 = vld [vmem:[#allocation2 + $0x2] sm:$0x3] }
 0x63a   : > { %9373 = vmatmul.mubr.msk.f32.vlgmr.msra.gmra.mxu1 %vm846_vm3, %v9363_v33  ;;  %9384 = vmatmul.mubr.msk.f32.vlgmr.msra.gmra.mxu0 %vm846_vm3, %v9363_v33 }
 0x63b   : > { %9387 = vmatpush3.msra.mxu1 %v2361_v35  ;;  %9398 = vmatpush3.msra.mxu0 %v2458_v15  ;;  %v3039_v15 = vld [vmem:[#allocation9 + $0xe8] sm:$0xff] }
 0x63c   : > { %9388 = vmatprep.subr.mxu1 %v2360_v36  ;;  %9399 = vmatprep.subr.mxu0 %v2457_v16 }
 0x63d   : > { %9389 = vmatpush3.msra.mxu1 %v2360_v36  ;;  %9400 = vmatpush3.msra.mxu0 %v2457_v16  ;;  %v2950_v16 = vld [vmem:[#allocation6 + $0xe0] sm:$0xff] }
 0x63e   : > { %9390 = vmatprep.subr.mxu1 %v2359_v39  ;;  %9401 = vmatprep.subr.mxu0 %v2456_v17 }
 0x63f   : > { %9391 = vmatpush3.msra.mxu1 %v2359_v39  ;;  %9402 = vmatpush3.msra.mxu0 %v2456_v17  ;;  %v3038_v17 = vld [vmem:[#allocation9 + $0xe0] sm:$0xff] }
 0x640   : > { %9392 = vmatprep.subr.mxu1 %v2358_v40  ;;  %9403 = vmatprep.subr.mxu0 %v2455_v19 }
 0x641   : > { %9393 = vmatpush3.msra.mxu1 %v2358_v40  ;;  %9404 = vmatpush3.msra.mxu0 %v2455_v19  ;;  %v2554_v40 = vpop.permute.xlu1 %2553  ;;  %v3198_v19 = vld [vmem:[#allocation6 + $0x118] sm:$0xff] }
 0x642   : > { %9408 = vmatprep.subr.msk.mxu1 %vm665_vm0, %v2593_v34 }
 0x6fa   : > { %v9385_v50 = vpop.f32.mrf.mxu0  ;;  %v9374_v56 = vpop.f32.mrf.mxu1 }
 0x6fb   : > { %v2340_v52 = vadd.f32 %v9385_v50, %v2086_v49  ;;  %v2258_v0 = vadd.f32 %v9374_v56, %v2004_v30 }
 0x6fc   : > { %v2330_v53 = vpop.f32.mrf.mxu0  ;;  %v2248_v57 = vpop.f32.mrf.mxu1 }
 0x6fd   : > { %v8532_v55 = vmul.f32 -1.442695, %v2340_v52  ;;  %v2339_v18 = vadd.f32 %v2330_v53, %v2085_v51  ;;  %v2257_v58 = vadd.f32 %v2248_v57, %v2003_v32  ;;  %v2769_v52 = vld [vmem:[#allocation6 + $0xc8] sm:$0xff]  ;;  %v8539_v53 = vld [vmem:[#allocation4 + $0x1] ss:$0 sm:$0xff] }
 0x6ff   : > { %10158 = vpow2.f32 %v8532_v55  ;;  %v8531_v20 = vmul.f32 -1.442695, %v2339_v18 }
 0x701   : > { %10160 = vpow2.f32 %v8531_v20 }
 0x702   : > { %10162 = vtanh.f32 %v2257_v58 }
 0x70c   : > { %v10159_v59 = vpop.eup %10158 }
 0x70d   : > { %v2350_v62 = vadd.f32 1.0, %v10159_v59  ;;  %v2865_v59 = vld [vmem:[#allocation9 + $0xd8] sm:$0xff] }
 0x70e   : > { %v10161_v63 = vpop.eup %10160 }
 0x70f   : > { %v2349_v1 = vadd.f32 1.0, %v10161_v63  ;;  %10164 = vrcp.f32 %v2350_v62  ;;  %v10163_v4 = vpop.eup %10162  ;;  %v2864_v62 = vld [vmem:[#allocation9 + $0xd0] sm:$0xff]  ;;  %v2863_v63 = vld [vmem:[#allocation9 + $0xc8] sm:$0xff] }
 0x711   : > { %10166 = vrcp.f32 %v2349_v1  ;;  %v2862_v1 = vld [vmem:[#allocation9 + $0xc0] sm:$0xff] }
 0x712   : > { %10168 = vtanh.f32 %v2258_v0  ;;  %v2768_v0 = vld [vmem:[#allocation6 + $0xc0] sm:$0xff] }
 0x71c   : > { %v10165_v5 = vpop.eup %10164 }
 0x71e   : > { %v10167_v7 = vpop.eup %10166 }
 0x71f   : > { %v10169_v8 = vpop.eup %10168  ;;  %v2355_v13 = vmul.f32 %v10167_v7, %v10163_v4  ;;  %v2953_v4 = vld [vmem:[#allocation6 + $0xf8] sm:$0xff] }
 0x720   : > { %v2356_v14 = vmul.f32 %v10169_v8, %v10165_v5  ;;  %v3041_v5 = vld [vmem:[#allocation9 + $0xf8] sm:$0xff] }
 0x721   : > { %9394 = vmatprep.mubr.msk.f32.mxu1 %vm846_vm3, %v2355_v13  ;;  %v3040_v13 = vld [vmem:[#allocation9 + $0xf0] sm:$0xff] }
 0x722   : > { %9395 = vmatmul.mubr.msk.f32.vlgmr.msra.gmra.mxu1 %vm846_vm3, %v2356_v14  ;;  %v2951_v14 = vld [vmem:[#allocation6 + $0xe8] sm:$0xff] }
 0x723   : > { %9409 = vmatpush3.msk.msra.mxu1 %vm665_vm0, %v2593_v34 }
 0x7e2   : > { %v9396_v24 = vpop.f32.mrf.mxu1 }
 0x7e3   : > { %v2448_v25 = vadd.f32 %v9396_v24, %v8533_v22  ;;  %v3285_v24 = vld [vmem:[#allocation9 + $0x110] sm:$0xff] }
 0x7e4   : > { %v2442_v27 = vpop.f32.mrf.mxu1 }
 0x7e5   : > { %v2443_v29 = vadd.f32 %v8533_v22, %v2442_v27  ;;  %v2452_v30 = vadd.f32 %v2448_v25, %v1552_v26  ;;  %v3286_v22 = vld [vmem:[#allocation9 + $0x118] sm:$0xff]  ;;  %v3284_v25 = vld [vmem:[#allocation9 + $0x108] sm:$0xff] }
 0x7e6   : > { %v3195_v26 = vld [vmem:[#allocation6 + $0x100] sm:$0xff] }
 0x7e7   : > { %v2451_v31 = vadd.f32 %v2443_v29, %v1547_v28  ;;  %v2454_v33 = vmul.f32 %v2452_v30, %v10793_v10  ;;  %v8547_v28 = vld [vmem:[#allocation7 + $0x2] ss:$0 sm:$0xff] }
 0x7e9   : > { %v2453_v32 = vmul.f32 %v2451_v31, %v10795_v11 }
 0x7eb   : > { %9405 = vmatprep.mubr.msk.f32.mxu0 %vm846_vm3, %v2453_v32 }
 0x7ec   : > { %9406 = vmatmul.mubr.msk.f32.vlgmr.msra.gmra.mxu0 %vm846_vm3, %v2454_v33 }
 0x7ed   : > { %9417 = vmatprep.mubr.msk.f32.mxu0 %vm760_vm2, %v10789_v6  ;;  %v2556_v6 = vpop.permute.xlu1 %2555 }
 0x8ac   : > { %v9407_v60 = vpop.f32.mrf.mxu0 }
 0x8ad   : > { %v2544_v36 = vadd.f32 %v9407_v60, %v8536_v61 }
 0x8ae   : > { %v2538_v35 = vpop.f32.mrf.mxu0 }
 0x8af   : > { %v2539_v39 = vadd.f32 %v8536_v61, %v2538_v35  ;;  %v2548_v43 = vmul.f32 %v2544_v36, %v10793_v10  ;;  %v3384_v36 = vld [vmem:[#allocation13 + $0x58] sm:$0xff] }
 0x8b1   : > { %v2547_v42 = vmul.f32 %v2539_v39, %v10795_v11  ;;  %v2560_v45 = vadd.f32 %v2556_v6, %v2548_v43  ;;  %v8569_v39 = vld [vmem:[%s11434_s9 + $0x38] sm:$0xff]  ;;  %v3382_v43 = vld [vmem:[#allocation13 + $0x48] sm:$0xff]  ;;  %v3381_v6 = vld [vmem:[#allocation13 + $0x40] sm:$0xff] }
 0x8b3   : > { %v2559_v44 = vadd.f32 %v2554_v40, %v2547_v42  ;;  %v3383_v40 = vld [vmem:[#allocation13 + $0x50] sm:$0xff] }
 0x8b4   : > { %v8568_v42 = vld [vmem:[%s11434_s9 + $0x30] sm:$0xff] }
 0x8b5   : > { %2569 = vrot.lane.b32.xlu1 %v2559_v44, %s10529_s23  ;;  %2563 = vrot.lane.b32.xlu0 %v2559_v44, %s10530_s25  ;;  %v8567_v44 = vld [vmem:[%s11434_s9 + $0x28] sm:$0xff] }
 0x8b9   : > { %2571 = vrot.lane.b32.xlu1 %v2560_v45, %s10529_s23  ;;  %2565 = vrot.lane.b32.xlu0 %v2560_v45, %s10530_s25  ;;  %v8566_v45 = vld [vmem:[%s11434_s9 + $0x20] sm:$0xff] }
 0x8bd   : > { %2584 = vrot.lane.b32.xlu1 %v10776_v2, %s10529_s23  ;;  %2578 = vrot.lane.b32.xlu0 %v10776_v2, %s10530_s25  ;;  %v2771_v2 = vld [vmem:[#allocation6 + $0xd8] sm:$0xff] }
 0x8be   : > { %9420 = vmatprep.subr.mxu1 %v2771_v2 }
 0x8c1   : > { %2586 = vrot.lane.b32.xlu1 %v10778_v3, %s10529_s23  ;;  %2580 = vrot.lane.b32.xlu0 %v10778_v3, %s10530_s25  ;;  %v2770_v3 = vld [vmem:[#allocation6 + $0xd0] sm:$0xff] }
 0x927   : > { %v2570_v46 = vpop.permute.xlu1 %2569  ;;  %v2564_v47 = vpop.permute.xlu0 %2563 }
 0x928   : > { %v10974_v48 = vsel %vm2575_vm4, %v2564_v47, %v2570_v46 }
 0x929   : > { %9410 = vmatprep.mubr.msk.f32.mxu1 %vm658_vm1, %v10974_v48 }
 0x92b   : > { %v2572_v49 = vpop.permute.xlu1 %2571  ;;  %v2566_v50 = vpop.permute.xlu0 %2565 }
 0x92c   : > { %v10979_v51 = vsel %vm2575_vm4, %v2566_v50, %v2572_v49  ;;  %v8550_v49 = vld [vmem:[#allocation10 + $0x2] ss:$0 sm:$0xff] }
 0x92d   : > { %9411 = vmatmul.mubr.msk.f32.vlgmr.msra.gmra.mxu1 %vm658_vm1, %v10979_v51 }
 0x92e   : > { %9421 = vmatpush3.msra.mxu1 %v2771_v2 }
 0x92f   : > { %9422 = vmatprep.subr.mxu1 %v2770_v3 }
 0x930   : > { %9423 = vmatpush3.msra.mxu1 %v2770_v3 }
 0x931   : > { %9424 = vmatprep.subr.mxu1 %v2769_v52 }
 0x932   : > { %9425 = vmatpush3.msra.mxu1 %v2769_v52 }
 0x933   : > { %9426 = vmatprep.subr.mxu1 %v2768_v0 }
 0x934   : > { %9427 = vmatpush3.msra.mxu1 %v2768_v0 }
 0x935   : > { %9442 = vmatprep.subr.mxu1 %v2953_v4 }
 0x9ed   : > { %v9412_v55 = vpop.f32.mrf.mxu1 }
 0x9ee   : > { %v2683_v18 = vadd.f32 %v9412_v55, %v8539_v53 }
 0x9ef   : > { %v2677_v20 = vpop.f32.mrf.mxu1 }
 0x9f0   : > { %v10984_v56 = vmul.f32 %v2683_v18, %v10793_v10  ;;  %v2678_v57 = vadd.f32 %v8539_v53, %v2677_v20 }
 0x9f2   : > { %v10987_v58 = vmul.f32 %v2678_v57, %v10795_v11  ;;  %9413 = vmatprep.subr.mxu0 %v10984_v56 }
 0x9f3   : > { %9414 = vmatpush3.msra.mxu0 %v10984_v56 }
 0x9f4   : > { %9415 = vmatprep.subr.mxu0 %v10987_v58 }
 0x9f5   : > { %9416 = vmatpush3.msra.mxu0 %v10987_v58 }
 0x9f6   : > { %9418 = vmatmul.mubr.msk.f32.vlgmr.msra.gmra.mxu0 %vm760_vm2, %v10812_v21  ;;  %9431 = vmatprep.subr.mxu0 %v2865_v59  ;;  %v2952_v21 = vld [vmem:[#allocation6 + $0xf0] sm:$0xff] }
 0x9f7   : > { %9432 = vmatpush3.msra.mxu0 %v2865_v59 }
 0x9f8   : > { %9433 = vmatprep.subr.mxu0 %v2864_v62 }
 0x9f9   : > { %9434 = vmatpush3.msra.mxu0 %v2864_v62 }
 0x9fa   : > { %9435 = vmatprep.subr.mxu0 %v2863_v63 }
 0x9fb   : > { %9436 = vmatpush3.msra.mxu0 %v2863_v63 }
 0x9fc   : > { %9437 = vmatprep.subr.mxu0 %v2862_v1 }
 0x9fd   : > { %9438 = vmatpush3.msra.mxu0 %v2862_v1 }
 0x9fe   : > { %9453 = vmatprep.subr.mxu0 %v3041_v5 }
 0xab6   : > { %v9419_v7 = vpop.f32.mrf.mxu0 }
 0xab8   : > { %v2758_v8 = vpop.f32.mrf.mxu0 }
 0xab9   : > { %9428 = vmatprep.mubr.msk.f32.mxu1 %vm846_vm3, %v2758_v8  ;;  %9439 = vmatprep.mubr.msk.f32.mxu0 %vm846_vm3, %v2758_v8 }
 0xaba   : > { %9429 = vmatmul.mubr.msk.f32.vlgmr.msra.gmra.mxu1 %vm846_vm3, %v9419_v7  ;;  %9440 = vmatmul.mubr.msk.f32.vlgmr.msra.gmra.mxu0 %vm846_vm3, %v9419_v7 }
 0xabb   : > { %9443 = vmatpush3.msra.mxu1 %v2953_v4  ;;  %9454 = vmatpush3.msra.mxu0 %v3041_v5 }
 0xabc   : > { %9444 = vmatprep.subr.mxu1 %v2952_v21  ;;  %9450 = vmatprep.mubr.msk.f32.mxu1 %vm846_vm3, %v10987_v58 }
 0xabd   : > { %9455 = vmatprep.subr.mxu0 %v3040_v13  ;;  %9461 = vmatprep.mubr.msk.f32.mxu0 %vm846_vm3, %v10987_v58 }
 0xabe   : > { %9445 = vmatpush3.msra.mxu1 %v2952_v21  ;;  %9456 = vmatpush3.msra.mxu0 %v3040_v13 }
 0xabf   : > { %9446 = vmatprep.subr.mxu1 %v2951_v14  ;;  %9457 = vmatprep.subr.mxu0 %v3039_v15 }
 0xac0   : > { %9447 = vmatpush3.msra.mxu1 %v2951_v14  ;;  %9458 = vmatpush3.msra.mxu0 %v3039_v15 }
 0xac1   : > { %9448 = vmatprep.subr.mxu1 %v2950_v16  ;;  %9459 = vmatprep.subr.mxu0 %v3038_v17 }
 0xac2   : > { %9449 = vmatpush3.msra.mxu1 %v2950_v16  ;;  %9460 = vmatpush3.msra.mxu0 %v3038_v17 }
 0xac3   : > { %9451 = vmatmul.mubr.msk.f32.vlgmr.msra.gmra.mxu1 %vm846_vm3, %v10984_v56  ;;  %9462 = vmatmul.mubr.msk.f32.vlgmr.msra.gmra.mxu0 %vm846_vm3, %v10984_v56 }
 0xac4   : > { %9464 = vmatprep.subr.mxu1 %v10984_v56  ;;  %9468 = vmatprep.mubr.msk.f32.mxu1 %vm760_vm2, %v10829_v37  ;;  %v3196_v37 = vld [vmem:[#allocation6 + $0x108] sm:$0xff] }
 0xac5   : > { %9465 = vmatpush3.msra.mxu1 %v10984_v56  ;;  %9471 = vmatprep.subr.mxu0 %v3198_v19 }
 0xac6   : > { %9466 = vmatprep.subr.mxu1 %v10987_v58  ;;  %9472 = vmatpush3.msra.mxu0 %v3198_v19 }
 0xac7   : > { %9467 = vmatpush3.msra.mxu1 %v10987_v58  ;;  %9473 = vmatprep.subr.mxu0 %v3197_v23 }
 0xac8   : > { %9469 = vmatmul.mubr.msk.f32.vlgmr.msra.gmra.mxu1 %vm760_vm2, %v10842_v38  ;;  %9482 = vmatprep.subr.mxu1 %v3286_v22  ;;  %v3283_v38 = vld [vmem:[#allocation9 + $0x100] sm:$0xff] }
 0xac9   : > { %9483 = vmatpush3.msra.mxu1 %v3286_v22  ;;  %9474 = vmatpush3.msra.mxu0 %v3197_v23  ;;  %v3651_v23 = vld [vmem:[#allocation6 + $0x138] sm:$0xff] }
 0xaca   : > { %9484 = vmatprep.subr.mxu1 %v3285_v24  ;;  %9475 = vmatprep.subr.mxu0 %v3196_v37 }
 0xacb   : > { %9485 = vmatpush3.msra.mxu1 %v3285_v24  ;;  %9476 = vmatpush3.msra.mxu0 %v3196_v37  ;;  %v3650_v24 = vld [vmem:[#allocation6 + $0x130] sm:$0xff]  ;;  %v3649_v37 = vld [vmem:[#allocation6 + $0x128] sm:$0xff] }
 0xacc   : > { %9486 = vmatprep.subr.mxu1 %v3284_v25  ;;  %9477 = vmatprep.subr.mxu0 %v3195_v26 }
 0xacd   : > { %9487 = vmatpush3.msra.mxu1 %v3284_v25  ;;  %9478 = vmatpush3.msra.mxu0 %v3195_v26  ;;  %v8570_v25 = vld [vmem:[#allocation12 + $0x1] ss:$0 sm:$0xff] }
 0xace   : > { %9488 = vmatprep.subr.mxu1 %v3283_v38  ;;  %9493 = vmatprep.subr.mxu0 %v3384_v36 }
 0xacf   : > { %9489 = vmatpush3.msra.mxu1 %v3283_v38 }
 0xad0   : > { %9504 = vmatprep.subr.mxu1 %v8569_v39 }
 0xb7a   : > { %v9430_v27 = vpop.f32.mrf.mxu1  ;;  %v9441_v46 = vpop.f32.mrf.mxu0 }
 0xb7b   : > { %v2860_v30 = vadd.f32 %v9430_v27, %v8547_v28  ;;  %v2948_v2 = vadd.f32 %v9441_v46, %v8550_v49  ;;  %v4078_v46 = vld [vmem:[#allocation6 + $0x178] sm:$0xff] }
 0xb7c   : > { %v2844_v29 = vpop.f32.mrf.mxu1  ;;  %v2932_v47 = vpop.f32.mrf.mxu0 }
 0xb7d   : > { %v2859_v32 = vadd.f32 %v8547_v28, %v2844_v29  ;;  %v2947_v52 = vadd.f32 %v8550_v49, %v2932_v47  ;;  %v4166_v47 = vld [vmem:[#allocation9 + $0x178] sm:$0xff]  ;;  %v4077_v49 = vld [vmem:[#allocation6 + $0x170] sm:$0xff] }
 0xb83   : > { %v9452_v31 = vpop.f32.mrf.mxu1  ;;  %v9463_v50 = vpop.f32.mrf.mxu0 }
 0xb84   : > { %v3036_v33 = vadd.f32 %v9452_v31, %v2860_v30  ;;  %v3118_v53 = vadd.f32 %v9463_v50, %v2948_v2  ;;  %v4165_v50 = vld [vmem:[#allocation9 + $0x170] sm:$0xff]  ;;  %v4076_v2 = vld [vmem:[#allocation6 + $0x168] sm:$0xff] }
 0xb85   : > { %v3026_v34 = vpop.f32.mrf.mxu1  ;;  %v3108_v3 = vpop.f32.mrf.mxu0 }
 0xb86   : > { %v3035_v60 = vadd.f32 %v3026_v34, %v2859_v32  ;;  %v3117_v18 = vadd.f32 %v3108_v3, %v2947_v52  ;;  %v3745_v32 = vld [vmem:[#allocation9 + $0x138] sm:$0xff]  ;;  %v3743_v34 = vld [vmem:[#allocation9 + $0x128] sm:$0xff] }
 0xb87   : > { %v4075_v3 = vld [vmem:[#allocation6 + $0x160] sm:$0xff] }
 0xb88   : > { %v9470_v61 = vpop.f32.mrf.mxu1 }
 0xb8a   : > { %v3185_v35 = vpop.f32.mrf.mxu1 }
 0xb8b   : > { %9479 = vmatprep.mubr.msk.f32.mxu0 %vm846_vm3, %v3185_v35  ;;  %9490 = vmatprep.mubr.msk.f32.mxu1 %vm846_vm3, %v3185_v35 }
 0xb8c   : > { %9480 = vmatmul.mubr.msk.f32.vlgmr.msra.gmra.mxu0 %vm846_vm3, %v9470_v61  ;;  %9491 = vmatmul.mubr.msk.f32.vlgmr.msra.gmra.mxu1 %vm846_vm3, %v9470_v61  ;;  %v3921_v61 = vld [vmem:[#allocation9 + $0x158] sm:$0xff] }
 0xb8d   : > { %9494 = vmatpush3.msra.mxu0 %v3384_v36  ;;  %9505 = vmatpush3.msra.mxu1 %v8569_v39 }
 0xb8e   : > { %9495 = vmatprep.subr.mxu0 %v3383_v40  ;;  %9506 = vmatprep.subr.mxu1 %v8568_v42 }
 0xb8f   : > { %9496 = vmatpush3.msra.mxu0 %v3383_v40  ;;  %9507 = vmatpush3.msra.mxu1 %v8568_v42  ;;  %v3832_v40 = vld [vmem:[#allocation6 + $0x150] sm:$0xff]  ;;  %v3920_v42 = vld [vmem:[#allocation9 + $0x150] sm:$0xff] }
 0xb90   : > { %9497 = vmatprep.subr.mxu0 %v3382_v43  ;;  %9508 = vmatprep.subr.mxu1 %v8567_v44 }
 0xb91   : > { %9498 = vmatpush3.msra.mxu0 %v3382_v43  ;;  %9509 = vmatpush3.msra.mxu1 %v8567_v44  ;;  %v3831_v43 = vld [vmem:[#allocation6 + $0x148] sm:$0xff]  ;;  %v3919_v44 = vld [vmem:[#allocation9 + $0x148] sm:$0xff] }
 0xb92   : > { %9499 = vmatprep.subr.mxu0 %v3381_v6  ;;  %9510 = vmatprep.subr.mxu1 %v8566_v45 }
 0xb93   : > { %9500 = vmatpush3.msra.mxu0 %v3381_v6  ;;  %9511 = vmatpush3.msra.mxu1 %v8566_v45  ;;  %v3830_v6 = vld [vmem:[#allocation6 + $0x140] sm:$0xff]  ;;  %v3918_v45 = vld [vmem:[#allocation9 + $0x140] sm:$0xff] }
 0xb94   : > { %9522 = vmatprep.subr.mxu1 %v3651_v23 }
 0xc4c   : > { %v9492_v55 = vpop.f32.mrf.mxu1  ;;  %v9481_v0 = vpop.f32.mrf.mxu0 }
 0xc4d   : > { %v3363_v20 = vadd.f32 %v9492_v55, %v3118_v53  ;;  %v3281_v21 = vadd.f32 %v9481_v0, %v3036_v33  ;;  %v3744_v33 = vld [vmem:[#allocation9 + $0x130] sm:$0xff]  ;;  %v8577_v53 = vld [vmem:[#allocation7 + $0x3] ss:$0 sm:$0xff] }
 0xc4e   : > { %v3353_v57 = vpop.f32.mrf.mxu1  ;;  %v3271_v1 = vpop.f32.mrf.mxu0 }
 0xc4f   : > { %v8562_v59 = vmul.f32 -1.442695, %v3363_v20  ;;  %v3362_v62 = vadd.f32 %v3353_v57, %v3117_v18  ;;  %v3280_v4 = vadd.f32 %v3271_v1, %v3035_v60  ;;  %v3833_v60 = vld [vmem:[#allocation6 + $0x158] sm:$0xff] }
 0xc51   : > { %10170 = vpow2.f32 %v8562_v59  ;;  %v8561_v63 = vmul.f32 -1.442695, %v3362_v62 }
 0xc53   : > { %10172 = vpow2.f32 %v8561_v63 }
 0xc54   : > { %10174 = vtanh.f32 %v3280_v4  ;;  %v4264_v4 = vld [vmem:[#allocation13 + $0x78] sm:$0xff] }
 0xc5e   : > { %v10171_v5 = vpop.eup %10170 }
 0xc5f   : > { %v3373_v7 = vadd.f32 1.0, %v10171_v5  ;;  %v4263_v5 = vld [vmem:[#allocation13 + $0x70] sm:$0xff] }
 0xc60   : > { %v10173_v8 = vpop.eup %10172 }
 0xc61   : > { %v3372_v13 = vadd.f32 1.0, %v10173_v8  ;;  %10176 = vrcp.f32 %v3373_v7  ;;  %v10175_v14 = vpop.eup %10174  ;;  %v4262_v7 = vld [vmem:[#allocation13 + $0x68] sm:$0xff]  ;;  %v4261_v8 = vld [vmem:[#allocation13 + $0x60] sm:$0xff] }
 0xc63   : > { %10178 = vrcp.f32 %v3372_v13 }
 0xc64   : > { %10180 = vtanh.f32 %v3281_v21 }
 0xc6e   : > { %v10177_v15 = vpop.eup %10176 }
 0xc70   : > { %v10179_v16 = vpop.eup %10178 }
 0xc71   : > { %v10181_v17 = vpop.eup %10180  ;;  %v3378_v19 = vmul.f32 %v10179_v16, %v10175_v14  ;;  %v8580_v14 = vld [vmem:[#allocation10 + $0x3] ss:$0 sm:$0xff] }
 0xc72   : > { %v3379_v22 = vmul.f32 %v10181_v17, %v10177_v15 }
 0xc73   : > { %9501 = vmatprep.mubr.msk.f32.mxu0 %vm846_vm3, %v3378_v19  ;;  %9512 = vmatprep.mubr.msk.f32.mxu1 %vm846_vm3, %v3378_v19 }
 0xc74   : > { %9502 = vmatmul.mubr.msk.f32.vlgmr.msra.gmra.mxu0 %vm846_vm3, %v3379_v22  ;;  %9513 = vmatmul.mubr.msk.f32.vlgmr.msra.gmra.mxu1 %vm846_vm3, %v3379_v22 }
 0xc75   : > { %9519 = vmatprep.mubr.msk.f32.mxu0 %vm760_vm2, %v10871_v41  ;;  %9523 = vmatpush3.msra.mxu1 %v3651_v23 }
 0xc76   : > { %9524 = vmatprep.subr.mxu1 %v3650_v24 }
 0xc77   : > { %9525 = vmatpush3.msra.mxu1 %v3650_v24 }
 0xc78   : > { %9526 = vmatprep.subr.mxu1 %v3649_v37 }
 0xc79   : > { %9527 = vmatpush3.msra.mxu1 %v3649_v37 }
 0xd34   : > { %v9514_v26 = vpop.f32.mrf.mxu1  ;;  %v11043_v35 = vpop.f32.mrf.mxu0 }
 0xd35   : > { %v3561_v38 = vadd.f32 %v9514_v26, %v8570_v25 }
 0xd36   : > { %v3555_v27 = vpop.f32.mrf.mxu1 }
 0xd37   : > { %v3565_v28 = vadd.f32 %v3561_v38, %v10984_v56  ;;  %v3556_v29 = vadd.f32 %v8570_v25, %v3555_v27  ;;  %v3648_v56 = vld [vmem:[#allocation6 + $0x120] sm:$0xff] }
 0xd38   : > { %9528 = vmatprep.subr.mxu1 %v3648_v56 }
 0xd39   : > { %v3567_v30 = vmul.f32 %v3565_v28, %v10793_v10  ;;  %v3564_v41 = vadd.f32 %v3556_v29, %v10987_v58  ;;  %v3742_v58 = vld [vmem:[#allocation9 + $0x120] sm:$0xff]  ;;  %9529 = vmatpush3.msra.mxu1 %v3648_v56 }
 0xd3a   : > { %9544 = vmatprep.subr.mxu1 %v3833_v60 }
 0xd3b   : > { %v3566_v31 = vmul.f32 %v3564_v41, %v10795_v11  ;;  %9515 = vmatprep.subr.mxu0 %v3567_v30 }
 0xd3c   : > { %9516 = vmatpush3.msra.mxu0 %v3567_v30 }
 0xd3d   : > { %9517 = vmatprep.subr.mxu0 %v3566_v31 }
 0xd3e   : > { %9518 = vmatpush3.msra.mxu0 %v3566_v31 }
 0xd3f   : > { %9520 = vmatmul.mubr.msk.f32.vlgmr.msra.gmra.mxu0 %vm760_vm2, %v10888_v54  ;;  %9533 = vmatprep.subr.mxu0 %v3745_v32  ;;  %v11045_v54 = vpop.f32.mrf.mxu0 }
 0xd40   : > { %9534 = vmatpush3.msra.mxu0 %v3745_v32 }
 0xd41   : > { %9535 = vmatprep.subr.mxu0 %v3744_v33 }
 0xd42   : > { %9536 = vmatpush3.msra.mxu0 %v3744_v33 }
 0xd43   : > { %9537 = vmatprep.subr.mxu0 %v3743_v34 }
 0xd44   : > { %9538 = vmatpush3.msra.mxu0 %v3743_v34 }
 0xd45   : > { %9539 = vmatprep.subr.mxu0 %v3742_v58 }
 0xd46   : > { %9540 = vmatpush3.msra.mxu0 %v3742_v58 }
 0xd47   : > { %9555 = vmatprep.subr.mxu0 %v3921_v61 }
 0xdff   : > { %v9521_v36 = vpop.f32.mrf.mxu0 }
 0xe01   : > { %v3638_v39 = vpop.f32.mrf.mxu0 }
 0xe02   : > { %9530 = vmatprep.mubr.msk.f32.mxu1 %vm846_vm3, %v3638_v39  ;;  %9541 = vmatprep.mubr.msk.f32.mxu0 %vm846_vm3, %v3638_v39 }
 0xe03   : > { %9531 = vmatmul.mubr.msk.f32.vlgmr.msra.gmra.mxu1 %vm846_vm3, %v9521_v36  ;;  %9542 = vmatmul.mubr.msk.f32.vlgmr.msra.gmra.mxu0 %vm846_vm3, %v9521_v36 }
 0xe04   : > { %9545 = vmatpush3.msra.mxu1 %v3833_v60  ;;  %9556 = vmatpush3.msra.mxu0 %v3921_v61 }
 0xe05   : > { %9546 = vmatprep.subr.mxu1 %v3832_v40  ;;  %9552 = vmatprep.mubr.msk.f32.mxu1 %vm846_vm3, %v3566_v31 }
 0xe06   : > { %9557 = vmatprep.subr.mxu0 %v3920_v42  ;;  %9563 = vmatprep.mubr.msk.f32.mxu0 %vm846_vm3, %v3566_v31 }
 0xe07   : > { %9547 = vmatpush3.msra.mxu1 %v3832_v40  ;;  %9558 = vmatpush3.msra.mxu0 %v3920_v42  ;;  %v8599_v40 = vld [vmem:[%s11438_s13 + $0x38] sm:$0xff]  ;;  %v8598_v42 = vld [vmem:[%s11438_s13 + $0x30] sm:$0xff] }
 0xe08   : > { %9548 = vmatprep.subr.mxu1 %v3831_v43  ;;  %9559 = vmatprep.subr.mxu0 %v3919_v44 }
 0xe09   : > { %9549 = vmatpush3.msra.mxu1 %v3831_v43  ;;  %9560 = vmatpush3.msra.mxu0 %v3919_v44  ;;  %v8597_v43 = vld [vmem:[%s11438_s13 + $0x28] sm:$0xff]  ;;  %v8596_v44 = vld [vmem:[%s11438_s13 + $0x20] sm:$0xff] }
 0xe0a   : > { %9550 = vmatprep.subr.mxu1 %v3830_v6  ;;  %9561 = vmatprep.subr.mxu0 %v3918_v45 }
 0xe0b   : > { %9551 = vmatpush3.msra.mxu1 %v3830_v6  ;;  %9562 = vmatpush3.msra.mxu0 %v3918_v45  ;;  %v8593_v6 = vld [vmem:[#allocation15 + $0x3] ss:$0 sm:$0xff]  ;;  %v8563_v45 = vld [vmem:[#allocation15 + $0x2] ss:$0 sm:$0xff] }
 0xe0c   : > { %9553 = vmatmul.mubr.msk.f32.vlgmr.msra.gmra.mxu1 %vm846_vm3, %v3567_v30  ;;  %9564 = vmatmul.mubr.msk.f32.vlgmr.msra.gmra.mxu0 %vm846_vm3, %v3567_v30 }
 0xe0d   : > { %9566 = vmatprep.subr.mxu1 %v3567_v30  ;;  %9570 = vmatprep.mubr.msk.f32.mxu1 %vm760_vm2, %v10909_v9  ;;  %v4164_v9 = vld [vmem:[#allocation9 + $0x168] sm:$0xff] }
 0xe0e   : > { %9567 = vmatpush3.msra.mxu1 %v3567_v30  ;;  %9573 = vmatprep.subr.mxu0 %v4078_v46 }
 0xe0f   : > { %9568 = vmatprep.subr.mxu1 %v3566_v31  ;;  %9574 = vmatpush3.msra.mxu0 %v4078_v46 }
 0xe10   : > { %9569 = vmatpush3.msra.mxu1 %v3566_v31  ;;  %9575 = vmatprep.subr.mxu0 %v4077_v49 }
 0xe11   : > { %9571 = vmatmul.mubr.msk.f32.vlgmr.msra.gmra.mxu1 %vm760_vm2, %v10922_v12  ;;  %9584 = vmatprep.subr.mxu1 %v4166_v47  ;;  %v4163_v12 = vld [vmem:[#allocation9 + $0x160] sm:$0xff] }
 0xe12   : > { %9585 = vmatpush3.msra.mxu1 %v4166_v47  ;;  %9576 = vmatpush3.msra.mxu0 %v4077_v49  ;;  %v3471_v49 = vadd.f32 %v11043_v35, %v8563_v45  ;;  %v4489_v35 = vld [vmem:[#allocation2 + $0x4] sm:$0x3] }
 0xe13   : > { %9586 = vmatprep.subr.mxu1 %v4165_v50  ;;  %9577 = vmatprep.subr.mxu0 %v4076_v2 }
 0xe14   : > { %9587 = vmatpush3.msra.mxu1 %v4165_v50  ;;  %9578 = vmatpush3.msra.mxu0 %v4076_v2  ;;  %v3466_v2 = vadd.f32 %v8563_v45, %v11045_v54  ;;  %v2585_v54 = vpop.permute.xlu1 %2584  ;;  %v11156_v45 = vld [vmem:[%s11427_s2 + $0x20] sm:$0xff] }
 0xe15   : > { %9588 = vmatprep.subr.mxu1 %v4164_v9  ;;  %9579 = vmatprep.subr.mxu0 %v4075_v3 }
 0xe16   : > { %9589 = vmatpush3.msra.mxu1 %v4164_v9  ;;  %9580 = vmatpush3.msra.mxu0 %v4075_v3 }
 0xe17   : > { %9590 = vmatprep.subr.mxu1 %v4163_v12  ;;  %9595 = vmatprep.subr.mxu0 %v4264_v4 }
 0xe18   : > { %9591 = vmatpush3.msra.mxu1 %v4163_v12 }
 0xe19   : > { %9606 = vmatprep.subr.mxu1 %v8599_v40 }
 0xec3   : > { %v9532_v52 = vpop.f32.mrf.mxu1  ;;  %v9543_v21 = vpop.f32.mrf.mxu0 }
 0xec4   : > { %v3740_v18 = vadd.f32 %v9532_v52, %v8577_v53  ;;  %v3828_v16 = vadd.f32 %v9543_v21, %v8580_v14 }
 0xec5   : > { %v3724_v55 = vpop.f32.mrf.mxu1  ;;  %v3812_v13 = vpop.f32.mrf.mxu0 }
 0xec6   : > { %v3739_v57 = vadd.f32 %v8577_v53, %v3724_v55  ;;  %v3827_v19 = vadd.f32 %v8580_v14, %v3812_v13  ;;  %v11086_v55 = vld [vmem:[%s11427_s2] sm:$0xff] }
 0xecc   : > { %v9554_v20 = vpop.f32.mrf.mxu1  ;;  %v9565_v15 = vpop.f32.mrf.mxu0 }
 0xecd   : > { %v3916_v59 = vadd.f32 %v9554_v20, %v3740_v18  ;;  %v3998_v22 = vadd.f32 %v9565_v15, %v3828_v16  ;;  %v2579_v18 = vpop.permute.xlu0 %2578 }
 0xece   : > { %v3906_v62 = vpop.f32.mrf.mxu1  ;;  %v3988_v17 = vpop.f32.mrf.mxu0 }
 0xecf   : > { %v3915_v63 = vadd.f32 %v3906_v62, %v3739_v57  ;;  %v3997_v24 = vadd.f32 %v3988_v17, %v3827_v19  ;;  %v8601_v57 = vld [vmem:[%s11439_s14 + $0x1] ss:$0 sm:$0xff] }
 0xed1   : > { %v9572_v0 = vpop.f32.mrf.mxu1 }
 0xed3   : > { %v4065_v1 = vpop.f32.mrf.mxu1 }
 0xed4   : > { %9581 = vmatprep.mubr.msk.f32.mxu0 %vm846_vm3, %v4065_v1  ;;  %9592 = vmatprep.mubr.msk.f32.mxu1 %vm846_vm3, %v4065_v1 }
 0xed5   : > { %9582 = vmatmul.mubr.msk.f32.vlgmr.msra.gmra.mxu0 %vm846_vm3, %v9572_v0  ;;  %9593 = vmatmul.mubr.msk.f32.vlgmr.msra.gmra.mxu1 %vm846_vm3, %v9572_v0  ;;  %v2581_v0 = vpop.permute.xlu0 %2580 }
 0xed6   : > { %9596 = vmatpush3.msra.mxu0 %v4264_v4  ;;  %9607 = vmatpush3.msra.mxu1 %v8599_v40  ;;  %v4936_v40 = vld [vmem:[#allocation9 + $0x1b0] sm:$0xff] }
 0xed7   : > { %9597 = vmatprep.subr.mxu0 %v4263_v5  ;;  %9608 = vmatprep.subr.mxu1 %v8598_v42 }
 0xed8   : > { %9598 = vmatpush3.msra.mxu0 %v4263_v5  ;;  %9609 = vmatpush3.msra.mxu1 %v8598_v42  ;;  %v4847_v42 = vld [vmem:[#allocation6 + $0x1a8] sm:$0xff] }
 0xed9   : > { %9599 = vmatprep.subr.mxu0 %v4262_v7  ;;  %9610 = vmatprep.subr.mxu1 %v8597_v43 }
 0xeda   : > { %9600 = vmatpush3.msra.mxu0 %v4262_v7  ;;  %9611 = vmatpush3.msra.mxu1 %v8597_v43  ;;  %v4935_v43 = vld [vmem:[#allocation9 + $0x1a8] sm:$0xff] }
 0xedb   : > { %9601 = vmatprep.subr.mxu0 %v4261_v8  ;;  %9612 = vmatprep.subr.mxu1 %v8596_v44 }
 0xedc   : > { %9602 = vmatpush3.msra.mxu0 %v4261_v8  ;;  %9613 = vmatpush3.msra.mxu1 %v8596_v44  ;;  %v4846_v44 = vld [vmem:[#allocation6 + $0x1a0] sm:$0xff] }
 0xedd   : > { %9617 = vmatprep.subr.msk.mxu0 %vm665_vm0, %v4489_v35 }
 0xf95   : > { %v9594_v23 = vpop.f32.mrf.mxu1  ;;  %v9583_v28 = vpop.f32.mrf.mxu0 }
 0xf96   : > { %v4243_v37 = vadd.f32 %v9594_v23, %v3998_v22  ;;  %v4161_v33 = vadd.f32 %v9583_v28, %v3916_v59  ;;  %v2590_v59 = vsel %vm2575_vm4, %v2579_v18, %v2585_v54 }
 0xf97   : > { %v4233_v25 = vpop.f32.mrf.mxu1  ;;  %v4151_v29 = vpop.f32.mrf.mxu0  ;;  %v4454_v5 = vmul.f32 %v2590_v59, %v10795_v11 }
 0xf98   : > { %v8592_v26 = vmul.f32 -1.442695, %v4243_v37  ;;  %v4242_v38 = vadd.f32 %v4233_v25, %v3997_v24  ;;  %v4160_v30 = vadd.f32 %v4151_v29, %v3915_v63  ;;  %v2587_v63 = vpop.permute.xlu1 %2586  ;;  %v4666_v37 = vld [vmem:[#allocation6 + $0x190] sm:$0xff]  ;;  %v8604_v25 = vld [vmem:[#allocation4 + $0x2] ss:$0 sm:$0xff] }
 0xf99   : > { %v2591_v8 = vsel %vm2575_vm4, %v2581_v0, %v2587_v63 }
 0xf9a   : > { %10182 = vpow2.f32 %v8592_v26  ;;  %v8591_v27 = vmul.f32 -1.442695, %v4242_v38  ;;  %v4455_v14 = vmul.f32 %v2591_v8, %v10793_v10  ;;  %v8633_v8 = vld [vmem:[%s11434_s9 + $0x50] sm:$0xff] }
 0xf9c   : > { %10184 = vpow2.f32 %v8591_v27 }
 0xf9d   : > { %10186 = vtanh.f32 %v4160_v30 }
 0xfa7   : > { %v10183_v41 = vpop.eup %10182 }
 0xfa8   : > { %v4253_v31 = vadd.f32 1.0, %v10183_v41  ;;  %v4761_v41 = vld [vmem:[#allocation9 + $0x198] sm:$0xff] }
 0xfa9   : > { %v10185_v32 = vpop.eup %10184 }
 0xfaa   : > { %v4252_v34 = vadd.f32 1.0, %v10185_v32  ;;  %10188 = vrcp.f32 %v4253_v31  ;;  %v10187_v56 = vpop.eup %10186  ;;  %v4760_v31 = vld [vmem:[#allocation9 + $0x190] sm:$0xff] }
 0xfab   : > { %v11136_v32 = vld [vmem:[%s11427_s2 + $0x8] sm:$0xff] }
 0xfac   : > { %10190 = vrcp.f32 %v4252_v34  ;;  %v4664_v34 = vld [vmem:[#allocation6 + $0x180] sm:$0xff] }
 0xfad   : > { %10192 = vtanh.f32 %v4161_v33  ;;  %v4759_v33 = vld [vmem:[#allocation9 + $0x188] sm:$0xff] }
 0xfb7   : > { %v10189_v58 = vpop.eup %10188 }
 0xfb9   : > { %v10191_v60 = vpop.eup %10190 }
 0xfba   : > { %v10193_v61 = vpop.eup %10192  ;;  %v4258_v36 = vmul.f32 %v10191_v60, %v10187_v56  ;;  %v4758_v56 = vld [vmem:[#allocation9 + $0x180] sm:$0xff]  ;;  %v4937_v60 = vld [vmem:[#allocation9 + $0x1b8] sm:$0xff] }
 0xfbb   : > { %v4259_v39 = vmul.f32 %v10193_v61, %v10189_v58  ;;  %v4849_v58 = vld [vmem:[#allocation6 + $0x1b8] sm:$0xff] }
 0xfbc   : > { %9603 = vmatprep.mubr.msk.f32.mxu0 %vm846_vm3, %v4258_v36 }
 0xfbd   : > { %9604 = vmatmul.mubr.msk.f32.vlgmr.msra.gmra.mxu0 %vm846_vm3, %v4259_v39  ;;  %v4848_v39 = vld [vmem:[#allocation6 + $0x1b0] sm:$0xff] }
 0xfbe   : > { %9618 = vmatpush3.msk.msra.mxu0 %vm665_vm0, %v4489_v35  ;;  %v8612_v35 = vld [vmem:[#allocation7 + $0x4] ss:$0 sm:$0xff] }
0x107d   : > { %v9605_v46 = vpop.f32.mrf.mxu0 }
0x107e   : > { %v4351_v47 = vadd.f32 %v9605_v46, %v8593_v6  ;;  %v11166_v46 = vld [vmem:[%s11427_s2 + $0x28] sm:$0xff] }
0x107f   : > { %v4345_v50 = vpop.f32.mrf.mxu0 }
0x1080   : > { %v4346_v9 = vadd.f32 %v8593_v6, %v4345_v50  ;;  %v4355_v3 = vadd.f32 %v4351_v47, %v3471_v49  ;;  %v4934_v6 = vld [vmem:[#allocation9 + $0x1a0] sm:$0xff]  ;;  %v5094_v47 = vld [vmem:[#allocation6 + $0x1d8] sm:$0xff]  ;;  %v5182_v49 = vld [vmem:[#allocation9 + $0x1d8] sm:$0xff] }
0x1081   : > { %v5093_v50 = vld [vmem:[#allocation6 + $0x1d0] sm:$0xff] }
0x1082   : > { %v4354_v12 = vadd.f32 %v4346_v9, %v3466_v2  ;;  %v4357_v53 = vmul.f32 %v4355_v3, %v10793_v10  ;;  %v5181_v2 = vld [vmem:[#allocation9 + $0x1d0] sm:$0xff]  ;;  %v5092_v9 = vld [vmem:[#allocation6 + $0x1c8] sm:$0xff]  ;;  %v5180_v3 = vld [vmem:[#allocation9 + $0x1c8] sm:$0xff] }
0x1084   : > { %v4356_v52 = vmul.f32 %v4354_v12, %v10795_v11  ;;  %v5091_v12 = vld [vmem:[#allocation6 + $0x1c0] sm:$0xff] }
0x1086   : > { %9614 = vmatprep.mubr.msk.f32.mxu1 %vm846_vm3, %v4356_v52  ;;  %v5179_v52 = vld [vmem:[#allocation9 + $0x1c0] sm:$0xff] }
0x1087   : > { %9615 = vmatmul.mubr.msk.f32.vlgmr.msra.gmra.mxu1 %vm846_vm3, %v4357_v53 }
0x1088   : > { %9626 = vmatprep.mubr.msk.f32.mxu1 %vm760_vm2, %v11086_v55 }
0x1147   : > { %v9616_v20 = vpop.f32.mrf.mxu1 }
0x1148   : > { %v4449_v1 = vadd.f32 %v9616_v20, %v8601_v57 }
0x1149   : > { %v4443_v62 = vpop.f32.mrf.mxu1 }
0x114a   : > { %v4444_v4 = vadd.f32 %v8601_v57, %v4443_v62  ;;  %v4453_v21 = vmul.f32 %v4449_v1, %v10793_v10 }
0x114c   : > { %v4452_v7 = vmul.f32 %v4444_v4, %v10795_v11  ;;  %v4457_v15 = vadd.f32 %v4455_v14, %v4453_v21  ;;  %v5280_v4 = vld [vmem:[#allocation13 + $0x98] sm:$0xff]  ;;  %v5278_v21 = vld [vmem:[#allocation13 + $0x88] sm:$0xff]  ;;  %v5277_v14 = vld [vmem:[#allocation13 + $0x80] sm:$0xff] }
0x114e   : > { %v4456_v13 = vadd.f32 %v4454_v5, %v4452_v7  ;;  %v8634_v5 = vld [vmem:[%s11434_s9 + $0x58] sm:$0xff]  ;;  %v5279_v7 = vld [vmem:[#allocation13 + $0x90] sm:$0xff] }
0x1150   : > { %4466 = vrot.lane.b32.xlu1 %v4456_v13, %s10529_s23  ;;  %4460 = vrot.lane.b32.xlu0 %v4456_v13, %s10530_s25  ;;  %v8632_v13 = vld [vmem:[%s11434_s9 + $0x48] sm:$0xff] }
0x1154   : > { %4468 = vrot.lane.b32.xlu1 %v4457_v15, %s10529_s23  ;;  %4462 = vrot.lane.b32.xlu0 %v4457_v15, %s10530_s25  ;;  %v8631_v15 = vld [vmem:[%s11434_s9 + $0x40] sm:$0xff] }
0x1158   : > { %4480 = vrot.lane.b32.xlu1 %v10974_v48, %s10529_s23  ;;  %4474 = vrot.lane.b32.xlu0 %v10974_v48, %s10530_s25  ;;  %v4667_v48 = vld [vmem:[#allocation6 + $0x198] sm:$0xff] }
0x1159   : > { %9629 = vmatprep.subr.mxu0 %v4667_v48 }
0x115c   : > { %4482 = vrot.lane.b32.xlu1 %v10979_v51, %s10529_s23  ;;  %4476 = vrot.lane.b32.xlu0 %v10979_v51, %s10530_s25  ;;  %v4665_v51 = vld [vmem:[#allocation6 + $0x188] sm:$0xff] }
0x11c2   : > { %v4467_v16 = vpop.permute.xlu1 %4466  ;;  %v4461_v17 = vpop.permute.xlu0 %4460 }
0x11c3   : > { %v11114_v19 = vsel %vm2575_vm4, %v4461_v17, %v4467_v16 }
0x11c4   : > { %9619 = vmatprep.mubr.msk.f32.mxu0 %vm658_vm1, %v11114_v19 }
0x11c6   : > { %v4469_v22 = vpop.permute.xlu1 %4468  ;;  %v4463_v23 = vpop.permute.xlu0 %4462 }
0x11c7   : > { %v11119_v24 = vsel %vm2575_vm4, %v4463_v23, %v4469_v22  ;;  %v8615_v22 = vld [vmem:[#allocation10 + $0x4] ss:$0 sm:$0xff] }
0x11c8   : > { %9620 = vmatmul.mubr.msk.f32.vlgmr.msra.gmra.mxu0 %vm658_vm1, %v11119_v24 }
0x11c9   : > { %9630 = vmatpush3.msra.mxu0 %v4667_v48 }
0x11ca   : > { %9631 = vmatprep.subr.mxu0 %v4666_v37 }
0x11cb   : > { %9632 = vmatpush3.msra.mxu0 %v4666_v37 }
0x11cc   : > { %9633 = vmatprep.subr.mxu0 %v4665_v51 }
0x11cd   : > { %9634 = vmatpush3.msra.mxu0 %v4665_v51 }
0x11ce   : > { %9635 = vmatprep.subr.mxu0 %v4664_v34 }
0x11cf   : > { %9636 = vmatpush3.msra.mxu0 %v4664_v34 }
0x11d0   : > { %9651 = vmatprep.subr.mxu0 %v4849_v58 }
0x1288   : > { %v9621_v26 = vpop.f32.mrf.mxu0 }
0x1289   : > { %v4579_v38 = vadd.f32 %v9621_v26, %v8604_v25 }
0x128a   : > { %v4573_v27 = vpop.f32.mrf.mxu0 }
0x128b   : > { %v11124_v28 = vmul.f32 %v4579_v38, %v10793_v10  ;;  %v4574_v29 = vadd.f32 %v8604_v25, %v4573_v27 }
0x128d   : > { %v11127_v30 = vmul.f32 %v4574_v29, %v10795_v11  ;;  %9622 = vmatprep.subr.mxu1 %v11124_v28 }
0x128e   : > { %9623 = vmatpush3.msra.mxu1 %v11124_v28 }
0x128f   : > { %9624 = vmatprep.subr.mxu1 %v11127_v30 }
0x1290   : > { %9625 = vmatpush3.msra.mxu1 %v11127_v30 }
0x1291   : > { %9627 = vmatmul.mubr.msk.f32.vlgmr.msra.gmra.mxu1 %vm760_vm2, %v11136_v32  ;;  %9640 = vmatprep.subr.mxu1 %v4761_v41 }
0x1292   : > { %9641 = vmatpush3.msra.mxu1 %v4761_v41 }
0x1293   : > { %9642 = vmatprep.subr.mxu1 %v4760_v31 }
0x1294   : > { %9643 = vmatpush3.msra.mxu1 %v4760_v31 }
0x1295   : > { %9644 = vmatprep.subr.mxu1 %v4759_v33 }
0x1296   : > { %9645 = vmatpush3.msra.mxu1 %v4759_v33 }
0x1297   : > { %9646 = vmatprep.subr.mxu1 %v4758_v56 }
0x1298   : > { %9647 = vmatpush3.msra.mxu1 %v4758_v56 }
0x1299   : > { %9662 = vmatprep.subr.mxu1 %v4937_v60 }
0x1351   : > { %v9628_v61 = vpop.f32.mrf.mxu1 }
0x1353   : > { %v4654_v36 = vpop.f32.mrf.mxu1 }
0x1354   : > { %9637 = vmatprep.mubr.msk.f32.mxu0 %vm846_vm3, %v4654_v36  ;;  %9648 = vmatprep.mubr.msk.f32.mxu1 %vm846_vm3, %v4654_v36 }
0x1355   : > { %9638 = vmatmul.mubr.msk.f32.vlgmr.msra.gmra.mxu0 %vm846_vm3, %v9628_v61  ;;  %9649 = vmatmul.mubr.msk.f32.vlgmr.msra.gmra.mxu1 %vm846_vm3, %v9628_v61 }
0x1356   : > { %9652 = vmatpush3.msra.mxu0 %v4849_v58  ;;  %9663 = vmatpush3.msra.mxu1 %v4937_v60 }
0x1357   : > { %9653 = vmatprep.subr.mxu0 %v4848_v39  ;;  %9659 = vmatprep.mubr.msk.f32.mxu0 %vm846_vm3, %v11127_v30 }
0x1358   : > { %9664 = vmatprep.subr.mxu1 %v4936_v40  ;;  %9670 = vmatprep.mubr.msk.f32.mxu1 %vm846_vm3, %v11127_v30 }
0x1359   : > { %9654 = vmatpush3.msra.mxu0 %v4848_v39  ;;  %9665 = vmatpush3.msra.mxu1 %v4936_v40 }
0x135a   : > { %9655 = vmatprep.subr.mxu0 %v4847_v42  ;;  %9666 = vmatprep.subr.mxu1 %v4935_v43 }
0x135b   : > { %9656 = vmatpush3.msra.mxu0 %v4847_v42  ;;  %9667 = vmatpush3.msra.mxu1 %v4935_v43 }
0x135c   : > { %9657 = vmatprep.subr.mxu0 %v4846_v44  ;;  %9668 = vmatprep.subr.mxu1 %v4934_v6 }
0x135d   : > { %9658 = vmatpush3.msra.mxu0 %v4846_v44  ;;  %9669 = vmatpush3.msra.mxu1 %v4934_v6 }
0x135e   : > { %9660 = vmatmul.mubr.msk.f32.vlgmr.msra.gmra.mxu0 %vm846_vm3, %v11124_v28  ;;  %9671 = vmatmul.mubr.msk.f32.vlgmr.msra.gmra.mxu1 %vm846_vm3, %v11124_v28 }
0x135f   : > { %9673 = vmatprep.subr.mxu0 %v11124_v28  ;;  %9677 = vmatprep.mubr.msk.f32.mxu0 %vm760_vm2, %v11156_v45 }
0x1360   : > { %9674 = vmatpush3.msra.mxu0 %v11124_v28  ;;  %9680 = vmatprep.subr.mxu1 %v5094_v47 }
0x1361   : > { %9675 = vmatprep.subr.mxu0 %v11127_v30  ;;  %9681 = vmatpush3.msra.mxu1 %v5094_v47 }
0x1362   : > { %9676 = vmatpush3.msra.mxu0 %v11127_v30  ;;  %9682 = vmatprep.subr.mxu1 %v5093_v50 }
0x1363   : > { %9678 = vmatmul.mubr.msk.f32.vlgmr.msra.gmra.mxu0 %vm760_vm2, %v11166_v46  ;;  %9691 = vmatprep.subr.mxu0 %v5182_v49 }
0x1364   : > { %9692 = vmatpush3.msra.mxu0 %v5182_v49  ;;  %9683 = vmatpush3.msra.mxu1 %v5093_v50  ;;  %v11193_v50 = vld [vmem:[%s11427_s2 + $0x30] sm:$0xff] }
0x1365   : > { %9693 = vmatprep.subr.mxu0 %v5181_v2  ;;  %9684 = vmatprep.subr.mxu1 %v5092_v9 }
0x1366   : > { %9694 = vmatpush3.msra.mxu0 %v5181_v2  ;;  %9685 = vmatpush3.msra.mxu1 %v5092_v9  ;;  %v5547_v2 = vld [vmem:[#allocation6 + $0x1f8] sm:$0xff]  ;;  %v5546_v9 = vld [vmem:[#allocation6 + $0x1f0] sm:$0xff] }
0x1367   : > { %9695 = vmatprep.subr.mxu0 %v5180_v3  ;;  %9686 = vmatprep.subr.mxu1 %v5091_v12 }
0x1368   : > { %9696 = vmatpush3.msra.mxu0 %v5180_v3  ;;  %9687 = vmatpush3.msra.mxu1 %v5091_v12  ;;  %v5545_v3 = vld [vmem:[#allocation6 + $0x1e8] sm:$0xff]  ;;  %v8635_v12 = vld [vmem:[#allocation12 + $0x2] ss:$0 sm:$0xff] }
0x1369   : > { %9697 = vmatprep.subr.mxu0 %v5179_v52  ;;  %9702 = vmatprep.subr.mxu1 %v5280_v4 }
0x136a   : > { %9698 = vmatpush3.msra.mxu0 %v5179_v52 }
0x136b   : > { %9713 = vmatprep.subr.mxu0 %v8634_v5 }
0x1415   : > { %v9639_v53 = vpop.f32.mrf.mxu0  ;;  %v9650_v16 = vpop.f32.mrf.mxu1 }
0x1416   : > { %v4756_v18 = vadd.f32 %v9639_v53, %v8612_v35  ;;  %v4844_v48 = vadd.f32 %v9650_v16, %v8615_v22  ;;  %v5727_v16 = vld [vmem:[#allocation6 + $0x208] sm:$0xff] }
0x1417   : > { %v4740_v54 = vpop.f32.mrf.mxu0  ;;  %v4828_v17 = vpop.f32.mrf.mxu1 }
0x1418   : > { %v4755_v57 = vadd.f32 %v8612_v35, %v4740_v54  ;;  %v4843_v51 = vadd.f32 %v8615_v22, %v4828_v17  ;;  %v5815_v17 = vld [vmem:[#allocation9 + $0x208] sm:$0xff]  ;;  %v5726_v22 = vld [vmem:[#allocation6 + $0x200] sm:$0xff] }
0x141e   : > { %v9661_v20 = vpop.f32.mrf.mxu0  ;;  %v9672_v23 = vpop.f32.mrf.mxu1 }
0x141f   : > { %v4932_v59 = vadd.f32 %v9661_v20, %v4756_v18  ;;  %v5014_v25 = vadd.f32 %v9672_v23, %v4844_v48  ;;  %v5814_v23 = vld [vmem:[#allocation9 + $0x200] sm:$0xff] }
0x1420   : > { %v4922_v62 = vpop.f32.mrf.mxu0  ;;  %v5004_v37 = vpop.f32.mrf.mxu1  ;;  %v11230_v48 = vld [vmem:[%s11427_s2 + $0x50] sm:$0xff] }
0x1421   : > { %v4931_v63 = vadd.f32 %v4922_v62, %v4755_v57  ;;  %v5013_v38 = vadd.f32 %v5004_v37, %v4843_v51  ;;  %v5641_v62 = vld [vmem:[#allocation9 + $0x1f8] sm:$0xff]  ;;  %v11238_v37 = vld [vmem:[%s11427_s2 + $0x58] sm:$0xff]  ;;  %v5974_v51 = vld [vmem:[#allocation6 + $0x238] sm:$0xff] }
0x1423   : > { %v9679_v0 = vpop.f32.mrf.mxu0 }
0x1425   : > { %v5081_v1 = vpop.f32.mrf.mxu0 }
0x1426   : > { %9688 = vmatprep.mubr.msk.f32.mxu1 %vm846_vm3, %v5081_v1  ;;  %9699 = vmatprep.mubr.msk.f32.mxu0 %vm846_vm3, %v5081_v1  ;;  %v5638_v1 = vld [vmem:[#allocation9 + $0x1e0] sm:$0xff] }
0x1427   : > { %9689 = vmatmul.mubr.msk.f32.vlgmr.msra.gmra.mxu1 %vm846_vm3, %v9679_v0  ;;  %9700 = vmatmul.mubr.msk.f32.vlgmr.msra.gmra.mxu0 %vm846_vm3, %v9679_v0  ;;  %v5544_v0 = vld [vmem:[#allocation6 + $0x1e0] sm:$0xff] }
0x1428   : > { %9703 = vmatpush3.msra.mxu1 %v5280_v4  ;;  %9714 = vmatpush3.msra.mxu0 %v8634_v5  ;;  %v5729_v4 = vld [vmem:[#allocation6 + $0x218] sm:$0xff]  ;;  %v5817_v5 = vld [vmem:[#allocation9 + $0x218] sm:$0xff] }
0x1429   : > { %9704 = vmatprep.subr.mxu1 %v5279_v7  ;;  %9715 = vmatprep.subr.mxu0 %v8633_v8 }
0x142a   : > { %9705 = vmatpush3.msra.mxu1 %v5279_v7  ;;  %9716 = vmatpush3.msra.mxu0 %v8633_v8 }
0x142b   : > { %9706 = vmatprep.subr.mxu1 %v5278_v21  ;;  %9717 = vmatprep.subr.mxu0 %v8632_v13 }
0x142c   : > { %9707 = vmatpush3.msra.mxu1 %v5278_v21  ;;  %9718 = vmatpush3.msra.mxu0 %v8632_v13 }
0x142d   : > { %9708 = vmatprep.subr.mxu1 %v5277_v14  ;;  %9719 = vmatprep.subr.mxu0 %v8631_v15 }
0x142e   : > { %9709 = vmatpush3.msra.mxu1 %v5277_v14  ;;  %9720 = vmatpush3.msra.mxu0 %v8631_v15  ;;  %v5728_v14 = vld [vmem:[#allocation6 + $0x210] sm:$0xff]  ;;  %v5816_v15 = vld [vmem:[#allocation9 + $0x210] sm:$0xff] }
0x142f   : > { %9731 = vmatprep.subr.mxu0 %v5547_v2 }
0x14e7   : > { %v9701_v26 = vpop.f32.mrf.mxu0  ;;  %v9690_v34 = vpop.f32.mrf.mxu1 }
0x14e8   : > { %v5259_v27 = vadd.f32 %v9701_v26, %v5014_v25  ;;  %v5177_v39 = vadd.f32 %v9690_v34, %v4932_v59  ;;  %v6062_v25 = vld [vmem:[#allocation9 + $0x238] sm:$0xff]  ;;  %v5973_v26 = vld [vmem:[#allocation6 + $0x230] sm:$0xff] }
0x14e9   : > { %v5249_v29 = vpop.f32.mrf.mxu0  ;;  %v5167_v56 = vpop.f32.mrf.mxu1  ;;  %v8642_v34 = vld [vmem:[#allocation7 + $0x5] ss:$0 sm:$0xff] }
0x14ea   : > { %v8627_v41 = vmul.f32 -1.442695, %v5259_v27  ;;  %v5258_v31 = vadd.f32 %v5249_v29, %v5013_v38  ;;  %v5176_v58 = vadd.f32 %v5167_v56, %v4931_v63  ;;  %v5640_v63 = vld [vmem:[#allocation9 + $0x1f0] sm:$0xff]  ;;  %v5972_v27 = vld [vmem:[#allocation6 + $0x228] sm:$0xff]  ;;  %v6060_v29 = vld [vmem:[#allocation9 + $0x228] sm:$0xff] }
0x14eb   : > { %v6061_v38 = vld [vmem:[#allocation9 + $0x230] sm:$0xff] }
0x14ec   : > { %10194 = vpow2.f32 %v8627_v41  ;;  %v8626_v33 = vmul.f32 -1.442695, %v5258_v31  ;;  %v5971_v41 = vld [vmem:[#allocation6 + $0x220] sm:$0xff]  ;;  %v6059_v31 = vld [vmem:[#allocation9 + $0x220] sm:$0xff] }
0x14ee   : > { %10196 = vpow2.f32 %v8626_v33 }
0x14ef   : > { %10198 = vtanh.f32 %v5176_v58 }
0x14f9   : > { %v10195_v60 = vpop.eup %10194 }
0x14fa   : > { %v5269_v61 = vadd.f32 1.0, %v10195_v60 }
0x14fb   : > { %v10197_v36 = vpop.eup %10196 }
0x14fc   : > { %v5268_v40 = vadd.f32 1.0, %v10197_v36  ;;  %10200 = vrcp.f32 %v5269_v61  ;;  %v10199_v42 = vpop.eup %10198 }
0x14fe   : > { %10202 = vrcp.f32 %v5268_v40 }
0x14ff   : > { %10204 = vtanh.f32 %v5177_v39 }
0x1509   : > { %v10201_v43 = vpop.eup %10200 }
0x150b   : > { %v10203_v44 = vpop.eup %10202 }
0x150c   : > { %v10205_v6 = vpop.eup %10204  ;;  %v5274_v47 = vmul.f32 %v10203_v44, %v10199_v42  ;;  %v6160_v44 = vld [vmem:[#allocation13 + $0xb8] sm:$0xff] }
0x150d   : > { %v5275_v49 = vmul.f32 %v10205_v6, %v10201_v43  ;;  %v6159_v6 = vld [vmem:[#allocation13 + $0xb0] sm:$0xff] }
0x150e   : > { %9710 = vmatprep.mubr.msk.f32.mxu1 %vm846_vm3, %v5274_v47  ;;  %9721 = vmatprep.mubr.msk.f32.mxu0 %vm846_vm3, %v5274_v47  ;;  %v6158_v47 = vld [vmem:[#allocation13 + $0xa8] sm:$0xff] }
0x150f   : > { %9711 = vmatmul.mubr.msk.f32.vlgmr.msra.gmra.mxu1 %vm846_vm3, %v5275_v49  ;;  %9722 = vmatmul.mubr.msk.f32.vlgmr.msra.gmra.mxu0 %vm846_vm3, %v5275_v49  ;;  %v6157_v49 = vld [vmem:[#allocation13 + $0xa0] sm:$0xff] }
0x1510   : > { %9728 = vmatprep.mubr.msk.f32.mxu1 %vm760_vm2, %v11193_v50  ;;  %9732 = vmatpush3.msra.mxu0 %v5547_v2 }
0x1511   : > { %9733 = vmatprep.subr.mxu0 %v5546_v9 }
0x1512   : > { %9734 = vmatpush3.msra.mxu0 %v5546_v9 }
0x1513   : > { %9735 = vmatprep.subr.mxu0 %v5545_v3 }
0x1514   : > { %9736 = vmatpush3.msra.mxu0 %v5545_v3  ;;  %v8645_v3 = vld [vmem:[#allocation10 + $0x5] ss:$0 sm:$0xff] }
0x1515   : > { %9737 = vmatprep.subr.mxu0 %v5544_v0 }
0x1516   : > { %9738 = vmatpush3.msra.mxu0 %v5544_v0 }
0x1517   : > { %9753 = vmatprep.subr.mxu0 %v5729_v4 }
0x15cf   : > { %v9723_v52 = vpop.f32.mrf.mxu0  ;;  %v11212_v7 = vpop.f32.mrf.mxu1 }
0x15d0   : > { %v5457_v53 = vadd.f32 %v9723_v52, %v8635_v12 }
0x15d1   : > { %v5451_v35 = vpop.f32.mrf.mxu0  ;;  %v11214_v8 = vpop.f32.mrf.mxu1 }
0x15d2   : > { %v5461_v54 = vadd.f32 %v5457_v53, %v11124_v28  ;;  %v5452_v18 = vadd.f32 %v8635_v12, %v5451_v35  ;;  %v11208_v28 = vld [vmem:[%s11427_s2 + $0x38] sm:$0xff] }
0x15d4   : > { %v11199_v20 = vmul.f32 %v5461_v54, %v10793_v10  ;;  %v5460_v57 = vadd.f32 %v5452_v18, %v11127_v30  ;;  %v5639_v30 = vld [vmem:[#allocation9 + $0x1e8] sm:$0xff] }
0x15d6   : > { %v5462_v59 = vmul.f32 %v5460_v57, %v10795_v11  ;;  %9724 = vmatprep.subr.mxu1 %v11199_v20 }
0x15d7   : > { %9725 = vmatpush3.msra.mxu1 %v11199_v20 }
0x15d8   : > { %9726 = vmatprep.subr.mxu1 %v5462_v59 }
0x15d9   : > { %9727 = vmatpush3.msra.mxu1 %v5462_v59 }
0x15da   : > { %9729 = vmatmul.mubr.msk.f32.vlgmr.msra.gmra.mxu1 %vm760_vm2, %v11208_v28  ;;  %9742 = vmatprep.subr.mxu1 %v5641_v62 }
0x15db   : > { %9743 = vmatpush3.msra.mxu1 %v5641_v62 }
0x15dc   : > { %9744 = vmatprep.subr.mxu1 %v5640_v63 }
0x15dd   : > { %9745 = vmatpush3.msra.mxu1 %v5640_v63 }
0x15de   : > { %9746 = vmatprep.subr.mxu1 %v5639_v30 }
0x15df   : > { %9747 = vmatpush3.msra.mxu1 %v5639_v30 }
0x15e0   : > { %9748 = vmatprep.subr.mxu1 %v5638_v1 }
0x15e1   : > { %9749 = vmatpush3.msra.mxu1 %v5638_v1 }
0x15e2   : > { %9764 = vmatprep.subr.mxu1 %v5817_v5 }
0x169a   : > { %v9730_v21 = vpop.f32.mrf.mxu1 }
0x169c   : > { %v5534_v13 = vpop.f32.mrf.mxu1 }
0x169d   : > { %9739 = vmatprep.mubr.msk.f32.mxu0 %vm846_vm3, %v5534_v13  ;;  %9750 = vmatprep.mubr.msk.f32.mxu1 %vm846_vm3, %v5534_v13 }
0x169e   : > { %9740 = vmatmul.mubr.msk.f32.vlgmr.msra.gmra.mxu0 %vm846_vm3, %v9730_v21  ;;  %9751 = vmatmul.mubr.msk.f32.vlgmr.msra.gmra.mxu1 %vm846_vm3, %v9730_v21 }
0x169f   : > { %9754 = vmatpush3.msra.mxu0 %v5729_v4  ;;  %9765 = vmatpush3.msra.mxu1 %v5817_v5 }
0x16a0   : > { %9755 = vmatprep.subr.mxu0 %v5728_v14  ;;  %9761 = vmatprep.mubr.msk.f32.mxu0 %vm846_vm3, %v5462_v59 }
0x16a1   : > { %9766 = vmatprep.subr.mxu1 %v5816_v15  ;;  %9772 = vmatprep.mubr.msk.f32.mxu1 %vm846_vm3, %v5462_v59 }
0x16a2   : > { %9756 = vmatpush3.msra.mxu0 %v5728_v14  ;;  %9767 = vmatpush3.msra.mxu1 %v5816_v15 }
0x16a3   : > { %9757 = vmatprep.subr.mxu0 %v5727_v16  ;;  %9768 = vmatprep.subr.mxu1 %v5815_v17 }
0x16a4   : > { %9758 = vmatpush3.msra.mxu0 %v5727_v16  ;;  %9769 = vmatpush3.msra.mxu1 %v5815_v17 }
0x16a5   : > { %9759 = vmatprep.subr.mxu0 %v5726_v22  ;;  %9770 = vmatprep.subr.mxu1 %v5814_v23 }
0x16a6   : > { %9760 = vmatpush3.msra.mxu0 %v5726_v22  ;;  %9771 = vmatpush3.msra.mxu1 %v5814_v23 }
0x16a7   : > { %9762 = vmatmul.mubr.msk.f32.vlgmr.msra.gmra.mxu0 %vm846_vm3, %v11199_v20  ;;  %9773 = vmatmul.mubr.msk.f32.vlgmr.msra.gmra.mxu1 %vm846_vm3, %v11199_v20 }
0x16a8   : > { %9775 = vmatprep.subr.mxu0 %v11199_v20  ;;  %9779 = vmatprep.mubr.msk.f32.mxu0 %vm760_vm2, %v11230_v48 }
0x16a9   : > { %9776 = vmatpush3.msra.mxu0 %v11199_v20  ;;  %9782 = vmatprep.subr.mxu1 %v5974_v51 }
0x16aa   : > { %9777 = vmatprep.subr.mxu0 %v5462_v59  ;;  %9783 = vmatpush3.msra.mxu1 %v5974_v51 }
0x16ab   : > { %9778 = vmatpush3.msra.mxu0 %v5462_v59  ;;  %9784 = vmatprep.subr.mxu1 %v5973_v26 }
0x16ac   : > { %9780 = vmatmul.mubr.msk.f32.vlgmr.msra.gmra.mxu0 %vm760_vm2, %v11238_v37  ;;  %9793 = vmatprep.subr.mxu0 %v6062_v25 }
0x16ad   : > { %9794 = vmatpush3.msra.mxu0 %v6062_v25  ;;  %9785 = vmatpush3.msra.mxu1 %v5973_v26  ;;  %v8664_v26 = vld [vmem:[%s11438_s13 + $0x58] sm:$0xff] }
0x16ae   : > { %9795 = vmatprep.subr.mxu0 %v6061_v38  ;;  %9786 = vmatprep.subr.mxu1 %v5972_v27 }
0x16af   : > { %9796 = vmatpush3.msra.mxu0 %v6061_v38  ;;  %9787 = vmatpush3.msra.mxu1 %v5972_v27  ;;  %v8663_v38 = vld [vmem:[%s11438_s13 + $0x50] sm:$0xff]  ;;  %v8662_v27 = vld [vmem:[%s11438_s13 + $0x48] sm:$0xff] }
0x16b0   : > { %9797 = vmatprep.subr.mxu0 %v6060_v29  ;;  %9788 = vmatprep.subr.mxu1 %v5971_v41 }
0x16b1   : > { %9798 = vmatpush3.msra.mxu0 %v6060_v29  ;;  %9789 = vmatpush3.msra.mxu1 %v5971_v41  ;;  %v8661_v29 = vld [vmem:[%s11438_s13 + $0x40] sm:$0xff] }
0x16b2   : > { %9799 = vmatprep.subr.mxu0 %v6059_v31  ;;  %9804 = vmatprep.subr.mxu1 %v6160_v44  ;;  %v8658_v41 = vld [vmem:[#allocation15 + $0x5] ss:$0 sm:$0xff] }
0x16b3   : > { %9800 = vmatpush3.msra.mxu0 %v6059_v31  ;;  %v8628_v31 = vld [vmem:[#allocation15 + $0x4] ss:$0 sm:$0xff] }
0x16b4   : > { %9815 = vmatprep.subr.mxu0 %v8664_v26 }
0x175e   : > { %v9741_v33 = vpop.f32.mrf.mxu0  ;;  %v9752_v2 = vpop.f32.mrf.mxu1 }
0x175f   : > { %v5636_v58 = vadd.f32 %v9741_v33, %v8642_v34  ;;  %v5724_v52 = vadd.f32 %v9752_v2, %v8645_v3 }
0x1760   : > { %v5620_v56 = vpop.f32.mrf.mxu0  ;;  %v5708_v9 = vpop.f32.mrf.mxu1 }
0x1761   : > { %v5635_v61 = vadd.f32 %v8642_v34, %v5620_v56  ;;  %v5723_v35 = vadd.f32 %v8645_v3, %v5708_v9  ;;  %v5367_v56 = vadd.f32 %v11212_v7, %v8628_v31  ;;  %v4481_v7 = vpop.permute.xlu1 %4480 }
0x1765   : > { %v4483_v2 = vpop.permute.xlu1 %4482 }
0x1767   : > { %v9763_v60 = vpop.f32.mrf.mxu0  ;;  %v9774_v12 = vpop.f32.mrf.mxu1 }
0x1768   : > { %v5812_v36 = vadd.f32 %v9763_v60, %v5636_v58  ;;  %v5894_v54 = vadd.f32 %v9774_v12, %v5724_v52  ;;  %v5362_v60 = vadd.f32 %v8628_v31, %v11214_v8  ;;  %v6743_v31 = vld [vmem:[#allocation6 + $0x268] sm:$0xff] }
0x1769   : > { %v5802_v39 = vpop.f32.mrf.mxu0  ;;  %v5884_v53 = vpop.f32.mrf.mxu1 }
0x176a   : > { %v5811_v40 = vadd.f32 %v5802_v39, %v5635_v61  ;;  %v5893_v20 = vadd.f32 %v5884_v53, %v5723_v35 }
0x176c   : > { %v9781_v42 = vpop.f32.mrf.mxu0 }
0x176e   : > { %v5961_v43 = vpop.f32.mrf.mxu0 }
0x176f   : > { %9790 = vmatprep.mubr.msk.f32.mxu1 %vm846_vm3, %v5961_v43  ;;  %9801 = vmatprep.mubr.msk.f32.mxu0 %vm846_vm3, %v5961_v43  ;;  %v6385_v43 = vld [vmem:[#allocation2 + $0x6] sm:$0x3] }
0x1770   : > { %9791 = vmatmul.mubr.msk.f32.vlgmr.msra.gmra.mxu1 %vm846_vm3, %v9781_v42  ;;  %9802 = vmatmul.mubr.msk.f32.vlgmr.msra.gmra.mxu0 %vm846_vm3, %v9781_v42 }
0x1771   : > { %9805 = vmatpush3.msra.mxu1 %v6160_v44  ;;  %9816 = vmatpush3.msra.mxu0 %v8664_v26  ;;  %v4475_v44 = vpop.permute.xlu0 %4474  ;;  %v6745_v26 = vld [vmem:[#allocation6 + $0x278] sm:$0xff] }
0x1772   : > { %9806 = vmatprep.subr.mxu1 %v6159_v6  ;;  %9817 = vmatprep.subr.mxu0 %v8663_v38 }
0x1773   : > { %9807 = vmatpush3.msra.mxu1 %v6159_v6  ;;  %9818 = vmatpush3.msra.mxu0 %v8663_v38  ;;  %v8666_v6 = vld [vmem:[%s11439_s14 + $0x2] ss:$0 sm:$0xff]  ;;  %v6833_v38 = vld [vmem:[#allocation9 + $0x278] sm:$0xff] }
0x1774   : > { %9808 = vmatprep.subr.mxu1 %v6158_v47  ;;  %9819 = vmatprep.subr.mxu0 %v8662_v27 }
0x1775   : > { %9809 = vmatpush3.msra.mxu1 %v6158_v47  ;;  %9820 = vmatpush3.msra.mxu0 %v8662_v27  ;;  %v4486_v47 = vsel %vm2575_vm4, %v4475_v44, %v4481_v7  ;;  %v4477_v9 = vpop.permute.xlu0 %4476 }
0x1776   : > { %9810 = vmatprep.subr.mxu1 %v6157_v49  ;;  %9821 = vmatprep.subr.mxu0 %v8661_v29  ;;  %v4487_v53 = vsel %vm2575_vm4, %v4477_v9, %v4483_v2 }
0x1777   : > { %9811 = vmatpush3.msra.mxu1 %v6157_v49  ;;  %9822 = vmatpush3.msra.mxu0 %v8661_v29 }
0x1778   : > { %9826 = vmatprep.subr.msk.mxu1 %vm665_vm0, %v6385_v43 }
0x1830   : > { %v9803_v18 = vpop.f32.mrf.mxu0  ;;  %v9792_v0 = vpop.f32.mrf.mxu1 }
0x1831   : > { %v6139_v57 = vadd.f32 %v9803_v18, %v5894_v54  ;;  %v6057_v14 = vadd.f32 %v9792_v0, %v5812_v36  ;;  %v6351_v18 = vmul.f32 %v4487_v53, %v10793_v10  ;;  %v8698_v53 = vld [vmem:[%s11434_s9 + $0x70] sm:$0xff] }
0x1832   : > { %v6129_v59 = vpop.f32.mrf.mxu0  ;;  %v6047_v1 = vpop.f32.mrf.mxu1 }
0x1833   : > { %v8657_v62 = vmul.f32 -1.442695, %v6139_v57  ;;  %v6138_v63 = vadd.f32 %v6129_v59, %v5893_v20  ;;  %v6056_v4 = vadd.f32 %v6047_v1, %v5811_v40  ;;  %v6561_v1 = vld [vmem:[#allocation6 + $0x248] sm:$0xff] }
0x1835   : > { %10206 = vpow2.f32 %v8657_v62  ;;  %v8656_v30 = vmul.f32 -1.442695, %v6138_v63 }
0x1837   : > { %10208 = vpow2.f32 %v8656_v30 }
0x1838   : > { %10210 = vtanh.f32 %v6056_v4  ;;  %v8669_v4 = vld [vmem:[#allocation4 + $0x3] ss:$0 sm:$0xff] }
0x1842   : > { %v10207_v5 = vpop.eup %10206 }
0x1843   : > { %v6149_v21 = vadd.f32 1.0, %v10207_v5 }
0x1844   : > { %v10209_v13 = vpop.eup %10208 }
0x1845   : > { %v6148_v15 = vadd.f32 1.0, %v10209_v13  ;;  %10212 = vrcp.f32 %v6149_v21  ;;  %v10211_v16 = vpop.eup %10210 }
0x1847   : > { %10214 = vrcp.f32 %v6148_v15 }
0x1848   : > { %10216 = vtanh.f32 %v6057_v14 }
0x1852   : > { %v10213_v17 = vpop.eup %10212 }
0x1854   : > { %v10215_v22 = vpop.eup %10214 }
0x1855   : > { %v10217_v23 = vpop.eup %10216  ;;  %v6154_v51 = vmul.f32 %v10215_v22, %v10211_v16  ;;  %v6656_v22 = vld [vmem:[#allocation9 + $0x250] sm:$0xff] }
0x1856   : > { %v6155_v25 = vmul.f32 %v10217_v23, %v10213_v17  ;;  %v6657_v17 = vld [vmem:[#allocation9 + $0x258] sm:$0xff]  ;;  %v6655_v23 = vld [vmem:[#allocation9 + $0x248] sm:$0xff] }
0x1857   : > { %9812 = vmatprep.mubr.msk.f32.mxu1 %vm846_vm3, %v6154_v51  ;;  %v6560_v51 = vld [vmem:[#allocation6 + $0x240] sm:$0xff] }
0x1858   : > { %9813 = vmatmul.mubr.msk.f32.vlgmr.msra.gmra.mxu1 %vm846_vm3, %v6155_v25  ;;  %v6654_v25 = vld [vmem:[#allocation9 + $0x240] sm:$0xff] }
0x1859   : > { %9827 = vmatpush3.msk.msra.mxu1 %vm665_vm0, %v6385_v43  ;;  %v8677_v43 = vld [vmem:[#allocation7 + $0x6] ss:$0 sm:$0xff] }
0x1918   : > { %v9814_v33 = vpop.f32.mrf.mxu1 }
0x1919   : > { %v6247_v34 = vadd.f32 %v9814_v33, %v8658_v41  ;;  %v6831_v33 = vld [vmem:[#allocation9 + $0x268] sm:$0xff] }
0x191a   : > { %v6241_v58 = vpop.f32.mrf.mxu1 }
0x191b   : > { %v6242_v61 = vadd.f32 %v8658_v41, %v6241_v58  ;;  %v6251_v36 = vadd.f32 %v6247_v34, %v5367_v56  ;;  %v6832_v41 = vld [vmem:[#allocation9 + $0x270] sm:$0xff]  ;;  %v6742_v34 = vld [vmem:[#allocation6 + $0x260] sm:$0xff]  ;;  %v6830_v56 = vld [vmem:[#allocation9 + $0x260] sm:$0xff] }
0x191c   : > { %v6990_v58 = vld [vmem:[#allocation6 + $0x298] sm:$0xff] }
0x191d   : > { %v6250_v39 = vadd.f32 %v6242_v61, %v5362_v60  ;;  %v6253_v42 = vmul.f32 %v6251_v36, %v10793_v10  ;;  %v7078_v60 = vld [vmem:[#allocation9 + $0x298] sm:$0xff]  ;;  %v6989_v61 = vld [vmem:[#allocation6 + $0x290] sm:$0xff]  ;;  %v7077_v36 = vld [vmem:[#allocation9 + $0x290] sm:$0xff] }
0x191f   : > { %v6252_v40 = vmul.f32 %v6250_v39, %v10795_v11  ;;  %v7076_v39 = vld [vmem:[#allocation9 + $0x288] sm:$0xff] }
0x1921   : > { %9823 = vmatprep.mubr.msk.f32.mxu0 %vm846_vm3, %v6252_v40  ;;  %v6987_v40 = vld [vmem:[#allocation6 + $0x280] sm:$0xff] }
0x1922   : > { %9824 = vmatmul.mubr.msk.f32.vlgmr.msra.gmra.mxu0 %vm846_vm3, %v6253_v42 }
0x1923   : > { %9835 = vmatprep.mubr.msk.f32.mxu0 %vm760_vm2, %v11086_v55  ;;  %v6350_v55 = vmul.f32 %v4486_v47, %v10795_v11 }
0x19e2   : > { %v9825_v8 = vpop.f32.mrf.mxu0 }
0x19e3   : > { %v6345_v3 = vadd.f32 %v9825_v8, %v8666_v6 }
0x19e4   : > { %v6339_v49 = vpop.f32.mrf.mxu0 }
0x19e5   : > { %v6340_v12 = vadd.f32 %v8666_v6, %v6339_v49  ;;  %v6349_v35 = vmul.f32 %v6345_v3, %v10793_v10 }
0x19e7   : > { %v6348_v52 = vmul.f32 %v6340_v12, %v10795_v11  ;;  %v6353_v20 = vadd.f32 %v6351_v18, %v6349_v35  ;;  %v7176_v12 = vld [vmem:[#allocation13 + $0xd8] sm:$0xff]  ;;  %v7174_v35 = vld [vmem:[#allocation13 + $0xc8] sm:$0xff]  ;;  %v7173_v18 = vld [vmem:[#allocation13 + $0xc0] sm:$0xff] }
0x19e9   : > { %v6352_v54 = vadd.f32 %v6350_v55, %v6348_v52  ;;  %v8699_v55 = vld [vmem:[%s11434_s9 + $0x78] sm:$0xff]  ;;  %v7175_v52 = vld [vmem:[#allocation13 + $0xd0] sm:$0xff] }
0x19eb   : > { %6362 = vrot.lane.b32.xlu1 %v6352_v54, %s10529_s23  ;;  %6356 = vrot.lane.b32.xlu0 %v6352_v54, %s10530_s25  ;;  %v8697_v54 = vld [vmem:[%s11434_s9 + $0x68] sm:$0xff] }
0x19ef   : > { %6364 = vrot.lane.b32.xlu1 %v6353_v20, %s10529_s23  ;;  %6358 = vrot.lane.b32.xlu0 %v6353_v20, %s10530_s25  ;;  %v8696_v20 = vld [vmem:[%s11434_s9 + $0x60] sm:$0xff] }
0x19f3   : > { %6372 = vrot.lane.b32.xlu1 %v11119_v24, %s10530_s25  ;;  %6370 = vrot.lane.b32.xlu0 %v11114_v19, %s10530_s25 }
0x19f7   : > { %6378 = vrot.lane.b32.xlu1 %v11119_v24, %s10529_s23  ;;  %6376 = vrot.lane.b32.xlu0 %v11114_v19, %s10529_s23  ;;  %v6563_v19 = vld [vmem:[#allocation6 + $0x258] sm:$0xff]  ;;  %v6562_v24 = vld [vmem:[#allocation6 + $0x250] sm:$0xff] }
0x19f8   : > { %9838 = vmatprep.subr.mxu1 %v6563_v19 }
0x1a5d   : > { %v6363_v57 = vpop.permute.xlu1 %6362  ;;  %v6357_v59 = vpop.permute.xlu0 %6356 }
0x1a5e   : > { %v6368_v62 = vsel %vm2575_vm4, %v6357_v59, %v6363_v57 }
0x1a5f   : > { %8266 = vrot.lane.b32.xlu0 %v6368_v62, %s10530_s25  ;;  %9828 = vmatprep.mubr.msk.f32.mxu1 %vm658_vm1, %v6368_v62 }
0x1a61   : > { %v6365_v63 = vpop.permute.xlu1 %6364  ;;  %v6359_v30 = vpop.permute.xlu0 %6358 }
0x1a62   : > { %v6369_v0 = vsel %vm2575_vm4, %v6359_v30, %v6365_v63 }
0x1a63   : > { %8272 = vrot.lane.b32.xlu0 %v6368_v62, %s10529_s23  ;;  %8268 = vrot.lane.b32.xlu1 %v6369_v0, %s10530_s25  ;;  %v8680_v62 = vld [vmem:[#allocation10 + $0x6] ss:$0 sm:$0xff] }
0x1a64   : > { %9829 = vmatmul.mubr.msk.f32.vlgmr.msra.gmra.mxu1 %vm658_vm1, %v6369_v0 }
0x1a65   : > { %9839 = vmatpush3.msra.mxu1 %v6563_v19 }
0x1a66   : > { %9840 = vmatprep.subr.mxu1 %v6562_v24 }
0x1a67   : > { %8274 = vrot.lane.b32.xlu1 %v6369_v0, %s10529_s23  ;;  %9841 = vmatpush3.msra.mxu1 %v6562_v24 }
0x1a68   : > { %9842 = vmatprep.subr.mxu1 %v6561_v1 }
0x1a69   : > { %9843 = vmatpush3.msra.mxu1 %v6561_v1 }
0x1a6a   : > { %9844 = vmatprep.subr.mxu1 %v6560_v51 }
0x1a6b   : > { %9845 = vmatpush3.msra.mxu1 %v6560_v51 }
0x1a6c   : > { %9860 = vmatprep.subr.mxu1 %v6745_v26 }
0x1b24   : > { %v9830_v5 = vpop.f32.mrf.mxu1 }
0x1b25   : > { %v6475_v21 = vadd.f32 %v9830_v5, %v8669_v4 }
0x1b26   : > { %v6469_v13 = vpop.f32.mrf.mxu1 }
0x1b27   : > { %v11300_v14 = vmul.f32 %v6475_v21, %v10793_v10  ;;  %v6470_v15 = vadd.f32 %v8669_v4, %v6469_v13 }
0x1b29   : > { %v11303_v16 = vmul.f32 %v6470_v15, %v10795_v11  ;;  %9831 = vmatprep.subr.mxu0 %v11300_v14 }
0x1b2a   : > { %9832 = vmatpush3.msra.mxu0 %v11300_v14 }
0x1b2b   : > { %9833 = vmatprep.subr.mxu0 %v11303_v16 }
0x1b2c   : > { %9834 = vmatpush3.msra.mxu0 %v11303_v16 }
0x1b2d   : > { %9836 = vmatmul.mubr.msk.f32.vlgmr.msra.gmra.mxu0 %vm760_vm2, %v11136_v32  ;;  %9849 = vmatprep.subr.mxu0 %v6657_v17  ;;  %v6744_v32 = vld [vmem:[#allocation6 + $0x270] sm:$0xff] }
0x1b2e   : > { %9850 = vmatpush3.msra.mxu0 %v6657_v17 }
0x1b2f   : > { %9851 = vmatprep.subr.mxu0 %v6656_v22 }
0x1b30   : > { %9852 = vmatpush3.msra.mxu0 %v6656_v22 }
0x1b31   : > { %9853 = vmatprep.subr.mxu0 %v6655_v23 }
0x1b32   : > { %9854 = vmatpush3.msra.mxu0 %v6655_v23 }
0x1b33   : > { %9855 = vmatprep.subr.mxu0 %v6654_v25 }
0x1b34   : > { %9856 = vmatpush3.msra.mxu0 %v6654_v25 }
0x1b35   : > { %9871 = vmatprep.subr.mxu0 %v6833_v38 }
0x1bed   : > { %v9837_v27 = vpop.f32.mrf.mxu0 }
0x1bef   : > { %v6550_v29 = vpop.f32.mrf.mxu0 }
0x1bf0   : > { %9846 = vmatprep.mubr.msk.f32.mxu1 %vm846_vm3, %v6550_v29  ;;  %9857 = vmatprep.mubr.msk.f32.mxu0 %vm846_vm3, %v6550_v29 }
0x1bf1   : > { %9847 = vmatmul.mubr.msk.f32.vlgmr.msra.gmra.mxu1 %vm846_vm3, %v9837_v27  ;;  %9858 = vmatmul.mubr.msk.f32.vlgmr.msra.gmra.mxu0 %vm846_vm3, %v9837_v27 }
0x1bf2   : > { %9861 = vmatpush3.msra.mxu1 %v6745_v26  ;;  %9872 = vmatpush3.msra.mxu0 %v6833_v38 }
0x1bf3   : > { %9862 = vmatprep.subr.mxu1 %v6744_v32  ;;  %9868 = vmatprep.mubr.msk.f32.mxu1 %vm846_vm3, %v11303_v16 }
0x1bf4   : > { %9873 = vmatprep.subr.mxu0 %v6832_v41  ;;  %9879 = vmatprep.mubr.msk.f32.mxu0 %vm846_vm3, %v11303_v16 }
0x1bf5   : > { %9863 = vmatpush3.msra.mxu1 %v6744_v32  ;;  %9874 = vmatpush3.msra.mxu0 %v6832_v41 }
0x1bf6   : > { %9864 = vmatprep.subr.mxu1 %v6743_v31  ;;  %9875 = vmatprep.subr.mxu0 %v6831_v33 }
0x1bf7   : > { %9865 = vmatpush3.msra.mxu1 %v6743_v31  ;;  %9876 = vmatpush3.msra.mxu0 %v6831_v33 }
0x1bf8   : > { %9866 = vmatprep.subr.mxu1 %v6742_v34  ;;  %9877 = vmatprep.subr.mxu0 %v6830_v56 }
0x1bf9   : > { %9867 = vmatpush3.msra.mxu1 %v6742_v34  ;;  %9878 = vmatpush3.msra.mxu0 %v6830_v56 }
0x1bfa   : > { %9869 = vmatmul.mubr.msk.f32.vlgmr.msra.gmra.mxu1 %vm846_vm3, %v11300_v14  ;;  %9880 = vmatmul.mubr.msk.f32.vlgmr.msra.gmra.mxu0 %vm846_vm3, %v11300_v14 }
0x1bfb   : > { %9882 = vmatprep.subr.mxu1 %v11300_v14  ;;  %9886 = vmatprep.mubr.msk.f32.mxu1 %vm760_vm2, %v11156_v45  ;;  %v6988_v45 = vld [vmem:[#allocation6 + $0x288] sm:$0xff] }
0x1bfc   : > { %9883 = vmatpush3.msra.mxu1 %v11300_v14  ;;  %9889 = vmatprep.subr.mxu0 %v6990_v58 }
0x1bfd   : > { %9884 = vmatprep.subr.mxu1 %v11303_v16  ;;  %9890 = vmatpush3.msra.mxu0 %v6990_v58  ;;  %v7443_v58 = vld [vmem:[#allocation6 + $0x2b8] sm:$0xff] }
0x1bfe   : > { %9885 = vmatpush3.msra.mxu1 %v11303_v16  ;;  %9891 = vmatprep.subr.mxu0 %v6989_v61 }
0x1bff   : > { %9887 = vmatmul.mubr.msk.f32.vlgmr.msra.gmra.mxu1 %vm760_vm2, %v11166_v46  ;;  %9900 = vmatprep.subr.mxu1 %v7078_v60  ;;  %v7075_v46 = vld [vmem:[#allocation9 + $0x280] sm:$0xff] }
0x1c00   : > { %9901 = vmatpush3.msra.mxu1 %v7078_v60  ;;  %9892 = vmatpush3.msra.mxu0 %v6989_v61  ;;  %v7442_v60 = vld [vmem:[#allocation6 + $0x2b0] sm:$0xff]  ;;  %v7441_v61 = vld [vmem:[#allocation6 + $0x2a8] sm:$0xff] }
0x1c01   : > { %9902 = vmatprep.subr.mxu1 %v7077_v36  ;;  %9893 = vmatprep.subr.mxu0 %v6988_v45 }
0x1c02   : > { %9903 = vmatpush3.msra.mxu1 %v7077_v36  ;;  %9894 = vmatpush3.msra.mxu0 %v6988_v45  ;;  %v8700_v36 = vld [vmem:[#allocation12 + $0x3] ss:$0 sm:$0xff] }
0x1c03   : > { %9904 = vmatprep.subr.mxu1 %v7076_v39  ;;  %9895 = vmatprep.subr.mxu0 %v6987_v40 }
0x1c04   : > { %9905 = vmatpush3.msra.mxu1 %v7076_v39  ;;  %9896 = vmatpush3.msra.mxu0 %v6987_v40 }
0x1c05   : > { %9906 = vmatprep.subr.mxu1 %v7075_v46  ;;  %9911 = vmatprep.subr.mxu0 %v7176_v12 }
0x1c06   : > { %9907 = vmatpush3.msra.mxu1 %v7075_v46 }
0x1c07   : > { %9922 = vmatprep.subr.mxu1 %v8699_v55 }
0x1cb1   : > { %v9848_v42 = vpop.f32.mrf.mxu1  ;;  %v9859_v57 = vpop.f32.mrf.mxu0 }
0x1cb2   : > { %v6652_v44 = vadd.f32 %v9848_v42, %v8677_v43  ;;  %v6740_v30 = vadd.f32 %v9859_v57, %v8680_v62  ;;  %v7869_v57 = vld [vmem:[#allocation6 + $0x2f0] sm:$0xff] }
0x1cb3   : > { %v6636_v7 = vpop.f32.mrf.mxu1  ;;  %v6724_v59 = vpop.f32.mrf.mxu0 }
0x1cb4   : > { %v6651_v6 = vadd.f32 %v8677_v43, %v6636_v7  ;;  %v6739_v19 = vadd.f32 %v8680_v62, %v6724_v59  ;;  %v7957_v59 = vld [vmem:[#allocation9 + $0x2f0] sm:$0xff]  ;;  %v7868_v62 = vld [vmem:[#allocation6 + $0x2e8] sm:$0xff] }
0x1cba   : > { %v9870_v8 = vpop.f32.mrf.mxu1  ;;  %v9881_v63 = vpop.f32.mrf.mxu0 }
0x1cbb   : > { %v6828_v47 = vadd.f32 %v9870_v8, %v6652_v44  ;;  %v6910_v24 = vadd.f32 %v9881_v63, %v6740_v30  ;;  %v7537_v44 = vld [vmem:[#allocation9 + $0x2b8] sm:$0xff]  ;;  %v7536_v8 = vld [vmem:[#allocation9 + $0x2b0] sm:$0xff] }
0x1cbc   : > { %v6818_v49 = vpop.f32.mrf.mxu1  ;;  %v6900_v0 = vpop.f32.mrf.mxu0  ;;  %v7867_v63 = vld [vmem:[#allocation6 + $0x2e0] sm:$0xff] }
0x1cbd   : > { %v6827_v2 = vadd.f32 %v6818_v49, %v6651_v6  ;;  %v6909_v4 = vadd.f32 %v6900_v0, %v6739_v19  ;;  %v7535_v6 = vld [vmem:[#allocation9 + $0x2a8] sm:$0xff]  ;;  %v7713_v49 = vld [vmem:[#allocation9 + $0x2d8] sm:$0xff] }
0x1cbe   : > { %v8707_v0 = vld [vmem:[#allocation7 + $0x7] ss:$0 sm:$0xff] }
0x1cbf   : > { %v9888_v9 = vpop.f32.mrf.mxu1 }
0x1cc1   : > { %v6977_v3 = vpop.f32.mrf.mxu1 }
0x1cc2   : > { %9897 = vmatprep.mubr.msk.f32.mxu0 %vm846_vm3, %v6977_v3  ;;  %9908 = vmatprep.mubr.msk.f32.mxu1 %vm846_vm3, %v6977_v3 }
0x1cc3   : > { %9898 = vmatmul.mubr.msk.f32.vlgmr.msra.gmra.mxu0 %vm846_vm3, %v9888_v9  ;;  %9909 = vmatmul.mubr.msk.f32.vlgmr.msra.gmra.mxu1 %vm846_vm3, %v9888_v9 }
0x1cc4   : > { %9912 = vmatpush3.msra.mxu0 %v7176_v12  ;;  %9923 = vmatpush3.msra.mxu1 %v8699_v55  ;;  %v7624_v12 = vld [vmem:[#allocation6 + $0x2d0] sm:$0xff]  ;;  %v7712_v55 = vld [vmem:[#allocation9 + $0x2d0] sm:$0xff] }
0x1cc5   : > { %9913 = vmatprep.subr.mxu0 %v7175_v52  ;;  %9924 = vmatprep.subr.mxu1 %v8698_v53 }
0x1cc6   : > { %9914 = vmatpush3.msra.mxu0 %v7175_v52  ;;  %9925 = vmatpush3.msra.mxu1 %v8698_v53  ;;  %v7623_v52 = vld [vmem:[#allocation6 + $0x2c8] sm:$0xff]  ;;  %v7711_v53 = vld [vmem:[#allocation9 + $0x2c8] sm:$0xff] }
0x1cc7   : > { %9915 = vmatprep.subr.mxu0 %v7174_v35  ;;  %9926 = vmatprep.subr.mxu1 %v8697_v54 }
0x1cc8   : > { %9916 = vmatpush3.msra.mxu0 %v7174_v35  ;;  %9927 = vmatpush3.msra.mxu1 %v8697_v54  ;;  %v7622_v35 = vld [vmem:[#allocation6 + $0x2c0] sm:$0xff]  ;;  %v7710_v54 = vld [vmem:[#allocation9 + $0x2c0] sm:$0xff] }
0x1cc9   : > { %9917 = vmatprep.subr.mxu0 %v7173_v18  ;;  %9928 = vmatprep.subr.mxu1 %v8696_v20 }
0x1cca   : > { %9918 = vmatpush3.msra.mxu0 %v7173_v18  ;;  %9929 = vmatpush3.msra.mxu1 %v8696_v20  ;;  %v7870_v18 = vld [vmem:[#allocation6 + $0x2f8] sm:$0xff]  ;;  %v7958_v20 = vld [vmem:[#allocation9 + $0x2f8] sm:$0xff] }
0x1ccb   : > { %9940 = vmatprep.subr.mxu1 %v7443_v58 }
0x1d83   : > { %v9910_v1 = vpop.f32.mrf.mxu1  ;;  %v9899_v22 = vpop.f32.mrf.mxu0 }
0x1d84   : > { %v7155_v5 = vadd.f32 %v9910_v1, %v6910_v24  ;;  %v7073_v27 = vadd.f32 %v9899_v22, %v6828_v47  ;;  %v7625_v47 = vld [vmem:[#allocation6 + $0x2d8] sm:$0xff]  ;;  %v8056_v22 = vld [vmem:[#allocation13 + $0xf8] sm:$0xff] }
0x1d85   : > { %v7145_v21 = vpop.f32.mrf.mxu1  ;;  %v7063_v23 = vpop.f32.mrf.mxu0 }
0x1d86   : > { %v8692_v13 = vmul.f32 -1.442695, %v7155_v5  ;;  %v7154_v15 = vadd.f32 %v7145_v21, %v6909_v4  ;;  %v7072_v51 = vadd.f32 %v7063_v23, %v6827_v2  ;;  %v8055_v23 = vld [vmem:[#allocation13 + $0xf0] sm:$0xff] }
0x1d88   : > { %10218 = vpow2.f32 %v8692_v13  ;;  %v8691_v17 = vmul.f32 -1.442695, %v7154_v15 }
0x1d8a   : > { %10220 = vpow2.f32 %v8691_v17 }
0x1d8b   : > { %10222 = vtanh.f32 %v7072_v51  ;;  %v8054_v51 = vld [vmem:[#allocation13 + $0xe8] sm:$0xff] }
0x1d95   : > { %v10219_v25 = vpop.eup %10218 }
0x1d96   : > { %v7165_v26 = vadd.f32 1.0, %v10219_v25  ;;  %v8053_v25 = vld [vmem:[#allocation13 + $0xe0] sm:$0xff] }
0x1d97   : > { %v10221_v38 = vpop.eup %10220 }
0x1d98   : > { %v7164_v29 = vadd.f32 1.0, %v10221_v38  ;;  %10224 = vrcp.f32 %v7165_v26  ;;  %v10223_v32 = vpop.eup %10222 }
0x1d9a   : > { %10226 = vrcp.f32 %v7164_v29 }
0x1d9b   : > { %10228 = vtanh.f32 %v7073_v27  ;;  %v8710_v27 = vld [vmem:[#allocation10 + $0x7] ss:$0 sm:$0xff] }
0x1da5   : > { %v10225_v41 = vpop.eup %10224 }
0x1da7   : > { %v10227_v31 = vpop.eup %10226 }
0x1da8   : > { %v10229_v33 = vpop.eup %10228  ;;  %v7170_v34 = vmul.f32 %v10227_v31, %v10223_v32 }
0x1da9   : > { %v7171_v56 = vmul.f32 %v10229_v33, %v10225_v41 }
0x1daa   : > { %9919 = vmatprep.mubr.msk.f32.mxu0 %vm846_vm3, %v7170_v34  ;;  %9930 = vmatprep.mubr.msk.f32.mxu1 %vm846_vm3, %v7170_v34 }
0x1dab   : > { %9920 = vmatmul.mubr.msk.f32.vlgmr.msra.gmra.mxu0 %vm846_vm3, %v7171_v56  ;;  %9931 = vmatmul.mubr.msk.f32.vlgmr.msra.gmra.mxu1 %vm846_vm3, %v7171_v56 }
0x1dac   : > { %9937 = vmatprep.mubr.msk.f32.mxu0 %vm760_vm2, %v11193_v50  ;;  %9941 = vmatpush3.msra.mxu1 %v7443_v58 }
0x1dad   : > { %9942 = vmatprep.subr.mxu1 %v7442_v60 }
0x1dae   : > { %9943 = vmatpush3.msra.mxu1 %v7442_v60 }
0x1daf   : > { %9944 = vmatprep.subr.mxu1 %v7441_v61 }
0x1db0   : > { %9945 = vmatpush3.msra.mxu1 %v7441_v61 }
0x1e6b   : > { %v9932_v45 = vpop.f32.mrf.mxu1  ;;  %v11359_v2 = vpop.f32.mrf.mxu0 }
0x1e6c   : > { %v7353_v39 = vadd.f32 %v9932_v45, %v8700_v36 }
0x1e6d   : > { %v7347_v40 = vpop.f32.mrf.mxu1 }
0x1e6e   : > { %v7357_v46 = vadd.f32 %v7353_v39, %v11300_v14  ;;  %v7348_v42 = vadd.f32 %v8700_v36, %v7347_v40  ;;  %v7440_v14 = vld [vmem:[#allocation6 + $0x2a0] sm:$0xff] }
0x1e6f   : > { %9946 = vmatprep.subr.mxu1 %v7440_v14 }
0x1e70   : > { %v7359_v43 = vmul.f32 %v7357_v46, %v10793_v10  ;;  %v7356_v50 = vadd.f32 %v7348_v42, %v11303_v16  ;;  %v7534_v16 = vld [vmem:[#allocation9 + $0x2a0] sm:$0xff]  ;;  %9947 = vmatpush3.msra.mxu1 %v7440_v14 }
0x1e71   : > { %9962 = vmatprep.subr.mxu1 %v7625_v47 }
0x1e72   : > { %v7358_v7 = vmul.f32 %v7356_v50, %v10795_v11  ;;  %9933 = vmatprep.subr.mxu0 %v7359_v43 }
0x1e73   : > { %9934 = vmatpush3.msra.mxu0 %v7359_v43 }
0x1e74   : > { %9935 = vmatprep.subr.mxu0 %v7358_v7 }
0x1e75   : > { %9936 = vmatpush3.msra.mxu0 %v7358_v7 }
0x1e76   : > { %9938 = vmatmul.mubr.msk.f32.vlgmr.msra.gmra.mxu0 %vm760_vm2, %v11208_v28  ;;  %9951 = vmatprep.subr.mxu0 %v7537_v44  ;;  %v11361_v28 = vpop.f32.mrf.mxu0 }
0x1e77   : > { %9952 = vmatpush3.msra.mxu0 %v7537_v44 }
0x1e78   : > { %9953 = vmatprep.subr.mxu0 %v7536_v8 }
0x1e79   : > { %9954 = vmatpush3.msra.mxu0 %v7536_v8 }
0x1e7a   : > { %9955 = vmatprep.subr.mxu0 %v7535_v6 }
0x1e7b   : > { %9956 = vmatpush3.msra.mxu0 %v7535_v6 }
0x1e7c   : > { %9957 = vmatprep.subr.mxu0 %v7534_v16 }
0x1e7d   : > { %9958 = vmatpush3.msra.mxu0 %v7534_v16 }
0x1e7e   : > { %9973 = vmatprep.subr.mxu0 %v7713_v49 }
0x1f36   : > { %v9939_v9 = vpop.f32.mrf.mxu0 }
0x1f38   : > { %v7430_v3 = vpop.f32.mrf.mxu0 }
0x1f39   : > { %9948 = vmatprep.mubr.msk.f32.mxu1 %vm846_vm3, %v7430_v3  ;;  %9959 = vmatprep.mubr.msk.f32.mxu0 %vm846_vm3, %v7430_v3  ;;  %v8728_v3 = vld [vmem:[%s11438_s13 + $0x70] sm:$0xff] }
0x1f3a   : > { %9949 = vmatmul.mubr.msk.f32.vlgmr.msra.gmra.mxu1 %vm846_vm3, %v9939_v9  ;;  %9960 = vmatmul.mubr.msk.f32.vlgmr.msra.gmra.mxu0 %vm846_vm3, %v9939_v9  ;;  %v8729_v9 = vld [vmem:[%s11438_s13 + $0x78] sm:$0xff] }
0x1f3b   : > { %9963 = vmatpush3.msra.mxu1 %v7625_v47  ;;  %9974 = vmatpush3.msra.mxu0 %v7713_v49 }
0x1f3c   : > { %9964 = vmatprep.subr.mxu1 %v7624_v12  ;;  %9970 = vmatprep.mubr.msk.f32.mxu1 %vm846_vm3, %v7358_v7 }
0x1f3d   : > { %9975 = vmatprep.subr.mxu0 %v7712_v55  ;;  %9981 = vmatprep.mubr.msk.f32.mxu0 %vm846_vm3, %v7358_v7 }
0x1f3e   : > { %9965 = vmatpush3.msra.mxu1 %v7624_v12  ;;  %9976 = vmatpush3.msra.mxu0 %v7712_v55  ;;  %v8727_v12 = vld [vmem:[%s11438_s13 + $0x68] sm:$0xff]  ;;  %v8726_v55 = vld [vmem:[%s11438_s13 + $0x60] sm:$0xff] }
0x1f3f   : > { %9966 = vmatprep.subr.mxu1 %v7623_v52  ;;  %9977 = vmatprep.subr.mxu0 %v7711_v53 }
0x1f40   : > { %9967 = vmatpush3.msra.mxu1 %v7623_v52  ;;  %9978 = vmatpush3.msra.mxu0 %v7711_v53  ;;  %v8723_v52 = vld [vmem:[#allocation15 + $0x7] ss:$0 sm:$0xff]  ;;  %v8693_v53 = vld [vmem:[#allocation15 + $0x6] ss:$0 sm:$0xff] }
0x1f41   : > { %9968 = vmatprep.subr.mxu1 %v7622_v35  ;;  %9979 = vmatprep.subr.mxu0 %v7710_v54 }
0x1f42   : > { %9969 = vmatpush3.msra.mxu1 %v7622_v35  ;;  %9980 = vmatpush3.msra.mxu0 %v7710_v54 }
0x1f43   : > { %9971 = vmatmul.mubr.msk.f32.vlgmr.msra.gmra.mxu1 %vm846_vm3, %v7359_v43  ;;  %9982 = vmatmul.mubr.msk.f32.vlgmr.msra.gmra.mxu0 %vm846_vm3, %v7359_v43 }
0x1f44   : > { %9984 = vmatprep.subr.mxu1 %v7359_v43  ;;  %9988 = vmatprep.mubr.msk.f32.mxu1 %vm760_vm2, %v11230_v48  ;;  %v7956_v48 = vld [vmem:[#allocation9 + $0x2e8] sm:$0xff] }
0x1f45   : > { %9985 = vmatpush3.msra.mxu1 %v7359_v43  ;;  %9991 = vmatprep.subr.mxu0 %v7870_v18 }
0x1f46   : > { %9986 = vmatprep.subr.mxu1 %v7358_v7  ;;  %9992 = vmatpush3.msra.mxu0 %v7870_v18  ;;  %v7263_v18 = vadd.f32 %v11359_v2, %v8693_v53  ;;  %v8731_v2 = vld [vmem:[%s11439_s14 + $0x3] ss:$0 sm:$0xff] }
0x1f47   : > { %9987 = vmatpush3.msra.mxu1 %v7358_v7  ;;  %9993 = vmatprep.subr.mxu0 %v7869_v57 }
0x1f48   : > { %9989 = vmatmul.mubr.msk.f32.vlgmr.msra.gmra.mxu1 %vm760_vm2, %v11238_v37  ;;  %10002 = vmatprep.subr.mxu1 %v7958_v20  ;;  %v7955_v37 = vld [vmem:[#allocation9 + $0x2e0] sm:$0xff] }
0x1f49   : > { %10003 = vmatpush3.msra.mxu1 %v7958_v20  ;;  %9994 = vmatpush3.msra.mxu0 %v7869_v57  ;;  %v7258_v57 = vadd.f32 %v8693_v53, %v11361_v28 }
0x1f4a   : > { %10004 = vmatprep.subr.mxu1 %v7957_v59  ;;  %9995 = vmatprep.subr.mxu0 %v7868_v62 }
0x1f4b   : > { %10005 = vmatpush3.msra.mxu1 %v7957_v59  ;;  %9996 = vmatpush3.msra.mxu0 %v7868_v62 }
0x1f4c   : > { %10006 = vmatprep.subr.mxu1 %v7956_v48  ;;  %9997 = vmatprep.subr.mxu0 %v7867_v63 }
0x1f4d   : > { %10007 = vmatpush3.msra.mxu1 %v7956_v48  ;;  %9998 = vmatpush3.msra.mxu0 %v7867_v63 }
0x1f4e   : > { %10008 = vmatprep.subr.mxu1 %v7955_v37  ;;  %10013 = vmatprep.subr.mxu0 %v8056_v22 }
0x1f4f   : > { %10009 = vmatpush3.msra.mxu1 %v7955_v37 }
0x1f50   : > { %10024 = vmatprep.subr.mxu1 %v8729_v9 }
0x1ffa   : > { %v9950_v30 = vpop.f32.mrf.mxu1  ;;  %v9961_v26 = vpop.f32.mrf.mxu0 }
0x1ffb   : > { %v7532_v24 = vadd.f32 %v9950_v30, %v8707_v0  ;;  %v7620_v32 = vadd.f32 %v9961_v26, %v8710_v27  ;;  %v6373_v30 = vpop.permute.xlu1 %6372 }
0x1ffc   : > { %v7516_v19 = vpop.f32.mrf.mxu1  ;;  %v7604_v38 = vpop.f32.mrf.mxu0 }
0x1ffd   : > { %v7531_v4 = vadd.f32 %v8707_v0, %v7516_v19  ;;  %v7619_v31 = vadd.f32 %v8710_v27, %v7604_v38  ;;  %v6371_v0 = vpop.permute.xlu0 %6370 }
0x1fff   : > { %v6379_v19 = vpop.permute.xlu1 %6378 }
0x2000   : > { %v6383_v28 = vsel %vm2575_vm4, %v6373_v30, %v6379_v19 }
0x2003   : > { %v9972_v1 = vpop.f32.mrf.mxu1  ;;  %v9983_v29 = vpop.f32.mrf.mxu0 }
0x2004   : > { %v7708_v5 = vadd.f32 %v9972_v1, %v7532_v24  ;;  %v7790_v33 = vadd.f32 %v9983_v29, %v7620_v32  ;;  %v6377_v24 = vpop.permute.xlu0 %6376 }
0x2005   : > { %v7698_v21 = vpop.f32.mrf.mxu1  ;;  %v7780_v41 = vpop.f32.mrf.mxu0 }
0x2006   : > { %v7707_v13 = vadd.f32 %v7698_v21, %v7531_v4  ;;  %v7789_v56 = vadd.f32 %v7780_v41, %v7619_v31 }
0x2008   : > { %v9990_v15 = vpop.f32.mrf.mxu1  ;;  %v8267_v26 = vpop.permute.xlu0 %8266 }
0x200a   : > { %v7857_v17 = vpop.f32.mrf.mxu1 }
0x200b   : > { %9999 = vmatprep.mubr.msk.f32.mxu0 %vm846_vm3, %v7857_v17  ;;  %10010 = vmatprep.mubr.msk.f32.mxu1 %vm846_vm3, %v7857_v17 }
0x200c   : > { %10000 = vmatmul.mubr.msk.f32.vlgmr.msra.gmra.mxu0 %vm846_vm3, %v9990_v15  ;;  %10011 = vmatmul.mubr.msk.f32.vlgmr.msra.gmra.mxu1 %vm846_vm3, %v9990_v15  ;;  %v8273_v29 = vpop.permute.xlu0 %8272 }
0x200d   : > { %10014 = vmatpush3.msra.mxu0 %v8056_v22  ;;  %10025 = vmatpush3.msra.mxu1 %v8729_v9 }
0x200e   : > { %10015 = vmatprep.subr.mxu0 %v8055_v23  ;;  %10026 = vmatprep.subr.mxu1 %v8728_v3 }
0x200f   : > { %10016 = vmatpush3.msra.mxu0 %v8055_v23  ;;  %10027 = vmatpush3.msra.mxu1 %v8728_v3  ;;  %v8269_v23 = vpop.permute.xlu1 %8268 }
0x2010   : > { %10017 = vmatprep.subr.mxu0 %v8054_v51  ;;  %10028 = vmatprep.subr.mxu1 %v8727_v12 }
0x2011   : > { %10018 = vmatpush3.msra.mxu0 %v8054_v51  ;;  %10029 = vmatpush3.msra.mxu1 %v8727_v12 }
0x2012   : > { %10019 = vmatprep.subr.mxu0 %v8053_v25  ;;  %10030 = vmatprep.subr.mxu1 %v8726_v55 }
0x2013   : > { %10020 = vmatpush3.msra.mxu0 %v8053_v25  ;;  %10031 = vmatpush3.msra.mxu1 %v8726_v55  ;;  %v8275_v27 = vpop.permute.xlu1 %8274 }
0x20cc   : > { %v10012_v34 = vpop.f32.mrf.mxu1  ;;  %v10001_v39 = vpop.f32.mrf.mxu0 }
0x20cd   : > { %v8035_v58 = vadd.f32 %v10012_v34, %v7790_v33  ;;  %v7953_v7 = vadd.f32 %v10001_v39, %v7708_v5  ;;  %v6382_v5 = vsel %vm2575_vm4, %v6371_v0, %v6377_v24 }
0x20ce   : > { %v8025_v60 = vpop.f32.mrf.mxu1  ;;  %v7943_v40 = vpop.f32.mrf.mxu0  ;;  %v8246_v22 = vmul.f32 %v6382_v5, %v10795_v11 }
0x20cf   : > { %v8722_v61 = vmul.f32 -1.442695, %v8035_v58  ;;  %v8034_v36 = vadd.f32 %v8025_v60, %v7789_v56  ;;  %v7952_v46 = vadd.f32 %v7943_v40, %v7707_v13  ;;  %v8247_v13 = vmul.f32 %v6383_v28, %v10793_v10 }
0x20d1   : > { %10230 = vpow2.f32 %v8722_v61  ;;  %v8721_v45 = vmul.f32 -1.442695, %v8034_v36 }
0x20d3   : > { %10232 = vpow2.f32 %v8721_v45 }
0x20d4   : > { %10234 = vtanh.f32 %v7952_v46 }
0x20de   : > { %v10231_v42 = vpop.eup %10230 }
0x20df   : > { %v8045_v43 = vadd.f32 1.0, %v10231_v42 }
0x20e0   : > { %v10233_v50 = vpop.eup %10232 }
0x20e1   : > { %v8044_v44 = vadd.f32 1.0, %v10233_v50  ;;  %10236 = vrcp.f32 %v8045_v43  ;;  %v10235_v8 = vpop.eup %10234 }
0x20e3   : > { %10238 = vrcp.f32 %v8044_v44 }
0x20e4   : > { %10240 = vtanh.f32 %v7953_v7 }
0x20ee   : > { %v10237_v6 = vpop.eup %10236 }
0x20f0   : > { %v10239_v14 = vpop.eup %10238 }
0x20f1   : > { %v10241_v16 = vpop.eup %10240  ;;  %v8050_v47 = vmul.f32 %v10239_v14, %v10235_v8 }
0x20f2   : > { %v8051_v49 = vmul.f32 %v10241_v16, %v10237_v6 }
0x20f3   : > { %10021 = vmatprep.mubr.msk.f32.mxu0 %vm846_vm3, %v8050_v47 }
0x20f4   : > { %10022 = vmatmul.mubr.msk.f32.vlgmr.msra.gmra.mxu0 %vm846_vm3, %v8051_v49 }
0x21b4   : > { %v10023_v35 = vpop.f32.mrf.mxu0 }
0x21b5   : > { %v8143_v54 = vadd.f32 %v10023_v35, %v8723_v52 }
0x21b6   : > { %v8137_v20 = vpop.f32.mrf.mxu0 }
0x21b7   : > { %v8138_v59 = vadd.f32 %v8723_v52, %v8137_v20  ;;  %v8147_v62 = vadd.f32 %v8143_v54, %v7263_v18 }
0x21b9   : > { %v8146_v48 = vadd.f32 %v8138_v59, %v7258_v57  ;;  %v8149_v37 = vmul.f32 %v8147_v62, %v10793_v10 }
0x21bb   : > { %v8148_v63 = vmul.f32 %v8146_v48, %v10795_v11 }
0x21bd   : > { %10032 = vmatprep.mubr.msk.f32.mxu1 %vm846_vm3, %v8148_v63 }
0x21be   : > { %10033 = vmatmul.mubr.msk.f32.vlgmr.msra.gmra.mxu1 %vm846_vm3, %v8149_v37 }
0x227e   : > { %v10034_v1 = vpop.f32.mrf.mxu1 }
0x227f   : > { %v8241_v4 = vadd.f32 %v10034_v1, %v8731_v2 }
0x2280   : > { %v8235_v21 = vpop.f32.mrf.mxu1 }
0x2281   : > { %v8245_v15 = vmul.f32 %v8241_v4, %v10793_v10  ;;  %v8236_v17 = vadd.f32 %v8731_v2, %v8235_v21  ;;  %v8279_v10 = vsel %vm2575_vm4, %v8269_v23, %v8275_v27 }
0x2283   : > { %v8244_v51 = vmul.f32 %v8236_v17, %v10795_v11  ;;  %v8249_v25 = vadd.f32 %v8247_v13, %v8245_v15  ;;  %v8278_v11 = vsel %vm2575_vm4, %v8267_v26, %v8273_v29 }
0x2285   : > { %8254 = vrot.lane.b32.xlu1 %v8249_v25, %s10530_s25  ;;  %v8248_v38 = vadd.f32 %v8246_v22, %v8244_v51 }
0x2287   : > { %8252 = vrot.lane.b32.xlu0 %v8248_v38, %s10530_s25  ;;  %s645_s25 = scalar_lea.vmem %s11440_s15, %s10766_s22 }
0x2289   : > { %8260 = vrot.lane.b32.xlu1 %v8249_v25, %s10529_s23 }
0x228b   : > { %8258 = vrot.lane.b32.xlu0 %v8248_v38, %s10529_s23 }
0x228d   : > { %8284 = vrot.lane.b32.xlu1 %v8279_v10, %s10531_s27 }
0x228f   : > { %8282 = vrot.lane.b32.xlu0 %v8278_v11, %s10531_s27 }
0x22f7   : > { %v8255_v32 = vpop.permute.xlu1 %8254 }
0x22f9   : > { %v8253_v41 = vpop.permute.xlu0 %8252 }
0x22fb   : > { %v8261_v31 = vpop.permute.xlu1 %8260 }
0x22fc   : > { %v8265_v34 = vsel %vm2575_vm4, %v8255_v32, %v8261_v31 }
0x22fd   : > { %v8259_v33 = vpop.permute.xlu0 %8258 }
0x22fe   : > { %v8264_v60 = vsel %vm2575_vm4, %v8253_v41, %v8259_v33 }
0x22ff   : > { %v8285_v56 = vpop.permute.xlu1 %8284 }
0x2300   : > { %v8289_v58 = vsel %vm658_vm1, %v8265_v34, %v8285_v56 }
0x2301   : > { %8292 = vst.msk [vmem:[%s645_s25 + $0x8] sm:$0xff] %vm8290_vm5, %v8289_v58  ;;  %v8283_v61 = vpop.permute.xlu0 %8282 }
0x2302   : > { %v8288_v36 = vsel %vm658_vm1, %v8264_v60, %v8283_v61 }
0x2303   : > { %8291 = vst.msk [vmem:[%s645_s25] sm:$0xff] %vm8290_vm5, %v8288_v36 }
0x2304 PF: > { %s30_s18 = sadd.s32 1, %s10510_s18  }
0x2305   : > { %p27_p2 = scmp.ge.s32.totalorder %s30_s18, 4  }
0x2307   :  { %29 = sbr.rel (!%p27_p2) target bundleno = 7 (0x7), region = 245 }
0x230c   :  { %8314 = vsyncpa [#allocation3], 1 }
0x230d   :  { %8316 = vsyncpa [#allocation3 + $0x1], 1 }
0x230e   :  { %8317 = vsyncpa [#allocation5], 1 }
0x230f   :  { %8318 = vsyncpa [#allocation8], 1 }
0x2310   :  { %8319 = vsyncpa [#allocation11], 1 }
0x2311   :  { %8320 = vsyncpa [#allocation14], 1 }

</bundles_post_ra>
